<compile_context>
chip_gen: v7x
topology: tpu7x:2x2x1
jax: 0.10.0
libtpu: 0.0.40
codegen_flags: <defaults>
</compile_context>

<pallas_src>
import functools

import jax
import jax.numpy as jnp
from jax.experimental import pallas as pl
from jax.experimental.pallas import tpu as pltpu


def _round_up(x, m):
    return (x + m - 1) // m * m


def _vmem_estimate(tile_n, kp, dp):
    """Rough per-step VMEM working-set estimate in bytes."""
    f32, bf16 = 4, 2
    io = 2 * 2 * tile_n * dp * f32                  # x in + q out, double-buffered
    cb = 2 * (kp * dp * (f32 + bf16) + kp * f32)    # f32 + bf16 codebook + e_sq
    inter = 6 * tile_n * kp * f32                   # dist / iota / one_hot / temps
    sse = 2 * dp * f32
    return io + cb + inter + sse + (1 << 20)


def _vq_kernel(n_valid, x_ref, esq_ref, ebf_ref, e_ref, q_ref, sse_ref):
    """Per-tile VQ: nearest-codebook lookup + quantize + partial SSE.

    x_ref  : (TN, Dp) f32   zero-padded flattened latents tile (lane-dense)
    esq_ref: (1, Kp)  f32   hoisted ||e_k||^2 (padded rows = huge, never win)
    ebf_ref: (Kp, Dp) bf16  codebook for the MXU distance matmul
    e_ref  : (Kp, Dp) f32   codebook for the exact one-hot gather
    q_ref  : (TN, Dp) f32   quantized output tile (lane-dense, unmasked store)
    sse_ref: (1, Dp)  f32   per-tile partial sum of squared error (lane-dense)
    """
    i = pl.program_id(0)
    x = x_ref[...]                                  # (TN, Dp)
    tn, dp = x.shape
    kp = e_ref.shape[0]

    # Distance up to the constant per-row ||x||^2 offset (cannot change the
    # argmin): dist[n, k] = ||e_k||^2 - 2 <x_n, e_k>.  bf16 MXU feed; near-tie
    # codewords could in principle resolve differently than a pure-f32 ref.
    xe = jax.lax.dot_general(
        x.astype(jnp.bfloat16), ebf_ref[...],
        (((1,), (1,)), ((), ())),
        preferred_element_type=jnp.float32)         # (TN, Kp)
    dist = esq_ref[...] - 2.0 * xe                  # (TN, Kp)

    # argmin with first-occurrence tie-break (matches torch.argmin).
    min_dist = jnp.min(dist, axis=1, keepdims=True)             # (TN, 1)
    iota_k = jax.lax.broadcasted_iota(jnp.int32, (tn, kp), 1)   # (TN, Kp)
    idx = jnp.min(jnp.where(dist == min_dist, iota_k, kp),
                  axis=1, keepdims=True)                        # (TN, 1)
    one_hot = (iota_k == idx).astype(jnp.float32)               # (TN, Kp)

    # Codeword gather as one_hot @ E, kept in f32 so quantized values are the
    # codebook rows (to f32-matmul accuracy).
    q = jnp.dot(one_hot, e_ref[...], preferred_element_type=jnp.float32)
    q_ref[...] = q

    # Per-tile partial SSE, reduced over rows only (sublane reduce) so the
    # store stays lane-dense and no per-step cross-lane scalar reduce runs.
    # Rows past the true N (grid padding) are masked out.
    row = jax.lax.broadcasted_iota(jnp.int32, (tn, 1), 0) + i * tn
    diff = (q - x) * (row < n_valid).astype(jnp.float32)
    sse_ref[...] = jnp.sum(diff * diff, axis=0, keepdims=True)  # (1, Dp)


def vector_quantize(latents, embedding, beta=0.25, tile_n=1024, lane_multiple=128):
    """Forward of VectorQuantizer.

    Args:
      latents:   [B, D, H, W] float32 (NCHW, PyTorch convention)
      embedding: [K, D] float32 codebook
    Returns:
      (quantized [B, D, H, W] float32, vq_loss scalar)
    """
    B, D, H, W = latents.shape
    K, D2 = embedding.shape
    assert D == D2
    N = B * H * W

    # Lane-dense padding of the embedding dim and codebook axis.  Use 256 for
    # full MXU tile occupancy on v6e/v7x if K, D are large; 128 keeps padding
    # waste minimal for small codebooks.
    Dp = _round_up(max(D, lane_multiple), lane_multiple)
    Kp = _round_up(max(K, lane_multiple), lane_multiple)

    # NCHW -> NHWC -> [N, D], zero-pad lane axis.
    x = jnp.transpose(latents, (0, 2, 3, 1)).reshape(N, D).astype(jnp.float32)
    x_p = jnp.pad(x, ((0, 0), (0, Dp - D)))

    e_f32 = embedding.astype(jnp.float32)
    e_p = jnp.pad(e_f32, ((0, Kp - K), (0, Dp - D)))
    e_bf = e_p.astype(jnp.bfloat16)
    # Hoisted codebook squared norms; padded rows get a huge value so the
    # argmin can never pick them.
    e_sq = jnp.sum(e_f32 * e_f32, axis=1)
    e_sq_p = jnp.pad(e_sq, (0, Kp - K), constant_values=1e30).reshape(1, Kp)

    # Tile sizing: large tiles amortize the ~0.35 us/step pipeline overhead;
    # shrink until the working set fits a conservative VMEM budget that is
    # safe on all generations (v7x has only 64 MiB physical / 32 MiB scoped).
    tile_n = max(8, min(_round_up(tile_n, 8), _round_up(N, 8)))
    vmem_budget = 28 * 1024 * 1024
    while tile_n > 8 and _vmem_estimate(tile_n, Kp, Dp) > vmem_budget:
        tile_n = max(8, _round_up(tile_n // 2, 8))
    Np = _round_up(N, tile_n)
    grid_n = Np // tile_n
    if Np != N:
        x_p = jnp.pad(x_p, ((0, Np - N), (0, 0)))

    kernel = functools.partial(_vq_kernel, N)

    q_p, sse_parts = pl.pallas_call(
        kernel,
        out_shape=(
            jax.ShapeDtypeStruct((Np, Dp), jnp.float32),
            jax.ShapeDtypeStruct((1, grid_n * Dp), jnp.float32),
        ),
        grid=(grid_n,),
        in_specs=[
            pl.BlockSpec((tile_n, Dp), lambda i: (i, 0)),   # latents tile
            pl.BlockSpec((1, Kp), lambda i: (0, 0)),        # hoisted ||e||^2
            pl.BlockSpec((Kp, Dp), lambda i: (0, 0)),       # codebook (bf16)
            pl.BlockSpec((Kp, Dp), lambda i: (0, 0)),       # codebook (f32)
        ],
        out_specs=(
            pl.BlockSpec((tile_n, Dp), lambda i: (i, 0)),   # quantized tile
            pl.BlockSpec((1, Dp), lambda i: (0, i)),        # per-tile SSE partials
        ),
        compiler_params=pltpu.CompilerParams(
            # No resident accumulator -> grid is fully parallel (2x on v7x).
            dimension_semantics=("parallel",),
            vmem_limit_bytes=32 * 1024 * 1024,
        ),
    )(x_p, e_sq_p, e_bf, e_p)

    # MSE over the true (unpadded) N*D elements; commitment and embedding
    # losses have identical forward values.
    sse = jnp.sum(sse_parts)
    mse = sse / jnp.float32(N * D)
    vq_loss = mse * beta + mse

    # Straight-through estimator: forward value == quantized latents.
    q = q_p[:N, :D].reshape(B, H, W, D)
    q_nchw = jnp.transpose(q, (0, 3, 1, 2))  # back to NCHW
    return q_nchw, vq_loss


if __name__ == "__main__":
    key = jax.random.PRNGKey(0)
    k_lat, k_emb = jax.random.split(key)

    B, D, H, W, K = 2, 4, 16, 16, 16
    beta = 0.25

    latents = jax.random.normal(k_lat, (B, D, H, W), dtype=jnp.float32)
    # nn.Embedding weight init: uniform(-1/K, 1/K)
    embedding = jax.random.uniform(
        k_emb, (K, D), dtype=jnp.float32, minval=-1.0 / K, maxval=1.0 / K
    )

    quantized, vq_loss = jax.jit(
        functools.partial(vector_quantize, beta=beta)
    )(latents, embedding)
    jax.block_until_ready((quantized, vq_loss))

    assert quantized.shape == (B, D, H, W)
    assert quantized.dtype == jnp.float32
    assert vq_loss.shape == ()
    assert bool(jnp.isfinite(vq_loss))

    # Every quantized vector must (to matmul precision) be a codebook row.
    q_nhwc = jnp.transpose(quantized, (0, 2, 3, 1)).reshape(-1, D)
    d = jnp.sum((q_nhwc[:, None, :] - embedding[None, :, :]) ** 2, axis=-1)
    assert float(jnp.max(jnp.min(d, axis=1))) < 1e-6

    print("KERNEL_OK")
</pallas_src>

<mosaic_0001>
module attributes {stable_mosaic.version = 11 : i64} {
  func.func @_vq_kernel(%arg0: i32, %arg1: memref<512x128xf32, #tpu.memory_space<vmem>>, %arg2: memref<1x128xf32, #tpu.memory_space<vmem>>, %arg3: memref<128x128xbf16, #tpu.memory_space<vmem>>, %arg4: memref<128x128xf32, #tpu.memory_space<vmem>>, %arg5: memref<512x128xf32, #tpu.memory_space<vmem>>, %arg6: memref<1x128xf32, #tpu.memory_space<vmem>>) attributes {dimension_semantics = [#tpu.dimension_semantics<parallel>], iteration_bounds = array<i64: 1>, scalar_prefetch = 0 : i64, scratch_operands = 0 : i64, tpu.core_type = #tpu.core_type<tc>, window_params = [{transform_indices = @transform_0, window_bounds = array<i64: 512, 128>}, {pipeline_mode = #tpu.pipeline_mode<synchronous>, transform_indices = @transform_1, window_bounds = array<i64: 1, 128>}, {pipeline_mode = #tpu.pipeline_mode<synchronous>, transform_indices = @transform_2, window_bounds = array<i64: 128, 128>}, {pipeline_mode = #tpu.pipeline_mode<synchronous>, transform_indices = @transform_3, window_bounds = array<i64: 128, 128>}, {transform_indices = @transform_4, window_bounds = array<i64: 512, 128>}, {transform_indices = @transform_5, window_bounds = array<i64: 1, 128>}]} {
    %c0 = arith.constant 0 : index
    %c0_0 = arith.constant 0 : index
    %0 = vector.load %arg1[%c0, %c0_0] : memref<512x128xf32, #tpu.memory_space<vmem>>, vector<512x128xf32>
    %1 = arith.truncf %0 : vector<512x128xf32> to vector<512x128xbf16>
    %c0_1 = arith.constant 0 : index
    %c0_2 = arith.constant 0 : index
    %2 = vector.load %arg3[%c0_1, %c0_2] : memref<128x128xbf16, #tpu.memory_space<vmem>>, vector<128x128xbf16>
    %cst = arith.constant dense<0.000000e+00> : vector<512x128xf32>
    %3 = tpu.matmul %1, %2, %cst {dimension_numbers = #tpu.dot_dimension_numbers<[1], [1], [0], [0], [0, 0, 1, 0], [], []>} : vector<512x128xbf16>, vector<128x128xbf16>, vector<512x128xf32> -> vector<512x128xf32>
    %c0_3 = arith.constant 0 : index
    %c0_4 = arith.constant 0 : index
    %4 = vector.load %arg2[%c0_3, %c0_4] : memref<1x128xf32, #tpu.memory_space<vmem>>, vector<1x128xf32>
    %cst_5 = arith.constant 2.000000e+00 : f32
    %5 = vector.broadcast %cst_5 : f32 to vector<512x128xf32>
    %6 = arith.mulf %5, %3 : vector<512x128xf32>
    %7 = vector.broadcast %4 : vector<1x128xf32> to vector<512x128xf32>
    %8 = arith.subf %7, %6 : vector<512x128xf32>
    %cst_6 = arith.constant dense<0x7F800000> : vector<512xf32>
    %9 = vector.multi_reduction <minimumf>, %8, %cst_6 [1] : vector<512x128xf32> to vector<512xf32>
    %10 = vector.shape_cast %9 : vector<512xf32> to vector<512x1xf32>
    %11 = tpu.iota {dimensions = array<i32: 1>} : vector<512x128xi32>
    %12 = vector.broadcast %10 : vector<512x1xf32> to vector<512x128xf32>
    %13 = arith.cmpf oeq, %8, %12 : vector<512x128xf32>
    %c128_i32 = arith.constant 128 : i32
    %14 = vector.broadcast %c128_i32 : i32 to vector<512x128xi32>
    %15 = arith.select %13, %11, %14 : vector<512x128xi1>, vector<512x128xi32>
    %cst_7 = arith.constant dense<2147483647> : vector<512xi32>
    %16 = vector.multi_reduction <minsi>, %15, %cst_7 [1] : vector<512x128xi32> to vector<512xi32>
    %17 = vector.shape_cast %16 : vector<512xi32> to vector<512x1xi32>
    %18 = vector.broadcast %17 : vector<512x1xi32> to vector<512x128xi32>
    %19 = arith.cmpi eq, %11, %18 : vector<512x128xi32>
    %20 = arith.extui %19 : vector<512x128xi1> to vector<512x128xi32>
    %21 = arith.sitofp %20 : vector<512x128xi32> to vector<512x128xf32>
    %c0_8 = arith.constant 0 : index
    %c0_9 = arith.constant 0 : index
    %22 = vector.load %arg4[%c0_8, %c0_9] : memref<128x128xf32, #tpu.memory_space<vmem>>, vector<128x128xf32>
    %cst_10 = arith.constant dense<0.000000e+00> : vector<512x128xf32>
    %23 = tpu.matmul %21, %22, %cst_10 {dimension_numbers = #tpu.dot_dimension_numbers<[1], [0], [0], [1], [0, 0, 1, 1], [], []>} : vector<512x128xf32>, vector<128x128xf32>, vector<512x128xf32> -> vector<512x128xf32>
    %c0_11 = arith.constant 0 : index
    %c0_12 = arith.constant 0 : index
    %24 = vector.load %arg5[%c0_11, %c0_12] : memref<512x128xf32, #tpu.memory_space<vmem>>, vector<512x128xf32>
    tpu.vector_store %arg5[%c0_11, %c0_12], %23 {strides = array<i32>} : memref<512x128xf32, #tpu.memory_space<vmem>>, vector<512x128xf32>,
    %25 = tpu.iota {dimensions = array<i32: 0>} : vector<512x1xi32>
    %c512_i32 = arith.constant 512 : i32
    %26 = arith.muli %arg0, %c512_i32 : i32
    %27 = vector.broadcast %26 : i32 to vector<512x1xi32>
    %28 = arith.addi %25, %27 : vector<512x1xi32>
    %29 = arith.subf %23, %0 : vector<512x128xf32>
    %c512_i32_13 = arith.constant 512 : i32
    %30 = vector.broadcast %c512_i32_13 : i32 to vector<512x1xi32>
    %31 = arith.cmpi slt, %28, %30 : vector<512x1xi32>
    %32 = arith.extui %31 : vector<512x1xi1> to vector<512x1xi32>
    %33 = arith.sitofp %32 : vector<512x1xi32> to vector<512x1xf32>
    %34 = vector.broadcast %33 : vector<512x1xf32> to vector<512x128xf32>
    %35 = arith.mulf %29, %34 : vector<512x128xf32>
    %36 = arith.mulf %35, %35 : vector<512x128xf32>
    %cst_14 = arith.constant dense<0.000000e+00> : vector<128xf32>
    %37 = vector.multi_reduction <add>, %36, %cst_14 [0] : vector<512x128xf32> to vector<128xf32>
    %38 = vector.shape_cast %37 : vector<128xf32> to vector<1x128xf32>
    %c0_15 = arith.constant 0 : index
    %c0_16 = arith.constant 0 : index
    %39 = vector.load %arg6[%c0_15, %c0_16] : memref<1x128xf32, #tpu.memory_space<vmem>>, vector<1x128xf32>
    tpu.vector_store %arg6[%c0_15, %c0_16], %38 {strides = array<i32>} : memref<1x128xf32, #tpu.memory_space<vmem>>, vector<1x128xf32>,
    return
  }
  func.func @transform_0(%arg0: i32) -> (i32, i32) {
    %c0_i32 = arith.constant 0 : i32
    %c0_i32_0 = arith.constant 0 : i32
    return %arg0, %c0_i32 : i32, i32
  }
  func.func @transform_1(%arg0: i32) -> (i32, i32) {
    %c0_i32 = arith.constant 0 : i32
    %c0_i32_0 = arith.constant 0 : i32
    %c0_i32_1 = arith.constant 0 : i32
    return %c0_i32, %c0_i32_0 : i32, i32
  }
  func.func @transform_2(%arg0: i32) -> (i32, i32) {
    %c0_i32 = arith.constant 0 : i32
    %c0_i32_0 = arith.constant 0 : i32
    %c0_i32_1 = arith.constant 0 : i32
    return %c0_i32, %c0_i32_0 : i32, i32
  }
  func.func @transform_3(%arg0: i32) -> (i32, i32) {
    %c0_i32 = arith.constant 0 : i32
    %c0_i32_0 = arith.constant 0 : i32
    %c0_i32_1 = arith.constant 0 : i32
    return %c0_i32, %c0_i32_0 : i32, i32
  }
  func.func @transform_4(%arg0: i32) -> (i32, i32) {
    %c0_i32 = arith.constant 0 : i32
    %c0_i32_0 = arith.constant 0 : i32
    return %arg0, %c0_i32 : i32, i32
  }
  func.func @transform_5(%arg0: i32) -> (i32, i32) {
    %c0_i32 = arith.constant 0 : i32
    %c0_i32_0 = arith.constant 0 : i32
    return %c0_i32, %arg0 : i32, i32
  }
}

</mosaic_0001>

<bundles_post_ra>
// kernel: vector_quantize.1
= control target key start
LH: loop header
LB: loop body
LE: loop exit
PB: predicated region body
PF: predicated region fallthrough
CT: control target
= control target key end

     0   :  { %s5553_s2 = inlined_call_operand.vmem [shape: bf16[128,128], index: 2, kind: input, shape index: {}]   ;;  %s5554_s0 = inlined_call_operand.vmem [shape: f32[512,128], index: 0, kind: input, shape index: {}]   ;;  %s5555_s1 = inlined_call_operand.vmem [shape: f32[1,128], index: 1, kind: input, shape index: {}]   ;;  %s5556_s3 = inlined_call_operand.vmem [shape: f32[128,128], index: 3, kind: input, shape index: {}]   ;;  %s5557_s4 = inlined_call_operand.vmem [shape: f32[512,128], index: 4, kind: output, shape index: {0}]   ;;  %s5558_s5 = inlined_call_operand.vmem [shape: f32[1,128], index: 5, kind: output, shape index: {1}]  }
   0x1   :  { %v3506_v0 = vld [vmem:[%s5553_s2] sm:$0xff]   ;;  %v3507_v1 = vld [vmem:[%s5553_s2 + $0x8] sm:$0xff]   ;;  %v3508_v2 = vld [vmem:[%s5553_s2 + $0x10] sm:$0xff]  }
   0x2   :  { %3265 = vmatprep.subr.bf16.mxu0 %v3506_v0  ;;  %v20_v3 = vld [vmem:[%s5554_s0] sm:$0xff]  ;;  %v21_v4 = vld [vmem:[%s5554_s0 + $0x8] sm:$0xff]  ;;  %v3509_v6 = vld [vmem:[%s5553_s2 + $0x18] sm:$0xff]  }
   0x3   :  { %3266 = vmatpush3.bf16.xpose.msra.mxu0 %v3506_v0  ;;  %v84_v5 = vpack.c.bf16 %v21_v4, %v20_v3  ;;  %v3510_v7 = vld [vmem:[%s5553_s2 + $0x20] sm:$0xff]   ;;  %v3511_v8 = vld [vmem:[%s5553_s2 + $0x28] sm:$0xff]   ;;  %v3512_v9 = vld [vmem:[%s5553_s2 + $0x30] sm:$0xff]  }
   0x4   :  { %3267 = vmatprep.subr.bf16.mxu0 %v3507_v1  ;;  %v3513_v10 = vld [vmem:[%s5553_s2 + $0x38] sm:$0xff]   ;;  %v22_v11 = vld [vmem:[%s5554_s0 + $0x10] sm:$0xff]  ;;  %v24_v13 = vld [vmem:[%s5554_s0 + $0x20] sm:$0xff] }
   0x5   :  { %3281 = vmatprep.mubr.bf16.mxu0 %v84_v5  ;;  %v23_v12 = vld [vmem:[%s5554_s0 + $0x18] sm:$0xff]  ;;  %v25_v14 = vld [vmem:[%s5554_s0 + $0x28] sm:$0xff]  ;;  %v26_v17 = vld [vmem:[%s5554_s0 + $0x30] sm:$0xff] }
   0x6   :  { %v85_v15 = vpack.c.bf16 %v23_v12, %v22_v11  ;;  %v86_v16 = vpack.c.bf16 %v25_v14, %v24_v13  ;;  %v27_v18 = vld [vmem:[%s5554_s0 + $0x38] sm:$0xff]  ;;  %v28_v19 = vld [vmem:[%s5554_s0 + $0x40] sm:$0xff]  ;;  %v29_v20 = vld [vmem:[%s5554_s0 + $0x48] sm:$0xff] }
   0x7   :  { %v87_v21 = vpack.c.bf16 %v27_v18, %v26_v17  ;;  %v88_v22 = vpack.c.bf16 %v29_v20, %v28_v19  ;;  %v30_v23 = vld [vmem:[%s5554_s0 + $0x50] sm:$0xff]  ;;  %v31_v24 = vld [vmem:[%s5554_s0 + $0x58] sm:$0xff]  ;;  %v32_v25 = vld [vmem:[%s5554_s0 + $0x60] sm:$0xff] }
   0x8   :  { %v33_v26 = vld [vmem:[%s5554_s0 + $0x68] sm:$0xff]  ;;  %v89_v27 = vpack.c.bf16 %v31_v24, %v30_v23  ;;  %v34_v29 = vld [vmem:[%s5554_s0 + $0x70] sm:$0xff]  ;;  %v35_v30 = vld [vmem:[%s5554_s0 + $0x78] sm:$0xff] }
   0x9   :  { %v90_v28 = vpack.c.bf16 %v33_v26, %v32_v25  ;;  %v36_v31 = vld [vmem:[%s5554_s0 + $0x80] sm:$0xff]  ;;  %v37_v32 = vld [vmem:[%s5554_s0 + $0x88] sm:$0xff]  ;;  %v91_v33 = vpack.c.bf16 %v35_v30, %v34_v29  ;;  %v38_v35 = vld [vmem:[%s5554_s0 + $0x90] sm:$0xff] }
   0xa   :  { %v92_v34 = vpack.c.bf16 %v37_v32, %v36_v31  ;;  %v39_v36 = vld [vmem:[%s5554_s0 + $0x98] sm:$0xff]  ;;  %v40_v37 = vld [vmem:[%s5554_s0 + $0xa0] sm:$0xff]  ;;  %v41_v38 = vld [vmem:[%s5554_s0 + $0xa8] sm:$0xff] }
   0xb   :  { %3268 = vmatpush3.bf16.xpose.msra.mxu0 %v3507_v1  ;;  %v93_v39 = vpack.c.bf16 %v39_v36, %v38_v35  ;;  %v94_v40 = vpack.c.bf16 %v41_v38, %v40_v37  ;;  %v42_v41 = vld [vmem:[%s5554_s0 + $0xb0] sm:$0xff]  ;;  %v43_v42 = vld [vmem:[%s5554_s0 + $0xb8] sm:$0xff]  ;;  %v44_v43 = vld [vmem:[%s5554_s0 + $0xc0] sm:$0xff] }
   0xc   :  { %3269 = vmatprep.subr.bf16.mxu0 %v3508_v2  ;;  %v45_v44 = vld [vmem:[%s5554_s0 + $0xc8] sm:$0xff]  ;;  %v95_v45 = vpack.c.bf16 %v43_v42, %v42_v41  ;;  %v46_v47 = vld [vmem:[%s5554_s0 + $0xd0] sm:$0xff]  ;;  %v47_v48 = vld [vmem:[%s5554_s0 + $0xd8] sm:$0xff] }
   0xd   :  { %v96_v46 = vpack.c.bf16 %v45_v44, %v44_v43  ;;  %v48_v49 = vld [vmem:[%s5554_s0 + $0xe0] sm:$0xff]  ;;  %v49_v50 = vld [vmem:[%s5554_s0 + $0xe8] sm:$0xff]  ;;  %v97_v51 = vpack.c.bf16 %v47_v48, %v46_v47  ;;  %v50_v53 = vld [vmem:[%s5554_s0 + $0xf0] sm:$0xff] }
   0xe   :  { %v98_v52 = vpack.c.bf16 %v49_v50, %v48_v49  ;;  %v51_v54 = vld [vmem:[%s5554_s0 + $0xf8] sm:$0xff]  ;;  %v52_v55 = vld [vmem:[%s5554_s0 + $0x100] sm:$0xff]  ;;  %v53_v56 = vld [vmem:[%s5554_s0 + $0x108] sm:$0xff] }
   0xf   :  { %v99_v57 = vpack.c.bf16 %v51_v54, %v50_v53  ;;  %v100_v58 = vpack.c.bf16 %v53_v56, %v52_v55  ;;  %v54_v59 = vld [vmem:[%s5554_s0 + $0x110] sm:$0xff]  ;;  %v55_v60 = vld [vmem:[%s5554_s0 + $0x118] sm:$0xff]  ;;  %v56_v61 = vld [vmem:[%s5554_s0 + $0x120] sm:$0xff] }
  0x10   :  { %v57_v62 = vld [vmem:[%s5554_s0 + $0x128] sm:$0xff]  ;;  %v101_v63 = vpack.c.bf16 %v55_v60, %v54_v59  ;;  %v58_v1 = vld [vmem:[%s5554_s0 + $0x130] sm:$0xff]  ;;  %v60_v3 = vld [vmem:[%s5554_s0 + $0x140] sm:$0xff] }
  0x11   :  { %v102_v0 = vpack.c.bf16 %v57_v62, %v56_v61  ;;  %v61_v4 = vld [vmem:[%s5554_s0 + $0x148] sm:$0xff]  ;;  %v66_v13 = vld [vmem:[%s5554_s0 + $0x170] sm:$0xff]  ;;  %v67_v14 = vld [vmem:[%s5554_s0 + $0x178] sm:$0xff] }
  0x12   :  { %v107_v17 = vpack.c.bf16 %v67_v14, %v66_v13  ;;  %v70_v19 = vld [vmem:[%s5554_s0 + $0x190] sm:$0xff]  ;;  %v71_v20 = vld [vmem:[%s5554_s0 + $0x198] sm:$0xff]  ;;  %v3828_v41 = vld [vmem:[%s5555_s1] ss:$0 sm:$0xff] }
  0x13   :  { %3270 = vmatpush3.bf16.xpose.msra.mxu0 %v3508_v2  ;;  %v59_v2 = vld [vmem:[%s5554_s0 + $0x138] sm:$0xff]  ;;  %v109_v23 = vpack.c.bf16 %v71_v20, %v70_v19  ;;  %v74_v25 = vld [vmem:[%s5554_s0 + $0x1b0] sm:$0xff] }
  0x14   :  { %3271 = vmatprep.subr.bf16.mxu0 %v3509_v6  ;;  %v103_v5 = vpack.c.bf16 %v59_v2, %v58_v1  ;;  %v75_v26 = vld [vmem:[%s5554_s0 + $0x1b8] sm:$0xff]  ;;  %v78_v31 = vld [vmem:[%s5554_s0 + $0x1d0] sm:$0xff] }
  0x15   :  { %v111_v29 = vpack.c.bf16 %v75_v26, %v74_v25  ;;  %v79_v32 = vld [vmem:[%s5554_s0 + $0x1d8] sm:$0xff]  ;;  %v82_v37 = vld [vmem:[%s5554_s0 + $0x1f0] sm:$0xff] }
  0x16   :  { %v113_v35 = vpack.c.bf16 %v79_v32, %v78_v31  ;;  %v83_v38 = vld [vmem:[%s5554_s0 + $0x1f8] sm:$0xff] }
  0x1b   :  { %3272 = vmatpush3.bf16.xpose.msra.mxu0 %v3509_v6  ;;  %v104_v6 = vpack.c.bf16 %v61_v4, %v60_v3 }
  0x1c   :  { %3273 = vmatprep.subr.bf16.mxu0 %v3510_v7 }
  0x23   :  { %3274 = vmatpush3.bf16.xpose.msra.mxu0 %v3510_v7  ;;  %v62_v7 = vld [vmem:[%s5554_s0 + $0x150] sm:$0xff] }
  0x24   :  { %3275 = vmatprep.subr.bf16.mxu0 %v3511_v8 }
  0x2b   :  { %3276 = vmatpush3.bf16.xpose.msra.mxu0 %v3511_v8  ;;  %v63_v8 = vld [vmem:[%s5554_s0 + $0x158] sm:$0xff] }
  0x2c   :  { %3277 = vmatprep.subr.bf16.mxu0 %v3512_v9  ;;  %v105_v11 = vpack.c.bf16 %v63_v8, %v62_v7 }
  0x33   :  { %3278 = vmatpush3.bf16.xpose.msra.mxu0 %v3512_v9  ;;  %v64_v9 = vld [vmem:[%s5554_s0 + $0x160] sm:$0xff] }
  0x34   :  { %3279 = vmatprep.subr.bf16.mxu0 %v3513_v10 }
  0x3b   :  { %3280 = vmatpush3.bf16.xpose.msra.mxu0 %v3513_v10  ;;  %v65_v10 = vld [vmem:[%s5554_s0 + $0x168] sm:$0xff] }
  0x3c   :  { %v106_v12 = vpack.c.bf16 %v65_v10, %v64_v9 }
  0x42   :  { %3282 = vmatmul.mubr.bf16.vlgmr.msra.gmra.mrb[0].mxu0 %v85_v15  ;;  %v68_v15 = vld [vmem:[%s5554_s0 + $0x180] sm:$0xff] }
  0x43   :  { %3285 = vmatprep.mubr.bf16.mxu0 %v86_v16  ;;  %v69_v16 = vld [vmem:[%s5554_s0 + $0x188] sm:$0xff] }
  0x44   :  { %v108_v18 = vpack.c.bf16 %v69_v16, %v68_v15 }
  0x4a   :  { %3286 = vmatmul.mubr.bf16.gmra.mrb[4].mxu0 %v87_v21  ;;  %v72_v21 = vld [vmem:[%s5554_s0 + $0x1a0] sm:$0xff] }
  0x4b   :  { %3289 = vmatprep.mubr.bf16.mxu0 %v88_v22  ;;  %v73_v22 = vld [vmem:[%s5554_s0 + $0x1a8] sm:$0xff] }
  0x4c   :  { %v110_v24 = vpack.c.bf16 %v73_v22, %v72_v21 }
  0x52   :  { %3290 = vmatmul.mubr.bf16.gmra.mrb[8].mxu0 %v89_v27  ;;  %v76_v27 = vld [vmem:[%s5554_s0 + $0x1c0] sm:$0xff] }
  0x53   :  { %3293 = vmatprep.mubr.bf16.mxu0 %v90_v28  ;;  %v77_v28 = vld [vmem:[%s5554_s0 + $0x1c8] sm:$0xff] }
  0x54   :  { %v112_v30 = vpack.c.bf16 %v77_v28, %v76_v27 }
  0x5a   :  { %3294 = vmatmul.mubr.bf16.gmra.mrb[12].mxu0 %v91_v33  ;;  %v80_v33 = vld [vmem:[%s5554_s0 + $0x1e0] sm:$0xff] }
  0x5b   :  { %3297 = vmatprep.mubr.bf16.mxu0 %v92_v34  ;;  %v81_v34 = vld [vmem:[%s5554_s0 + $0x1e8] sm:$0xff] }
  0x5c   :  { %v114_v36 = vpack.c.bf16 %v81_v34, %v80_v33 }
  0x62   :  { %3298 = vmatmul.mubr.bf16.gmra.mrb[16].mxu0 %v93_v39  ;;  %v115_v39 = vpack.c.bf16 %v83_v38, %v82_v37 }
  0x63   :  { %3301 = vmatprep.mubr.bf16.mxu0 %v94_v40 }
  0x6a   :  { %3302 = vmatmul.mubr.bf16.gmra.mrb[20].mxu0 %v95_v45 }
  0x6b   :  { %3305 = vmatprep.mubr.bf16.mxu0 %v96_v46 }
  0x72   :  { %3306 = vmatmul.mubr.bf16.gmra.mrb[24].mxu0 %v97_v51 }
  0x73   :  { %3309 = vmatprep.mubr.bf16.mxu0 %v98_v52 }
  0x7a   :  { %3310 = vmatmul.mubr.bf16.gmra.mrb[28].mxu0 %v99_v57 }
  0x7b   :  { %3313 = vmatprep.mubr.bf16.mxu0 %v100_v58 }
  0x82   :  { %3314 = vmatmul.mubr.bf16.gmra.mrb[32].mxu0 %v101_v63 }
  0x83   :  { %3317 = vmatprep.mubr.bf16.mxu0 %v102_v0 }
  0x8a   :  { %3318 = vmatmul.mubr.bf16.gmra.mrb[36].mxu0 %v103_v5 }
  0x8b   :  { %3321 = vmatprep.mubr.bf16.mxu0 %v104_v6 }
  0x92   :  { %3322 = vmatmul.mubr.bf16.gmra.mrb[40].mxu0 %v105_v11 }
  0x93   :  { %3325 = vmatprep.mubr.bf16.mxu0 %v106_v12 }
  0x9a   :  { %3326 = vmatmul.mubr.bf16.gmra.mrb[44].mxu0 %v107_v17 }
  0x9b   :  { %3329 = vmatprep.mubr.bf16.mxu0 %v108_v18 }
  0xa2   :  { %3330 = vmatmul.mubr.bf16.gmra.mrb[48].mxu0 %v109_v23 }
  0xa3   :  { %3333 = vmatprep.mubr.bf16.mxu0 %v110_v24 }
  0xaa   :  { %3334 = vmatmul.mubr.bf16.gmra.mrb[52].mxu0 %v111_v29 }
  0xab   :  { %3337 = vmatprep.mubr.bf16.mxu0 %v112_v30 }
  0xb2   :  { %3338 = vmatmul.mubr.bf16.gmra.mrb[56].mxu0 %v113_v35 }
  0xb3   :  { %3341 = vmatprep.mubr.bf16.mxu0 %v114_v36 }
  0xba   :  { %3342 = vmatmul.mubr.bf16.gmra.mrb[60].mxu0 %v115_v39 }
 0x115   :  { %v3283_v40 = vpop.f32.mrb[0].mxu0 }
 0x116   :  { %v472_v42 = vmul.f32 2.0, %v3283_v40  ;;  %v214_v43 = vpop.f32.mrb[1].mxu0 }
 0x117   :  { %v470_v44 = vmul.f32 2.0, %v214_v43  ;;  %v3284_v45 = vpop.f32.mrb[2].mxu0 }
 0x118   :  { %v473_v46 = vmul.f32 2.0, %v3284_v45  ;;  %v217_v47 = vpop.f32.mrb[3].mxu0  ;;  %v3831_v48 = vsub.f32 %v3828_v41, %v472_v42 }
 0x119   :  { %v471_v49 = vmul.f32 2.0, %v217_v47  ;;  %v3834_v50 = vsub.f32 %v3828_v41, %v470_v44 }
 0x11a   :  { %608 = vmin.xlane.f32.xlu1 %v3831_v48  ;;  %v3839_v51 = vsub.f32 %v3828_v41, %v473_v46 }
 0x11b   :  { %604 = vmin.xlane.f32.xlu0 %v3834_v50  ;;  %v3842_v53 = vsub.f32 %v3828_v41, %v471_v49 }
 0x11d   :  { %v3287_v52 = vpop.f32.mrb[4].mxu0 }
 0x11e   :  { %v476_v54 = vmul.f32 2.0, %v3287_v52  ;;  %610 = vmin.xlane.f32.xlu1 %v3839_v51  ;;  %v230_v55 = vpop.f32.mrb[5].mxu0 }
 0x11f   :  { %606 = vmin.xlane.f32.xlu0 %v3842_v53  ;;  %v3288_v56 = vpop.f32.mrb[6].mxu0  ;;  %v474_v60 = vmul.f32 2.0, %v230_v55 }
 0x120   :  { %v477_v57 = vmul.f32 2.0, %v3288_v56  ;;  %v233_v58 = vpop.f32.mrb[7].mxu0  ;;  %v3847_v59 = vsub.f32 %v3828_v41, %v476_v54 }
 0x121   :  { %v475_v61 = vmul.f32 2.0, %v233_v58  ;;  %v3855_v0 = vsub.f32 %v3828_v41, %v474_v60 }
 0x122   :  { %v3850_v62 = vsub.f32 %v3828_v41, %v477_v57 }
 0x123   :  { %616 = vmin.xlane.f32.xlu0 %v3847_v59  ;;  %v3858_v3 = vsub.f32 %v3828_v41, %v475_v61 }
 0x124   :  { %618 = vmin.xlane.f32.xlu1 %v3850_v62 }
 0x125   :  { %v3291_v63 = vpop.f32.mrb[8].mxu0 }
 0x126   :  { %v480_v1 = vmul.f32 2.0, %v3291_v63  ;;  %v246_v2 = vpop.f32.mrb[9].mxu0 }
 0x127   :  { %612 = vmin.xlane.f32.xlu0 %v3855_v0  ;;  %v3292_v4 = vpop.f32.mrb[10].mxu0  ;;  %v478_v8 = vmul.f32 2.0, %v246_v2 }
 0x128   :  { %v481_v5 = vmul.f32 2.0, %v3292_v4  ;;  %614 = vmin.xlane.f32.xlu1 %v3858_v3  ;;  %v249_v6 = vpop.f32.mrb[11].mxu0  ;;  %v3863_v7 = vsub.f32 %v3828_v41, %v480_v1 }
 0x129   :  { %v479_v9 = vmul.f32 2.0, %v249_v6  ;;  %v3871_v12 = vsub.f32 %v3828_v41, %v478_v8 }
 0x12a   :  { %v3866_v10 = vsub.f32 %v3828_v41, %v481_v5 }
 0x12b   :  { %624 = vmin.xlane.f32.xlu0 %v3863_v7  ;;  %v3874_v15 = vsub.f32 %v3828_v41, %v479_v9 }
 0x12c   :  { %626 = vmin.xlane.f32.xlu1 %v3866_v10 }
 0x12d   :  { %v3295_v11 = vpop.f32.mrb[12].mxu0 }
 0x12e   :  { %v484_v13 = vmul.f32 2.0, %v3295_v11  ;;  %v262_v14 = vpop.f32.mrb[13].mxu0 }
 0x12f   :  { %620 = vmin.xlane.f32.xlu0 %v3871_v12  ;;  %v3296_v16 = vpop.f32.mrb[14].mxu0  ;;  %v482_v20 = vmul.f32 2.0, %v262_v14 }
 0x130   :  { %v485_v17 = vmul.f32 2.0, %v3296_v16  ;;  %622 = vmin.xlane.f32.xlu1 %v3874_v15  ;;  %v265_v18 = vpop.f32.mrb[15].mxu0  ;;  %v3879_v19 = vsub.f32 %v3828_v41, %v484_v13 }
 0x131   :  { %v483_v21 = vmul.f32 2.0, %v265_v18  ;;  %v3887_v24 = vsub.f32 %v3828_v41, %v482_v20 }
 0x132   :  { %v3882_v22 = vsub.f32 %v3828_v41, %v485_v17 }
 0x133   :  { %632 = vmin.xlane.f32.xlu0 %v3879_v19  ;;  %v3890_v27 = vsub.f32 %v3828_v41, %v483_v21 }
 0x134   :  { %634 = vmin.xlane.f32.xlu1 %v3882_v22 }
 0x135   :  { %v3299_v23 = vpop.f32.mrb[16].mxu0 }
 0x136   :  { %v488_v25 = vmul.f32 2.0, %v3299_v23  ;;  %v278_v26 = vpop.f32.mrb[17].mxu0 }
 0x137   :  { %628 = vmin.xlane.f32.xlu0 %v3887_v24  ;;  %v3300_v28 = vpop.f32.mrb[18].mxu0  ;;  %v486_v32 = vmul.f32 2.0, %v278_v26 }
 0x138   :  { %v489_v29 = vmul.f32 2.0, %v3300_v28  ;;  %630 = vmin.xlane.f32.xlu1 %v3890_v27  ;;  %v281_v30 = vpop.f32.mrb[19].mxu0  ;;  %v3895_v31 = vsub.f32 %v3828_v41, %v488_v25 }
 0x139   :  { %v487_v33 = vmul.f32 2.0, %v281_v30  ;;  %v3903_v36 = vsub.f32 %v3828_v41, %v486_v32 }
 0x13a   :  { %v3898_v34 = vsub.f32 %v3828_v41, %v489_v29 }
 0x13b   :  { %640 = vmin.xlane.f32.xlu0 %v3895_v31  ;;  %v3906_v39 = vsub.f32 %v3828_v41, %v487_v33 }
 0x13c   :  { %642 = vmin.xlane.f32.xlu1 %v3898_v34 }
 0x13d   :  { %v3303_v35 = vpop.f32.mrb[20].mxu0 }
 0x13e   :  { %v492_v37 = vmul.f32 2.0, %v3303_v35  ;;  %v294_v38 = vpop.f32.mrb[21].mxu0 }
 0x13f   :  { %636 = vmin.xlane.f32.xlu0 %v3903_v36  ;;  %v3304_v40 = vpop.f32.mrb[22].mxu0  ;;  %v490_v45 = vmul.f32 2.0, %v294_v38 }
 0x140   :  { %v493_v42 = vmul.f32 2.0, %v3304_v40  ;;  %638 = vmin.xlane.f32.xlu1 %v3906_v39  ;;  %v297_v43 = vpop.f32.mrb[23].mxu0  ;;  %v3911_v44 = vsub.f32 %v3828_v41, %v492_v37 }
 0x141   :  { %v491_v46 = vmul.f32 2.0, %v297_v43  ;;  %v3919_v52 = vsub.f32 %v3828_v41, %v490_v45 }
 0x142   :  { %v3914_v47 = vsub.f32 %v3828_v41, %v493_v42 }
 0x143   :  { %648 = vmin.xlane.f32.xlu0 %v3911_v44  ;;  %v3922_v56 = vsub.f32 %v3828_v41, %v491_v46 }
 0x144   :  { %650 = vmin.xlane.f32.xlu1 %v3914_v47 }
 0x145   :  { %v3307_v49 = vpop.f32.mrb[24].mxu0 }
 0x146   :  { %v496_v54 = vmul.f32 2.0, %v3307_v49  ;;  %v310_v55 = vpop.f32.mrb[25].mxu0 }
 0x147   :  { %v494_v57 = vmul.f32 2.0, %v310_v55  ;;  %644 = vmin.xlane.f32.xlu0 %v3919_v52  ;;  %v3308_v58 = vpop.f32.mrb[26].mxu0 }
 0x148   :  { %v497_v60 = vmul.f32 2.0, %v3308_v58  ;;  %646 = vmin.xlane.f32.xlu1 %v3922_v56  ;;  %v3927_v61 = vsub.f32 %v3828_v41, %v496_v54  ;;  %v313_v63 = vpop.f32.mrb[27].mxu0 }
 0x149   :  { %v495_v1 = vmul.f32 2.0, %v313_v63  ;;  %v3934_v4 = vsub.f32 %v3828_v41, %v494_v57 }
 0x14a   :  { %v3930_v2 = vsub.f32 %v3828_v41, %v497_v60 }
 0x14b   :  { %656 = vmin.xlane.f32.xlu0 %v3927_v61  ;;  %v3938_v5 = vsub.f32 %v3828_v41, %v495_v1 }
 0x14c   :  { %658 = vmin.xlane.f32.xlu1 %v3930_v2 }
 0x14d   :  { %v3311_v6 = vpop.f32.mrb[28].mxu0 }
 0x14e   :  { %v500_v8 = vmul.f32 2.0, %v3311_v6  ;;  %v326_v9 = vpop.f32.mrb[29].mxu0 }
 0x14f   :  { %v498_v11 = vmul.f32 2.0, %v326_v9  ;;  %652 = vmin.xlane.f32.xlu0 %v3934_v4  ;;  %v3312_v13 = vpop.f32.mrb[30].mxu0 }
 0x150   :  { %v501_v14 = vmul.f32 2.0, %v3312_v13  ;;  %654 = vmin.xlane.f32.xlu1 %v3938_v5  ;;  %v3943_v16 = vsub.f32 %v3828_v41, %v500_v8  ;;  %v329_v17 = vpop.f32.mrb[31].mxu0 }
 0x151   :  { %v499_v18 = vmul.f32 2.0, %v329_v17  ;;  %v3950_v21 = vsub.f32 %v3828_v41, %v498_v11 }
 0x152   :  { %v3946_v20 = vsub.f32 %v3828_v41, %v501_v14 }
 0x153   :  { %664 = vmin.xlane.f32.xlu0 %v3943_v16  ;;  %v3954_v23 = vsub.f32 %v3828_v41, %v499_v18 }
 0x154   :  { %666 = vmin.xlane.f32.xlu1 %v3946_v20 }
 0x155   :  { %v3315_v25 = vpop.f32.mrb[32].mxu0 }
 0x156   :  { %v504_v26 = vmul.f32 2.0, %v3315_v25  ;;  %v342_v28 = vpop.f32.mrb[33].mxu0 }
 0x157   :  { %v502_v29 = vmul.f32 2.0, %v342_v28  ;;  %660 = vmin.xlane.f32.xlu0 %v3950_v21  ;;  %v3316_v30 = vpop.f32.mrb[34].mxu0 }
 0x158   :  { %v505_v32 = vmul.f32 2.0, %v3316_v30  ;;  %662 = vmin.xlane.f32.xlu1 %v3954_v23  ;;  %v3959_v33 = vsub.f32 %v3828_v41, %v504_v26  ;;  %v345_v35 = vpop.f32.mrb[35].mxu0 }
 0x159   :  { %v503_v37 = vmul.f32 2.0, %v345_v35  ;;  %v3966_v40 = vsub.f32 %v3828_v41, %v502_v29 }
 0x15a   :  { %v3962_v38 = vsub.f32 %v3828_v41, %v505_v32 }
 0x15b   :  { %672 = vmin.xlane.f32.xlu0 %v3959_v33  ;;  %v3970_v42 = vsub.f32 %v3828_v41, %v503_v37 }
 0x15c   :  { %674 = vmin.xlane.f32.xlu1 %v3962_v38 }
 0x15d   :  { %v3319_v43 = vpop.f32.mrb[36].mxu0 }
 0x15e   :  { %v508_v45 = vmul.f32 2.0, %v3319_v43  ;;  %v358_v46 = vpop.f32.mrb[37].mxu0 }
 0x15f   :  { %v506_v49 = vmul.f32 2.0, %v358_v46  ;;  %668 = vmin.xlane.f32.xlu0 %v3966_v40  ;;  %v3320_v54 = vpop.f32.mrb[38].mxu0 }
 0x160   :  { %v509_v55 = vmul.f32 2.0, %v3320_v54  ;;  %670 = vmin.xlane.f32.xlu1 %v3970_v42  ;;  %v3975_v57 = vsub.f32 %v3828_v41, %v508_v45  ;;  %v361_v58 = vpop.f32.mrb[39].mxu0 }
 0x161   :  { %v507_v60 = vmul.f32 2.0, %v361_v58  ;;  %v3982_v1 = vsub.f32 %v3828_v41, %v506_v49 }
 0x162   :  { %v3978_v63 = vsub.f32 %v3828_v41, %v509_v55 }
 0x163   :  { %680 = vmin.xlane.f32.xlu0 %v3975_v57  ;;  %v3986_v6 = vsub.f32 %v3828_v41, %v507_v60 }
 0x164   :  { %682 = vmin.xlane.f32.xlu1 %v3978_v63 }
 0x165   :  { %v3323_v8 = vpop.f32.mrb[40].mxu0 }
 0x166   :  { %v512_v9 = vmul.f32 2.0, %v3323_v8  ;;  %v374_v11 = vpop.f32.mrb[41].mxu0 }
 0x167   :  { %v510_v13 = vmul.f32 2.0, %v374_v11  ;;  %676 = vmin.xlane.f32.xlu0 %v3982_v1  ;;  %v3324_v14 = vpop.f32.mrb[42].mxu0 }
 0x168   :  { %v513_v17 = vmul.f32 2.0, %v3324_v14  ;;  %678 = vmin.xlane.f32.xlu1 %v3986_v6  ;;  %v3991_v18 = vsub.f32 %v3828_v41, %v512_v9  ;;  %v377_v25 = vpop.f32.mrb[43].mxu0 }
 0x169   :  { %v511_v26 = vmul.f32 2.0, %v377_v25  ;;  %v3998_v29 = vsub.f32 %v3828_v41, %v510_v13 }
 0x16a   :  { %v3994_v28 = vsub.f32 %v3828_v41, %v513_v17 }
 0x16b   :  { %688 = vmin.xlane.f32.xlu0 %v3991_v18  ;;  %v4002_v30 = vsub.f32 %v3828_v41, %v511_v26 }
 0x16c   :  { %690 = vmin.xlane.f32.xlu1 %v3994_v28 }
 0x16d   :  { %v3327_v32 = vpop.f32.mrb[44].mxu0 }
 0x16e   :  { %v516_v35 = vmul.f32 2.0, %v3327_v32  ;;  %v390_v37 = vpop.f32.mrb[45].mxu0 }
 0x16f   :  { %v514_v43 = vmul.f32 2.0, %v390_v37  ;;  %684 = vmin.xlane.f32.xlu0 %v3998_v29  ;;  %v3328_v45 = vpop.f32.mrb[46].mxu0 }
 0x170   :  { %v517_v46 = vmul.f32 2.0, %v3328_v45  ;;  %686 = vmin.xlane.f32.xlu1 %v4002_v30  ;;  %v4007_v49 = vsub.f32 %v3828_v41, %v516_v35  ;;  %v393_v54 = vpop.f32.mrb[47].mxu0 }
 0x171   :  { %v515_v55 = vmul.f32 2.0, %v393_v54  ;;  %v4014_v60 = vsub.f32 %v3828_v41, %v514_v43 }
 0x172   :  { %v4010_v58 = vsub.f32 %v3828_v41, %v517_v46 }
 0x173   :  { %696 = vmin.xlane.f32.xlu0 %v4007_v49  ;;  %v4018_v8 = vsub.f32 %v3828_v41, %v515_v55 }
 0x174   :  { %698 = vmin.xlane.f32.xlu1 %v4010_v58 }
 0x175   :  { %v3331_v9 = vpop.f32.mrb[48].mxu0 }
 0x176   :  { %v520_v11 = vmul.f32 2.0, %v3331_v9  ;;  %v406_v13 = vpop.f32.mrb[49].mxu0 }
 0x177   :  { %v518_v14 = vmul.f32 2.0, %v406_v13  ;;  %692 = vmin.xlane.f32.xlu0 %v4014_v60  ;;  %v3332_v17 = vpop.f32.mrb[50].mxu0 }
 0x178   :  { %v521_v25 = vmul.f32 2.0, %v3332_v17  ;;  %694 = vmin.xlane.f32.xlu1 %v4018_v8  ;;  %v4023_v26 = vsub.f32 %v3828_v41, %v520_v11  ;;  %v409_v32 = vpop.f32.mrb[51].mxu0 }
 0x179   :  { %v519_v35 = vmul.f32 2.0, %v409_v32  ;;  %v4030_v43 = vsub.f32 %v3828_v41, %v518_v14 }
 0x17a   :  { %v4026_v37 = vsub.f32 %v3828_v41, %v521_v25 }
 0x17b   :  { %704 = vmin.xlane.f32.xlu0 %v4023_v26  ;;  %5671 = vst [vmem:[#allocation2_spill] sm:$0xff] %v4030_v43  ;;  %v4034_v45 = vsub.f32 %v3828_v41, %v519_v35 }
 0x17c   :  { %706 = vmin.xlane.f32.xlu1 %v4026_v37 }
 0x17d   :  { %5672 = vst [vmem:[#allocation3_spill] sm:$0xff] %v4034_v45  ;;  %v3335_v46 = vpop.f32.mrb[52].mxu0 }
 0x17e   :  { %v524_v54 = vmul.f32 2.0, %v3335_v46  ;;  %v422_v55 = vpop.f32.mrb[53].mxu0 }
 0x17f   :  { %v522_v9 = vmul.f32 2.0, %v422_v55  ;;  %700 = vmin.xlane.f32.xlu0 %v4030_v43  ;;  %v3336_v11 = vpop.f32.mrb[54].mxu0 }
 0x180   :  { %v525_v13 = vmul.f32 2.0, %v3336_v11  ;;  %702 = vmin.xlane.f32.xlu1 %v4034_v45  ;;  %v4039_v17 = vsub.f32 %v3828_v41, %v524_v54  ;;  %v425_v14 = vpop.f32.mrb[55].mxu0 }
 0x181   :  { %v523_v25 = vmul.f32 2.0, %v425_v14  ;;  %v4046_v35 = vsub.f32 %v3828_v41, %v522_v9 }
 0x182   :  { %5673 = vst [vmem:[#allocation4_spill] sm:$0xff] %v4039_v17  ;;  %v4042_v32 = vsub.f32 %v3828_v41, %v525_v13 }
 0x183   :  { %712 = vmin.xlane.f32.xlu0 %v4039_v17  ;;  %5675 = vst [vmem:[#allocation6_spill] sm:$0xff] %v4046_v35  ;;  %v4050_v46 = vsub.f32 %v3828_v41, %v523_v25 }
 0x184   :  { %5674 = vst [vmem:[#allocation5_spill] sm:$0xff] %v4042_v32  ;;  %714 = vmin.xlane.f32.xlu1 %v4042_v32 }
 0x185   :  { %5676 = vst [vmem:[#allocation7_spill] sm:$0xff] %v4050_v46  ;;  %v3339_v55 = vpop.f32.mrb[56].mxu0 }
 0x186   :  { %v528_v11 = vmul.f32 2.0, %v3339_v55  ;;  %v438_v45 = vpop.f32.mrb[57].mxu0 }
 0x187   :  { %v526_v54 = vmul.f32 2.0, %v438_v45  ;;  %708 = vmin.xlane.f32.xlu0 %v4046_v35  ;;  %v3340_v14 = vpop.f32.mrb[58].mxu0 }
 0x188   :  { %v529_v43 = vmul.f32 2.0, %v3340_v14  ;;  %710 = vmin.xlane.f32.xlu1 %v4050_v46  ;;  %v4055_v13 = vsub.f32 %v3828_v41, %v528_v11  ;;  %v441_v9 = vpop.f32.mrb[59].mxu0 }
 0x189   :  { %v527_v17 = vmul.f32 2.0, %v441_v9  ;;  %v4062_v25 = vsub.f32 %v3828_v41, %v526_v54 }
 0x18a   :  { %5677 = vst [vmem:[#allocation8_spill] sm:$0xff] %v4055_v13  ;;  %v4058_v32 = vsub.f32 %v3828_v41, %v529_v43 }
 0x18b   :  { %720 = vmin.xlane.f32.xlu0 %v4055_v13  ;;  %v4066_v45 = vsub.f32 %v3828_v41, %v527_v17 }
 0x18c   :  { %5678 = vst [vmem:[#allocation9_spill] sm:$0xff] %v4058_v32  ;;  %722 = vmin.xlane.f32.xlu1 %v4058_v32 }
 0x18d   :  { %v3343_v55 = vpop.f32.mrb[60].mxu0 }
 0x18e   :  { %v532_v14 = vmul.f32 2.0, %v3343_v55  ;;  %v454_v46 = vpop.f32.mrb[61].mxu0  ;;  %v732_v55 = vlaneseq }
 0x18f   :  { %v530_v11 = vmul.f32 2.0, %v454_v46  ;;  %716 = vmin.xlane.f32.xlu0 %v4062_v25  ;;  %v3344_v9 = vpop.f32.mrb[62].mxu0 }
 0x190   :  { %v533_v35 = vmul.f32 2.0, %v3344_v9  ;;  %718 = vmin.xlane.f32.xlu1 %v4066_v45  ;;  %v4071_v43 = vsub.f32 %v3828_v41, %v532_v14  ;;  %v457_v54 = vpop.f32.mrb[63].mxu0  ;;  %v4086_v14 = vand.u32 127, %v732_v55 }
 0x191   :  { %v531_v13 = vmul.f32 2.0, %v457_v54  ;;  %v4078_v17 = vsub.f32 %v3828_v41, %v530_v11 }
 0x192   :  { %5679 = vst [vmem:[#allocation10_spill] sm:$0xff] %v4071_v43  ;;  %v4074_v32 = vsub.f32 %v3828_v41, %v533_v35 }
 0x193   :  { %728 = vmin.xlane.f32.xlu0 %v4071_v43  ;;  %v4082_v46 = vsub.f32 %v3828_v41, %v531_v13 }
 0x194   :  { %5680 = vst [vmem:[#allocation11_spill] sm:$0xff] %v4074_v32  ;;  %730 = vmin.xlane.f32.xlu1 %v4074_v32 }
 0x197   :  { %724 = vmin.xlane.f32.xlu0 %v4078_v17 }
 0x198   :  { %726 = vmin.xlane.f32.xlu1 %v4082_v46 }
 0x1a7   :  { %v609_v9 = vpop.xlane.xlu1 %608 }
 0x1a8   :  { %vm736_vm0 = vcmp.eq.f32.partialorder %v3831_v48, %v609_v9  ;;  %v605_v35 = vpop.xlane.xlu0 %604 }
 0x1a9   :  { %v4090_v54 = vsel %vm736_vm0, %v4086_v14, 128  ;;  %vm734_vm1 = vcmp.eq.f32.partialorder %v3834_v50, %v605_v35 }
 0x1aa   :  { %5681 = vst [vmem:[#allocation12_spill] sm:$0xff] %v4090_v54  ;;  %v4094_v11 = vsel %vm734_vm1, %v4086_v14, 128  ;;  %v891_v41 = vshra.s32 %v4090_v54, 16 }
 0x1ab   :  { %5682 = vst [vmem:[#allocation13_spill] sm:$0xff] %v4094_v11  ;;  %v611_v13 = vpop.xlane.xlu1 %610  ;;  %v863_v43 = vshra.s32 %v4094_v11, 16 }
 0x1ac   :  { %vm737_vm2 = vcmp.eq.f32.partialorder %v3839_v51, %v611_v13  ;;  %v607_v32 = vpop.xlane.xlu0 %606  ;;  %v4098_v55 = vcvt.s32.f32 %v891_v41 }
 0x1ad   :  { %v4102_v48 = vsel %vm737_vm2, %v4086_v14, 128  ;;  %vm735_vm3 = vcmp.eq.f32.partialorder %v3842_v53, %v607_v32  ;;  %v4110_v54 = vcvt.s32.f32 %v863_v43 }
 0x1ae   :  { %v4106_v50 = vsel %vm735_vm3, %v4086_v14, 128  ;;  %894 = vmin.xlane.f32.xlu0 %v4098_v55  ;;  %v905_v9 = vshra.s32 %v4102_v48, 16 }
 0x1af   :  { %5683 = vst [vmem:[#allocation14_spill] sm:$0xff] %v4106_v50  ;;  %v877_v41 = vshra.s32 %v4106_v50, 16 }
 0x1b0   :  { %v617_v35 = vpop.xlane.xlu0 %616  ;;  %v4112_v51 = vcvt.s32.f32 %v905_v9 }
 0x1b1   :  { %vm740_vm4 = vcmp.eq.f32.partialorder %v3847_v59, %v617_v35  ;;  %v619_v13 = vpop.xlane.xlu1 %618  ;;  %v4126_v9 = vcvt.s32.f32 %v877_v41 }
 0x1b2   :  { %5684 = vst [vmem:[#allocation15_spill] sm:$0xff] %v4112_v51  ;;  %v4117_v11 = vsel %vm740_vm4, %v4086_v14, 128  ;;  %vm741_vm5 = vcmp.eq.f32.partialorder %v3850_v62, %v619_v13  ;;  %866 = vmin.xlane.f32.xlu0 %v4110_v54  ;;  %908 = vmin.xlane.f32.xlu1 %v4112_v51 }
 0x1b3   :  { %v4123_v53 = vsel %vm741_vm5, %v4086_v14, 128  ;;  %v947_v32 = vshra.s32 %v4117_v11, 16 }
 0x1b4   :  { %5685 = vst [vmem:[#allocation16_spill] sm:$0xff] %v4123_v53  ;;  %v613_v43 = vpop.xlane.xlu0 %612  ;;  %v961_v59 = vshra.s32 %v4123_v53, 16 }
 0x1b5   :  { %vm738_vm6 = vcmp.eq.f32.partialorder %v3855_v0, %v613_v43  ;;  %v615_v35 = vpop.xlane.xlu1 %614  ;;  %v4130_v50 = vcvt.s32.f32 %v947_v32 }
 0x1b6   :  { %v4133_v62 = vsel %vm738_vm6, %v4086_v14, 128  ;;  %vm739_vm7 = vcmp.eq.f32.partialorder %v3858_v3, %v615_v35  ;;  %880 = vmin.xlane.f32.xlu1 %v4126_v9  ;;  %v4142_v51 = vcvt.s32.f32 %v961_v59 }
 0x1b7   :  { %5686 = vst [vmem:[#allocation17_spill] sm:$0xff] %v4130_v50  ;;  %v4138_v13 = vsel %vm739_vm7, %v4086_v14, 128  ;;  %950 = vmin.xlane.f32.xlu0 %v4130_v50  ;;  %v919_v41 = vshra.s32 %v4133_v62, 16 }
 0x1b8   :  { %5687 = vst [vmem:[#allocation18_spill] sm:$0xff] %v4138_v13  ;;  %v625_v53 = vpop.xlane.xlu0 %624  ;;  %v933_v0 = vshra.s32 %v4138_v13, 16 }
 0x1b9   :  { %vm744_vm8 = vcmp.eq.f32.partialorder %v3863_v7, %v625_v53  ;;  %v627_v32 = vpop.xlane.xlu1 %626  ;;  %v4146_v43 = vcvt.s32.f32 %v919_v41 }
 0x1ba   :  { %v4149_v3 = vsel %vm744_vm8, %v4086_v14, 128  ;;  %vm745_vm9 = vcmp.eq.f32.partialorder %v3866_v10, %v627_v32  ;;  %964 = vmin.xlane.f32.xlu1 %v4142_v51  ;;  %v4158_v50 = vcvt.s32.f32 %v933_v0 }
 0x1bb   :  { %5688 = vst [vmem:[#allocation19_spill] sm:$0xff] %v4146_v43  ;;  %v4154_v35 = vsel %vm745_vm9, %v4086_v14, 128  ;;  %922 = vmin.xlane.f32.xlu0 %v4146_v43  ;;  %v1003_v59 = vshra.s32 %v4149_v3, 16 }
 0x1bc   :  { %5689 = vst [vmem:[#allocation20_spill] sm:$0xff] %v4154_v35  ;;  %v621_v13 = vpop.xlane.xlu0 %620  ;;  %v1017_v7 = vshra.s32 %v4154_v35, 16 }
 0x1bd   :  { %vm742_vm10 = vcmp.eq.f32.partialorder %v3871_v12, %v621_v13  ;;  %v623_v53 = vpop.xlane.xlu1 %622  ;;  %v4162_v41 = vcvt.s32.f32 %v1003_v59 }
 0x1be   :  { %v4165_v10 = vsel %vm742_vm10, %v4086_v14, 128  ;;  %vm743_vm11 = vcmp.eq.f32.partialorder %v3874_v15, %v623_v53  ;;  %936 = vmin.xlane.f32.xlu1 %v4158_v50  ;;  %v4174_v43 = vcvt.s32.f32 %v1017_v7 }
 0x1bf   :  { %5690 = vst [vmem:[#allocation21_spill] sm:$0xff] %v4162_v41  ;;  %v4170_v32 = vsel %vm743_vm11, %v4086_v14, 128  ;;  %1006 = vmin.xlane.f32.xlu0 %v4162_v41  ;;  %v975_v0 = vshra.s32 %v4165_v10, 16 }
 0x1c0   :  { %5691 = vst [vmem:[#allocation22_spill] sm:$0xff] %v4170_v32  ;;  %v633_v35 = vpop.xlane.xlu0 %632  ;;  %v989_v12 = vshra.s32 %v4170_v32, 16 }
 0x1c1   :  { %vm748_vm12 = vcmp.eq.f32.partialorder %v3879_v19, %v633_v35  ;;  %v635_v13 = vpop.xlane.xlu1 %634  ;;  %v4178_v59 = vcvt.s32.f32 %v975_v0 }
 0x1c2   :  { %v4181_v15 = vsel %vm748_vm12, %v4086_v14, 128  ;;  %vm749_vm13 = vcmp.eq.f32.partialorder %v3882_v22, %v635_v13  ;;  %1020 = vmin.xlane.f32.xlu1 %v4174_v43  ;;  %v4190_v41 = vcvt.s32.f32 %v989_v12 }
 0x1c3   :  { %5692 = vst [vmem:[#allocation23_spill] sm:$0xff] %v4178_v59  ;;  %v4186_v53 = vsel %vm749_vm13, %v4086_v14, 128  ;;  %978 = vmin.xlane.f32.xlu0 %v4178_v59  ;;  %v1059_v7 = vshra.s32 %v4181_v15, 16 }
 0x1c4   :  { %5693 = vst [vmem:[#allocation24_spill] sm:$0xff] %v4186_v53  ;;  %v629_v32 = vpop.xlane.xlu0 %628  ;;  %v1073_v19 = vshra.s32 %v4186_v53, 16 }
 0x1c5   :  { %vm746_vm14 = vcmp.eq.f32.partialorder %v3887_v24, %v629_v32  ;;  %v631_v35 = vpop.xlane.xlu1 %630  ;;  %v4194_v0 = vcvt.s32.f32 %v1059_v7 }
 0x1c6   :  { %v4197_v22 = vsel %vm746_vm14, %v4086_v14, 128  ;;  %vm747_vm15 = vcmp.eq.f32.partialorder %v3890_v27, %v631_v35  ;;  %992 = vmin.xlane.f32.xlu1 %v4190_v41  ;;  %v4206_v59 = vcvt.s32.f32 %v1073_v19 }
 0x1c7   :  { %5694 = vst [vmem:[#allocation25_spill] sm:$0xff] %v4194_v0  ;;  %v4202_v13 = vsel %vm747_vm15, %v4086_v14, 128  ;;  %1062 = vmin.xlane.f32.xlu0 %v4194_v0  ;;  %v1031_v12 = vshra.s32 %v4197_v22, 16 }
 0x1c8   :  { %5695 = vst [vmem:[#allocation26_spill] sm:$0xff] %v4202_v13  ;;  %v641_v53 = vpop.xlane.xlu0 %640  ;;  %v1045_v24 = vshra.s32 %v4202_v13, 16 }
 0x1c9   :  { %vm752_vm0 = vcmp.eq.f32.partialorder %v3895_v31, %v641_v53  ;;  %v643_v32 = vpop.xlane.xlu1 %642  ;;  %v4210_v7 = vcvt.s32.f32 %v1031_v12 }
 0x1ca   :  { %v4213_v27 = vsel %vm752_vm0, %v4086_v14, 128  ;;  %vm753_vm1 = vcmp.eq.f32.partialorder %v3898_v34, %v643_v32  ;;  %1076 = vmin.xlane.f32.xlu1 %v4206_v59  ;;  %v4222_v0 = vcvt.s32.f32 %v1045_v24 }
 0x1cb   :  { %5696 = vst [vmem:[#allocation27_spill] sm:$0xff] %v4210_v7  ;;  %v4218_v35 = vsel %vm753_vm1, %v4086_v14, 128  ;;  %1034 = vmin.xlane.f32.xlu0 %v4210_v7  ;;  %v1115_v19 = vshra.s32 %v4213_v27, 16 }
 0x1cc   :  { %5697 = vst [vmem:[#allocation28_spill] sm:$0xff] %v4218_v35  ;;  %v637_v13 = vpop.xlane.xlu0 %636  ;;  %v1129_v31 = vshra.s32 %v4218_v35, 16 }
 0x1cd   :  { %vm750_vm2 = vcmp.eq.f32.partialorder %v3903_v36, %v637_v13  ;;  %v639_v53 = vpop.xlane.xlu1 %638  ;;  %v4226_v12 = vcvt.s32.f32 %v1115_v19 }
 0x1ce   :  { %v4229_v34 = vsel %vm750_vm2, %v4086_v14, 128  ;;  %vm751_vm3 = vcmp.eq.f32.partialorder %v3906_v39, %v639_v53  ;;  %1048 = vmin.xlane.f32.xlu1 %v4222_v0  ;;  %v4238_v7 = vcvt.s32.f32 %v1129_v31 }
 0x1cf   :  { %5698 = vst [vmem:[#allocation29_spill] sm:$0xff] %v4226_v12  ;;  %v4234_v32 = vsel %vm751_vm3, %v4086_v14, 128  ;;  %1118 = vmin.xlane.f32.xlu0 %v4226_v12  ;;  %v1087_v24 = vshra.s32 %v4229_v34, 16 }
 0x1d0   :  { %5699 = vst [vmem:[#allocation30_spill] sm:$0xff] %v4234_v32  ;;  %v649_v35 = vpop.xlane.xlu0 %648  ;;  %v1101_v36 = vshra.s32 %v4234_v32, 16 }
 0x1d1   :  { %vm756_vm4 = vcmp.eq.f32.partialorder %v3911_v44, %v649_v35  ;;  %v651_v13 = vpop.xlane.xlu1 %650  ;;  %v4242_v19 = vcvt.s32.f32 %v1087_v24 }
 0x1d2   :  { %v4245_v39 = vsel %vm756_vm4, %v4086_v14, 128  ;;  %vm757_vm5 = vcmp.eq.f32.partialorder %v3914_v47, %v651_v13  ;;  %1132 = vmin.xlane.f32.xlu1 %v4238_v7  ;;  %v4254_v12 = vcvt.s32.f32 %v1101_v36 }
 0x1d3   :  { %5700 = vst [vmem:[#allocation31_spill] sm:$0xff] %v4242_v19  ;;  %v4250_v53 = vsel %vm757_vm5, %v4086_v14, 128  ;;  %1090 = vmin.xlane.f32.xlu0 %v4242_v19  ;;  %v1171_v31 = vshra.s32 %v4245_v39, 16 }
 0x1d4   :  { %5701 = vst [vmem:[#allocation32_spill] sm:$0xff] %v4250_v53  ;;  %v645_v32 = vpop.xlane.xlu0 %644  ;;  %v1185_v44 = vshra.s32 %v4250_v53, 16 }
 0x1d5   :  { %vm754_vm6 = vcmp.eq.f32.partialorder %v3919_v52, %v645_v32  ;;  %v647_v35 = vpop.xlane.xlu1 %646  ;;  %v4258_v24 = vcvt.s32.f32 %v1171_v31 }
 0x1d6   :  { %v4261_v47 = vsel %vm754_vm6, %v4086_v14, 128  ;;  %vm755_vm7 = vcmp.eq.f32.partialorder %v3922_v56, %v647_v35  ;;  %1104 = vmin.xlane.f32.xlu1 %v4254_v12  ;;  %v4270_v19 = vcvt.s32.f32 %v1185_v44 }
 0x1d7   :  { %5702 = vst [vmem:[#allocation33_spill] sm:$0xff] %v4258_v24  ;;  %v4266_v13 = vsel %vm755_vm7, %v4086_v14, 128  ;;  %1174 = vmin.xlane.f32.xlu0 %v4258_v24  ;;  %v1143_v36 = vshra.s32 %v4261_v47, 16 }
 0x1d8   :  { %5703 = vst [vmem:[#allocation34_spill] sm:$0xff] %v4266_v13  ;;  %v657_v53 = vpop.xlane.xlu0 %656  ;;  %v1157_v52 = vshra.s32 %v4266_v13, 16 }
 0x1d9   :  { %vm760_vm8 = vcmp.eq.f32.partialorder %v3927_v61, %v657_v53  ;;  %v659_v32 = vpop.xlane.xlu1 %658  ;;  %v4274_v31 = vcvt.s32.f32 %v1143_v36 }
 0x1da   :  { %v4277_v56 = vsel %vm760_vm8, %v4086_v14, 128  ;;  %vm761_vm9 = vcmp.eq.f32.partialorder %v3930_v2, %v659_v32  ;;  %1188 = vmin.xlane.f32.xlu1 %v4270_v19  ;;  %v4286_v24 = vcvt.s32.f32 %v1157_v52 }
 0x1db   :  { %5704 = vst [vmem:[#allocation35_spill] sm:$0xff] %v4277_v56  ;;  %v4282_v35 = vsel %vm761_vm9, %v4086_v14, 128  ;;  %1146 = vmin.xlane.f32.xlu0 %v4274_v31  ;;  %v1227_v44 = vshra.s32 %v4277_v56, 16 }
 0x1dc   :  { %5705 = vst [vmem:[#allocation36_spill] sm:$0xff] %v4282_v35  ;;  %v653_v13 = vpop.xlane.xlu0 %652  ;;  %v1241_v61 = vshra.s32 %v4282_v35, 16 }
 0x1dd   :  { %vm758_vm10 = vcmp.eq.f32.partialorder %v3934_v4, %v653_v13  ;;  %v655_v53 = vpop.xlane.xlu1 %654  ;;  %v4290_v36 = vcvt.s32.f32 %v1227_v44 }
 0x1de   :  { %v4293_v2 = vsel %vm758_vm10, %v4086_v14, 128  ;;  %vm759_vm11 = vcmp.eq.f32.partialorder %v3938_v5, %v655_v53  ;;  %1160 = vmin.xlane.f32.xlu1 %v4286_v24  ;;  %v4302_v56 = vcvt.s32.f32 %v1241_v61 }
 0x1df   :  { %5706 = vst [vmem:[#allocation37_spill] sm:$0xff] %v4290_v36  ;;  %v4298_v32 = vsel %vm759_vm11, %v4086_v14, 128  ;;  %1230 = vmin.xlane.f32.xlu0 %v4290_v36  ;;  %v1199_v52 = vshra.s32 %v4293_v2, 16 }
 0x1e0   :  { %5707 = vst [vmem:[#allocation38_spill] sm:$0xff] %v4298_v32  ;;  %v665_v35 = vpop.xlane.xlu0 %664  ;;  %v1213_v4 = vshra.s32 %v4298_v32, 16 }
 0x1e1   :  { %vm764_vm12 = vcmp.eq.f32.partialorder %v3943_v16, %v665_v35  ;;  %v667_v13 = vpop.xlane.xlu1 %666  ;;  %v4306_v44 = vcvt.s32.f32 %v1199_v52 }
 0x1e2   :  { %v4309_v5 = vsel %vm764_vm12, %v4086_v14, 128  ;;  %vm765_vm13 = vcmp.eq.f32.partialorder %v3946_v20, %v667_v13  ;;  %1244 = vmin.xlane.f32.xlu1 %v4302_v56  ;;  %v4318_v32 = vcvt.s32.f32 %v1213_v4 }
 0x1e3   :  { %5708 = vst [vmem:[#allocation39_spill] sm:$0xff] %v4309_v5  ;;  %v4314_v53 = vsel %vm765_vm13, %v4086_v14, 128  ;;  %1202 = vmin.xlane.f32.xlu0 %v4306_v44  ;;  %v1283_v61 = vshra.s32 %v4309_v5, 16 }
 0x1e4   :  { %5709 = vst [vmem:[#allocation40_spill] sm:$0xff] %v4314_v53  ;;  %v661_v36 = vpop.xlane.xlu0 %660  ;;  %v1297_v16 = vshra.s32 %v4314_v53, 16 }
 0x1e5   :  { %vm762_vm14 = vcmp.eq.f32.partialorder %v3950_v21, %v661_v36  ;;  %v663_v35 = vpop.xlane.xlu1 %662  ;;  %v4322_v52 = vcvt.s32.f32 %v1283_v61 }
 0x1e6   :  { %v4325_v20 = vsel %vm762_vm14, %v4086_v14, 128  ;;  %vm763_vm15 = vcmp.eq.f32.partialorder %v3954_v23, %v663_v35  ;;  %1216 = vmin.xlane.f32.xlu1 %v4318_v32  ;;  %v4334_v5 = vcvt.s32.f32 %v1297_v16 }
 0x1e7   :  { %5710 = vst [vmem:[#allocation41_spill] sm:$0xff] %v4322_v52  ;;  %v4330_v13 = vsel %vm763_vm15, %v4086_v14, 128  ;;  %1286 = vmin.xlane.f32.xlu0 %v4322_v52  ;;  %v1255_v4 = vshra.s32 %v4325_v20, 16 }
 0x1e8   :  { %5711 = vst [vmem:[#allocation42_spill] sm:$0xff] %v4330_v13  ;;  %v673_v53 = vpop.xlane.xlu0 %672  ;;  %v1269_v21 = vshra.s32 %v4330_v13, 16 }
 0x1e9   :  { %vm768_vm0 = vcmp.eq.f32.partialorder %v3959_v33, %v673_v53  ;;  %v675_v36 = vpop.xlane.xlu1 %674  ;;  %v4338_v61 = vcvt.s32.f32 %v1255_v4 }
 0x1ea   :  { %v4341_v23 = vsel %vm768_vm0, %v4086_v14, 128  ;;  %vm769_vm1 = vcmp.eq.f32.partialorder %v3962_v38, %v675_v36  ;;  %1300 = vmin.xlane.f32.xlu1 %v4334_v5  ;;  %v4350_v13 = vcvt.s32.f32 %v1269_v21 }
 0x1eb   :  { %5712 = vst [vmem:[#allocation43_spill] sm:$0xff] %v4341_v23  ;;  %v4346_v35 = vsel %vm769_vm1, %v4086_v14, 128  ;;  %1258 = vmin.xlane.f32.xlu0 %v4338_v61  ;;  %v1339_v16 = vshra.s32 %v4341_v23, 16 }
 0x1ec   :  { %5713 = vst [vmem:[#allocation44_spill] sm:$0xff] %v4346_v35  ;;  %v669_v52 = vpop.xlane.xlu0 %668  ;;  %v1353_v33 = vshra.s32 %v4346_v35, 16 }
 0x1ed   :  { %vm766_vm2 = vcmp.eq.f32.partialorder %v3966_v40, %v669_v52  ;;  %v671_v53 = vpop.xlane.xlu1 %670  ;;  %v4354_v4 = vcvt.s32.f32 %v1339_v16 }
 0x1ee   :  { %v4357_v38 = vsel %vm766_vm2, %v4086_v14, 128  ;;  %vm767_vm3 = vcmp.eq.f32.partialorder %v3970_v42, %v671_v53  ;;  %1272 = vmin.xlane.f32.xlu1 %v4350_v13  ;;  %v4367_v52 = vcvt.s32.f32 %v1353_v33 }
 0x1ef   :  { %5714 = vst [vmem:[#allocation45_spill] sm:$0xff] %v4354_v4  ;;  %v1311_v36 = vshra.s32 %v4357_v38, 16  ;;  %v4363_v23 = vsel %vm767_vm3, %v4086_v14, 128  ;;  %1342 = vmin.xlane.f32.xlu0 %v4354_v4 }
 0x1f0   :  { %5715 = vst [vmem:[#allocation46_spill] sm:$0xff] %v4363_v23  ;;  %v1325_v21 = vshra.s32 %v4363_v23, 16  ;;  %v681_v40 = vpop.xlane.xlu0 %680 }
 0x1f1   :  { %vm772_vm4 = vcmp.eq.f32.partialorder %v3975_v57, %v681_v40  ;;  %v683_v16 = vpop.xlane.xlu1 %682  ;;  %v4370_v35 = vcvt.s32.f32 %v1311_v36 }
 0x1f2   :  { %v4373_v42 = vsel %vm772_vm4, %v4086_v14, 128  ;;  %vm773_vm5 = vcmp.eq.f32.partialorder %v3978_v63, %v683_v16  ;;  %1356 = vmin.xlane.f32.xlu1 %v4367_v52  ;;  %v4383_v40 = vcvt.s32.f32 %v1325_v21 }
 0x1f3   :  { %5716 = vst [vmem:[#allocation47_spill] sm:$0xff] %v4373_v42  ;;  %v1395_v53 = vshra.s32 %v4373_v42, 16  ;;  %v4379_v4 = vsel %vm773_vm5, %v4086_v14, 128  ;;  %1314 = vmin.xlane.f32.xlu0 %v4370_v35 }
 0x1f4   :  { %5717 = vst [vmem:[#allocation48_spill] sm:$0xff] %v4379_v4  ;;  %v1409_v33 = vshra.s32 %v4379_v4, 16  ;;  %v677_v57 = vpop.xlane.xlu0 %676 }
 0x1f5   :  { %vm770_vm6 = vcmp.eq.f32.partialorder %v3982_v1, %v677_v57  ;;  %v679_v36 = vpop.xlane.xlu1 %678  ;;  %v4386_v23 = vcvt.s32.f32 %v1395_v53 }
 0x1f6   :  { %v4389_v63 = vsel %vm770_vm6, %v4086_v14, 128  ;;  %vm771_vm7 = vcmp.eq.f32.partialorder %v3986_v6, %v679_v36  ;;  %1328 = vmin.xlane.f32.xlu1 %v4383_v40  ;;  %v4399_v57 = vcvt.s32.f32 %v1409_v33 }
 0x1f7   :  { %5718 = vst [vmem:[#allocation49_spill] sm:$0xff] %v4386_v23  ;;  %v1367_v16 = vshra.s32 %v4389_v63, 16  ;;  %v4395_v42 = vsel %vm771_vm7, %v4086_v14, 128  ;;  %1398 = vmin.xlane.f32.xlu0 %v4386_v23 }
 0x1f8   :  { %5719 = vst [vmem:[#allocation50_spill] sm:$0xff] %v4395_v42  ;;  %v1381_v21 = vshra.s32 %v4395_v42, 16  ;;  %v689_v1 = vpop.xlane.xlu0 %688 }
 0x1f9   :  { %vm776_vm8 = vcmp.eq.f32.partialorder %v3991_v18, %v689_v1  ;;  %v691_v53 = vpop.xlane.xlu1 %690  ;;  %v4402_v4 = vcvt.s32.f32 %v1367_v16 }
 0x1fa   :  { %v4405_v6 = vsel %vm776_vm8, %v4086_v14, 128  ;;  %vm777_vm9 = vcmp.eq.f32.partialorder %v3994_v28, %v691_v53  ;;  %1412 = vmin.xlane.f32.xlu1 %v4399_v57  ;;  %v4415_v1 = vcvt.s32.f32 %v1381_v21 }
 0x1fb   :  { %5720 = vst [vmem:[#allocation51_spill] sm:$0xff] %v4405_v6  ;;  %v1451_v36 = vshra.s32 %v4405_v6, 16  ;;  %v4411_v23 = vsel %vm777_vm9, %v4086_v14, 128  ;;  %1370 = vmin.xlane.f32.xlu0 %v4402_v4 }
 0x1fc   :  { %5721 = vst [vmem:[#allocation52_spill] sm:$0xff] %v4411_v23  ;;  %v1465_v33 = vshra.s32 %v4411_v23, 16  ;;  %v685_v18 = vpop.xlane.xlu0 %684 }
 0x1fd   :  { %vm774_vm10 = vcmp.eq.f32.partialorder %v3998_v29, %v685_v18  ;;  %v687_v16 = vpop.xlane.xlu1 %686  ;;  %v4418_v42 = vcvt.s32.f32 %v1451_v36 }
 0x1fe   :  { %v4421_v28 = vsel %vm774_vm10, %v4086_v14, 128  ;;  %vm775_vm11 = vcmp.eq.f32.partialorder %v4002_v30, %v687_v16  ;;  %1384 = vmin.xlane.f32.xlu1 %v4415_v1  ;;  %v4431_v18 = vcvt.s32.f32 %v1465_v33 }
 0x1ff   :  { %5722 = vst [vmem:[#allocation53_spill] sm:$0xff] %v4418_v42  ;;  %v1423_v53 = vshra.s32 %v4421_v28, 16  ;;  %v4427_v6 = vsel %vm775_vm11, %v4086_v14, 128  ;;  %1454 = vmin.xlane.f32.xlu0 %v4418_v42 }
 0x200   :  { %5723 = vst [vmem:[#allocation54_spill] sm:$0xff] %v4427_v6  ;;  %v1437_v21 = vshra.s32 %v4427_v6, 16  ;;  %v697_v29 = vpop.xlane.xlu0 %696  ;;  %5724 = vst [vmem:[#allocation55_spill] sm:$0xff] %v4431_v18 }
 0x201   :  { %vm780_vm12 = vcmp.eq.f32.partialorder %v4007_v49, %v697_v29  ;;  %v699_v36 = vpop.xlane.xlu1 %698  ;;  %v4434_v23 = vcvt.s32.f32 %v1423_v53 }
 0x202   :  { %v4437_v30 = vsel %vm780_vm12, %v4086_v14, 128  ;;  %vm781_vm13 = vcmp.eq.f32.partialorder %v4010_v58, %v699_v36  ;;  %1468 = vmin.xlane.f32.xlu1 %v4431_v18  ;;  %v4447_v29 = vcvt.s32.f32 %v1437_v21 }
 0x203   :  { %5725 = vst [vmem:[#allocation56_spill] sm:$0xff] %v4437_v30  ;;  %v1507_v16 = vshra.s32 %v4437_v30, 16  ;;  %v4443_v42 = vsel %vm781_vm13, %v4086_v14, 128  ;;  %1426 = vmin.xlane.f32.xlu0 %v4434_v23 }
 0x204   :  { %5726 = vst [vmem:[#allocation57_spill] sm:$0xff] %v4443_v42  ;;  %v1521_v33 = vshra.s32 %v4443_v42, 16  ;;  %v693_v49 = vpop.xlane.xlu0 %692 }
 0x205   :  { %vm778_vm14 = vcmp.eq.f32.partialorder %v4014_v60, %v693_v49  ;;  %v695_v53 = vpop.xlane.xlu1 %694  ;;  %v4450_v6 = vcvt.s32.f32 %v1507_v16 }
 0x206   :  { %v4453_v58 = vsel %vm778_vm14, %v4086_v14, 128  ;;  %vm779_vm15 = vcmp.eq.f32.partialorder %v4018_v8, %v695_v53  ;;  %1440 = vmin.xlane.f32.xlu1 %v4447_v29  ;;  %v4463_v49 = vcvt.s32.f32 %v1521_v33 }
 0x207   :  { %5727 = vst [vmem:[#allocation58_spill] sm:$0xff] %v4450_v6  ;;  %v1479_v36 = vshra.s32 %v4453_v58, 16  ;;  %v4459_v30 = vsel %vm779_vm15, %v4086_v14, 128  ;;  %1510 = vmin.xlane.f32.xlu0 %v4450_v6 }
 0x208   :  { %5728 = vst [vmem:[#allocation59_spill] sm:$0xff] %v4459_v30  ;;  %v1493_v21 = vshra.s32 %v4459_v30, 16  ;;  %v705_v60 = vpop.xlane.xlu0 %704  ;;  %5729 = vst [vmem:[#allocation60_spill] sm:$0xff] %v4463_v49 }
 0x209   :  { %vm784_vm0 = vcmp.eq.f32.partialorder %v4023_v26, %v705_v60  ;;  %v707_v16 = vpop.xlane.xlu1 %706  ;;  %v4466_v42 = vcvt.s32.f32 %v1479_v36  ;;  %v5734_v36 = vld [vmem:[#allocation2_spill] sm:$0xff] }
 0x20a   :  { %v4469_v8 = vsel %vm784_vm0, %v4086_v14, 128  ;;  %vm785_vm1 = vcmp.eq.f32.partialorder %v4026_v37, %v707_v16  ;;  %1524 = vmin.xlane.f32.xlu1 %v4463_v49  ;;  %v4479_v60 = vcvt.s32.f32 %v1493_v21  ;;  %v5737_v16 = vld [vmem:[#allocation3_spill] sm:$0xff] }
 0x20b   :  { %5730 = vst [vmem:[#allocation61_spill] sm:$0xff] %v4466_v42  ;;  %5731 = vst [vmem:[#allocation62_spill] sm:$0xff] %v4469_v8  ;;  %v1563_v53 = vshra.s32 %v4469_v8, 16  ;;  %v4475_v6 = vsel %vm785_vm1, %v4086_v14, 128  ;;  %1482 = vmin.xlane.f32.xlu0 %v4466_v42 }
 0x20c   :  { %5732 = vst [vmem:[#allocation63_spill] sm:$0xff] %v4475_v6  ;;  %v1577_v33 = vshra.s32 %v4475_v6, 16  ;;  %v701_v26 = vpop.xlane.xlu0 %700  ;;  %5733 = vst [vmem:[#allocation64_spill] sm:$0xff] %v4479_v60 }
 0x20d   :  { %vm782_vm2 = vcmp.eq.f32.partialorder %v5734_v36, %v701_v26  ;;  %v703_v30 = vpop.xlane.xlu1 %702  ;;  %v4482_v18 = vcvt.s32.f32 %v1563_v53  ;;  %v5740_v53 = vld [vmem:[#allocation4_spill] sm:$0xff] }
 0x20e   :  { %v4485_v37 = vsel %vm782_vm2, %v4086_v14, 128  ;;  %vm783_vm3 = vcmp.eq.f32.partialorder %v5737_v16, %v703_v30  ;;  %1496 = vmin.xlane.f32.xlu1 %v4479_v60  ;;  %v4495_v36 = vcvt.s32.f32 %v1577_v33  ;;  %v5743_v16 = vld [vmem:[#allocation5_spill] sm:$0xff] }
 0x20f   :  { %5735 = vst [vmem:[#allocation2_spill] sm:$0xff] %v4482_v18  ;;  %5736 = vst [vmem:[#allocation65_spill] sm:$0xff] %v4485_v37  ;;  %v1535_v8 = vshra.s32 %v4485_v37, 16  ;;  %v4491_v49 = vsel %vm783_vm3, %v4086_v14, 128  ;;  %1566 = vmin.xlane.f32.xlu0 %v4482_v18 }
 0x210   :  { %5738 = vst [vmem:[#allocation3_spill] sm:$0xff] %v4491_v49  ;;  %v1549_v21 = vshra.s32 %v4491_v49, 16  ;;  %v713_v26 = vpop.xlane.xlu0 %712  ;;  %5739 = vst [vmem:[#allocation66_spill] sm:$0xff] %v4495_v36 }
 0x211   :  { %vm788_vm4 = vcmp.eq.f32.partialorder %v5740_v53, %v713_v26  ;;  %v715_v6 = vpop.xlane.xlu1 %714  ;;  %v4498_v42 = vcvt.s32.f32 %v1535_v8  ;;  %v5746_v8 = vld [vmem:[#allocation6_spill] sm:$0xff] }
 0x212   :  { %v4501_v30 = vsel %vm788_vm4, %v4086_v14, 128  ;;  %vm789_vm5 = vcmp.eq.f32.partialorder %v5743_v16, %v715_v6  ;;  %1580 = vmin.xlane.f32.xlu1 %v4495_v36  ;;  %v4511_v53 = vcvt.s32.f32 %v1549_v21  ;;  %v5748_v16 = vld [vmem:[#allocation7_spill] sm:$0xff] }
 0x213   :  { %5741 = vst [vmem:[#allocation4_spill] sm:$0xff] %v4498_v42  ;;  %5742 = vst [vmem:[#allocation67_spill] sm:$0xff] %v4501_v30  ;;  %v1619_v60 = vshra.s32 %v4501_v30, 16  ;;  %v4507_v18 = vsel %vm789_vm5, %v4086_v14, 128  ;;  %1538 = vmin.xlane.f32.xlu0 %v4498_v42 }
 0x214   :  { %5744 = vst [vmem:[#allocation5_spill] sm:$0xff] %v4507_v18  ;;  %v1633_v33 = vshra.s32 %v4507_v18, 16  ;;  %v709_v26 = vpop.xlane.xlu0 %708  ;;  %5745 = vst [vmem:[#allocation68_spill] sm:$0xff] %v4511_v53 }
 0x215   :  { %vm786_vm6 = vcmp.eq.f32.partialorder %v5746_v8, %v709_v26  ;;  %v711_v49 = vpop.xlane.xlu1 %710  ;;  %v4514_v37 = vcvt.s32.f32 %v1619_v60  ;;  %v5751_v60 = vld [vmem:[#allocation8_spill] sm:$0xff] }
 0x216   :  { %v4517_v6 = vsel %vm786_vm6, %v4086_v14, 128  ;;  %vm787_vm7 = vcmp.eq.f32.partialorder %v5748_v16, %v711_v49  ;;  %1552 = vmin.xlane.f32.xlu1 %v4511_v53  ;;  %v4527_v8 = vcvt.s32.f32 %v1633_v33  ;;  %v5754_v16 = vld [vmem:[#allocation9_spill] sm:$0xff] }
 0x217   :  { %5747 = vst [vmem:[#allocation6_spill] sm:$0xff] %v4514_v37  ;;  %v1591_v30 = vshra.s32 %v4517_v6, 16  ;;  %v4523_v36 = vsel %vm787_vm7, %v4086_v14, 128  ;;  %1622 = vmin.xlane.f32.xlu0 %v4514_v37 }
 0x218   :  { %5749 = vst [vmem:[#allocation7_spill] sm:$0xff] %v4523_v36  ;;  %v1605_v21 = vshra.s32 %v4523_v36, 16  ;;  %v721_v26 = vpop.xlane.xlu0 %720  ;;  %5750 = vst [vmem:[#allocation69_spill] sm:$0xff] %v4527_v8 }
 0x219   :  { %vm792_vm8 = vcmp.eq.f32.partialorder %v5751_v60, %v721_v26  ;;  %v723_v18 = vpop.xlane.xlu1 %722  ;;  %v4530_v42 = vcvt.s32.f32 %v1591_v30 }
 0x21a   :  { %v4533_v49 = vsel %vm792_vm8, %v4086_v14, 128  ;;  %vm793_vm9 = vcmp.eq.f32.partialorder %v5754_v16, %v723_v18  ;;  %1636 = vmin.xlane.f32.xlu1 %v4527_v8  ;;  %v4543_v60 = vcvt.s32.f32 %v1605_v21 }
 0x21b   :  { %5752 = vst [vmem:[#allocation8_spill] sm:$0xff] %v4530_v42  ;;  %5753 = vst [vmem:[#allocation70_spill] sm:$0xff] %v4533_v49  ;;  %v1675_v53 = vshra.s32 %v4533_v49, 16  ;;  %v4539_v37 = vsel %vm793_vm9, %v4086_v14, 128  ;;  %1594 = vmin.xlane.f32.xlu0 %v4530_v42 }
 0x21c   :  { %5755 = vst [vmem:[#allocation9_spill] sm:$0xff] %v4539_v37  ;;  %v1689_v33 = vshra.s32 %v4539_v37, 16  ;;  %v717_v26 = vpop.xlane.xlu0 %716  ;;  %5756 = vst [vmem:[#allocation71_spill] sm:$0xff] %v4543_v60 }
 0x21d   :  { %vm790_vm10 = vcmp.eq.f32.partialorder %v4062_v25, %v717_v26  ;;  %v719_v30 = vpop.xlane.xlu1 %718  ;;  %v4546_v36 = vcvt.s32.f32 %v1675_v53 }
 0x21e   :  { %v4549_v18 = vsel %vm790_vm10, %v4086_v14, 128  ;;  %vm791_vm11 = vcmp.eq.f32.partialorder %v4066_v45, %v719_v30  ;;  %1608 = vmin.xlane.f32.xlu1 %v4543_v60  ;;  %v4561_v53 = vcvt.s32.f32 %v1689_v33 }
 0x21f   :  { %5757 = vst [vmem:[#allocation72_spill] sm:$0xff] %v4546_v36  ;;  %5758 = vst [vmem:[#allocation73_spill] sm:$0xff] %v4549_v18  ;;  %v1647_v16 = vshra.s32 %v4549_v18, 16  ;;  %v4555_v49 = vsel %vm791_vm11, %v4086_v14, 128  ;;  %1678 = vmin.xlane.f32.xlu0 %v4546_v36 }
 0x220   :  { %5759 = vst [vmem:[#allocation74_spill] sm:$0xff] %v4555_v49  ;;  %v1661_v21 = vshra.s32 %v4555_v49, 16  ;;  %v4559_v25 = vpop.xlane.xlu0 %728  ;;  %5760 = vst [vmem:[#allocation75_spill] sm:$0xff] %v4561_v53 }
 0x221   :  { %v4563_v26 = vpop.xlane.xlu1 %730  ;;  %v4565_v37 = vcvt.s32.f32 %v1647_v16 }
 0x222   :  { %1692 = vmin.xlane.f32.xlu1 %v4561_v53  ;;  %v4569_v30 = vcvt.s32.f32 %v1661_v21 }
 0x223   :  { %5761 = vst [vmem:[#allocation76_spill] sm:$0xff] %v4565_v37  ;;  %1650 = vmin.xlane.f32.xlu0 %v4565_v37 }
 0x224   :  { %v725_v45 = vpop.xlane.xlu0 %724  ;;  %5762 = vst [vmem:[#allocation77_spill] sm:$0xff] %v4569_v30 }
 0x225   :  { %vm794_vm12 = vcmp.eq.f32.partialorder %v4078_v17, %v725_v45  ;;  %v727_v36 = vpop.xlane.xlu1 %726  ;;  %v1950_v17 = vld [vmem:[%s5556_s3] sm:$0xff] }
 0x226   :  { %v4573_v49 = vsel %vm794_vm12, %v4086_v14, 128  ;;  %vm795_vm13 = vcmp.eq.f32.partialorder %v4082_v46, %v727_v36  ;;  %1664 = vmin.xlane.f32.xlu1 %v4569_v30  ;;  %v1951_v46 = vld [vmem:[%s5556_s3 + $0x8] sm:$0xff]  ;;  %v5767_v36 = vld [vmem:[#allocation12_spill] sm:$0xff] }
 0x227   :  { %5763 = vst [vmem:[#allocation78_spill] sm:$0xff] %v4573_v49  ;;  %v1703_v33 = vshra.s32 %v4573_v49, 16  ;;  %v4579_v16 = vsel %vm795_vm13, %v4086_v14, 128  ;;  %v890_v45 = vand.u32 65535, %v5767_v36  ;;  %v3473_v30 = vpack.c.bf16 %v1951_v46, %v1950_v17  ;;  %v1954_v17 = vld [vmem:[%s5556_s3 + $0x20] sm:$0xff] }
 0x228   :  { %5764 = vst [vmem:[#allocation79_spill] sm:$0xff] %v4579_v16  ;;  %v1717_v53 = vshra.s32 %v4579_v16, 16  ;;  %v904_v16 = vand.u32 65535, %v4102_v48  ;;  %v1956_v48 = vld [vmem:[%s5556_s3 + $0x30] sm:$0xff]  ;;  %v5770_v46 = vld [vmem:[#allocation14_spill] sm:$0xff] }
 0x229   :  { %v4582_v37 = vcvt.s32.f32 %v1703_v33  ;;  %3474 = vmatprep.subr.bf16.mxu1 %v3473_v30  ;;  %v1953_v33 = vld [vmem:[%s5556_s3 + $0x18] sm:$0xff]  ;;  %v892_v8 = vcvt.s32.f32 %v890_v45  ;;  %v876_v36 = vand.u32 65535, %v5770_v46 }
 0x22a   :  { %v4584_v21 = vcvt.s32.f32 %v1717_v53  ;;  %3476 = vmatpush3.bf16.msra.mxu1 %v3473_v30  ;;  %v1952_v53 = vld [vmem:[%s5556_s3 + $0x10] sm:$0xff] }
 0x22b   :  { %5765 = vst [vmem:[#allocation80_spill] sm:$0xff] %v4582_v37  ;;  %1706 = vmin.xlane.f32.xlu0 %v4582_v37  ;;  %v3477_v60 = vpack.c.bf16 %v1953_v33, %v1952_v53  ;;  %v1957_v33 = vld [vmem:[%s5556_s3 + $0x38] sm:$0xff] }
 0x22c   :  { %5766 = vst [vmem:[#allocation81_spill] sm:$0xff] %v4584_v21  ;;  %1720 = vmin.xlane.f32.xlu1 %v4584_v21  ;;  %v5768_v21 = vld [vmem:[#allocation13_spill] sm:$0xff]  ;;  %v3485_v42 = vpack.c.bf16 %v1957_v33, %v1956_v48 }
 0x22d   :  { %v862_v37 = vand.u32 65535, %v5768_v21  ;;  %3478 = vmatprep.subr.bf16.mxu1 %v3477_v60  ;;  %v1955_v21 = vld [vmem:[%s5556_s3 + $0x28] sm:$0xff] }
 0x22e   :  { %3480 = vmatpush3.bf16.msra.mxu1 %v3477_v60  ;;  %v906_v60 = vcvt.s32.f32 %v904_v16  ;;  %v3481_v53 = vpack.c.bf16 %v1955_v21, %v1954_v17  ;;  %v1959_v16 = vld [vmem:[%s5556_s3 + $0x48] sm:$0xff]  ;;  %v878_v21 = vcvt.s32.f32 %v876_v36 }
 0x230   :  { %3482 = vmatprep.subr.bf16.mxu1 %v3481_v53 }
 0x232   :  { %3484 = vmatpush3.bf16.msra.mxu1 %v3481_v53  ;;  %v1002_v53 = vand.u32 65535, %v4149_v3  ;;  %v1961_v3 = vld [vmem:[%s5556_s3 + $0x58] sm:$0xff] }
 0x233   :  { %3486 = vmatprep.subr.bf16.mxu1 %v3485_v42 }
 0x236   :  { %3488 = vmatpush3.bf16.msra.mxu1 %v3485_v42  ;;  %v5778_v42 = vld [vmem:[#allocation20_spill] sm:$0xff] }
 0x23b   :  { %v4603_v49 = vpop.xlane.xlu0 %894 }
 0x23c   :  { %5769 = vst [vmem:[#allocation12_spill] sm:$0xff] %v4603_v49  ;;  %vm896_vm14 = vcmp.eq.f32.partialorder %v4098_v55, %v4603_v49  ;;  %v5773_v49 = vld [vmem:[#allocation15_spill] sm:$0xff] }
 0x23d   :  { %v897_v30 = vsel %vm896_vm14, %v892_v8, inf  ;;  %v864_v8 = vcvt.s32.f32 %v862_v37  ;;  %v1958_v37 = vld [vmem:[%s5556_s3 + $0x40] sm:$0xff] }
 0x23e   :  { %898 = vmin.xlane.f32.xlu0 %v897_v30  ;;  %v946_v30 = vand.u32 65535, %v4117_v11  ;;  %v5774_v11 = vld [vmem:[#allocation16_spill] sm:$0xff] }
 0x23f   :  { %v4617_v45 = vpop.xlane.xlu0 %866  ;;  %v4619_v55 = vpop.xlane.xlu1 %908  ;;  %v960_v17 = vand.u32 65535, %v5774_v11  ;;  %v5776_v11 = vld [vmem:[#allocation18_spill] sm:$0xff] }
 0x240   :  { %5771 = vst [vmem:[#allocation13_spill] sm:$0xff] %v4617_v45  ;;  %5772 = vst [vmem:[#allocation14_spill] sm:$0xff] %v4619_v55  ;;  %vm868_vm15 = vcmp.eq.f32.partialorder %v4110_v54, %v4617_v45  ;;  %vm910_vm0 = vcmp.eq.f32.partialorder %v5773_v49, %v4619_v55  ;;  %v918_v49 = vand.u32 65535, %v4133_v62  ;;  %v948_v48 = vcvt.s32.f32 %v946_v30 }
 0x241   :  { %v869_v46 = vsel %vm868_vm15, %v864_v8, inf  ;;  %v911_v18 = vsel %vm910_vm0, %v906_v60, inf  ;;  %v3489_v60 = vpack.c.bf16 %v1959_v16, %v1958_v37  ;;  %v932_v55 = vand.u32 65535, %v5776_v11  ;;  %v5777_v37 = vld [vmem:[#allocation19_spill] sm:$0xff] }
 0x242   :  { %870 = vmin.xlane.f32.xlu0 %v869_v46  ;;  %912 = vmin.xlane.f32.xlu1 %v911_v18  ;;  %v5775_v46 = vld [vmem:[#allocation17_spill] sm:$0xff]  ;;  %v962_v62 = vcvt.s32.f32 %v960_v17  ;;  %v1960_v17 = vld [vmem:[%s5556_s3 + $0x50] sm:$0xff] }
 0x243   :  { %v4636_v54 = vpop.xlane.xlu1 %880  ;;  %3490 = vmatprep.subr.bf16.mxu1 %v3489_v60 }
 0x244   :  { %v4639_v8 = vpop.xlane.xlu0 %950  ;;  %vm882_vm1 = vcmp.eq.f32.partialorder %v4126_v9, %v4636_v54  ;;  %v920_v9 = vcvt.s32.f32 %v918_v49  ;;  %v934_v49 = vcvt.s32.f32 %v932_v55  ;;  %3492 = vmatpush3.bf16.msra.mxu1 %v3489_v60  ;;  %v1962_v55 = vld [vmem:[%s5556_s3 + $0x60] sm:$0xff] }
 0x245   :  { %v883_v33 = vsel %vm882_vm1, %v878_v21, inf  ;;  %vm952_vm2 = vcmp.eq.f32.partialorder %v5775_v46, %v4639_v8  ;;  %v1016_v21 = vand.u32 65535, %v5778_v42  ;;  %v5780_v60 = vld [vmem:[#allocation22_spill] sm:$0xff] }
 0x246   :  { %884 = vmin.xlane.f32.xlu1 %v883_v33  ;;  %v953_v18 = vsel %vm952_vm2, %v948_v48, inf  ;;  %v3493_v48 = vpack.c.bf16 %v1961_v3, %v1960_v17  ;;  %v974_v33 = vand.u32 65535, %v4165_v10  ;;  %v1963_v10 = vld [vmem:[%s5556_s3 + $0x68] sm:$0xff] }
 0x247   :  { %954 = vmin.xlane.f32.xlu0 %v953_v18  ;;  %v4646_v36 = vpop.xlane.xlu1 %964  ;;  %v1004_v18 = vcvt.s32.f32 %v1002_v53  ;;  %v1018_v53 = vcvt.s32.f32 %v1016_v21  ;;  %v1964_v21 = vld [vmem:[%s5556_s3 + $0x70] sm:$0xff] }
 0x248   :  { %v4649_v45 = vpop.xlane.xlu0 %922  ;;  %vm966_vm3 = vcmp.eq.f32.partialorder %v4142_v51, %v4646_v36  ;;  %3494 = vmatprep.subr.bf16.mxu1 %v3493_v48  ;;  %v976_v3 = vcvt.s32.f32 %v974_v33 }
 0x249   :  { %v967_v30 = vsel %vm966_vm3, %v962_v62, inf  ;;  %vm924_vm4 = vcmp.eq.f32.partialorder %v5777_v37, %v4649_v45  ;;  %v5779_v62 = vld [vmem:[#allocation21_spill] sm:$0xff]  ;;  %3496 = vmatpush3.bf16.msra.mxu1 %v3493_v48  ;;  %v3497_v37 = vpack.c.bf16 %v1963_v10, %v1962_v55  ;;  %v5782_v48 = vld [vmem:[#allocation24_spill] sm:$0xff] }
 0x24a   :  { %968 = vmin.xlane.f32.xlu1 %v967_v30  ;;  %v925_v16 = vsel %vm924_vm4, %v920_v9, inf  ;;  %v988_v30 = vand.u32 65535, %v5780_v60 }
 0x24b   :  { %926 = vmin.xlane.f32.xlu0 %v925_v16  ;;  %v4662_v51 = vpop.xlane.xlu1 %936  ;;  %v1058_v16 = vand.u32 65535, %v4181_v15  ;;  %3498 = vmatprep.subr.bf16.mxu1 %v3497_v37  ;;  %v1965_v15 = vld [vmem:[%s5556_s3 + $0x78] sm:$0xff] }
 0x24c   :  { %v4665_v46 = vpop.xlane.xlu0 %1006  ;;  %vm938_vm5 = vcmp.eq.f32.partialorder %v4158_v50, %v4662_v51  ;;  %v990_v33 = vcvt.s32.f32 %v988_v30 }
 0x24d   :  { %v939_v11 = vsel %vm938_vm5, %v934_v49, inf  ;;  %vm1008_vm6 = vcmp.eq.f32.partialorder %v5779_v62, %v4665_v46  ;;  %v5781_v49 = vld [vmem:[#allocation23_spill] sm:$0xff]  ;;  %3500 = vmatpush3.bf16.msra.mxu1 %v3497_v37  ;;  %v3501_v62 = vpack.c.bf16 %v1965_v15, %v1964_v21  ;;  %v1060_v10 = vcvt.s32.f32 %v1058_v16 }
 0x24e   :  { %940 = vmin.xlane.f32.xlu1 %v939_v11  ;;  %v1009_v9 = vsel %vm1008_vm6, %v1004_v18, inf  ;;  %v1072_v11 = vand.u32 65535, %v5782_v48  ;;  %v5785_v21 = vld [vmem:[#allocation27_spill] sm:$0xff]  ;;  %v5786_v48 = vld [vmem:[#allocation28_spill] sm:$0xff] }
 0x24f   :  { %1010 = vmin.xlane.f32.xlu0 %v1009_v9  ;;  %v4678_v50 = vpop.xlane.xlu1 %1020  ;;  %v1030_v9 = vand.u32 65535, %v4197_v22  ;;  %3502 = vmatprep.subr.bf16.mxu1 %v3501_v62  ;;  %v1114_v22 = vand.u32 65535, %v4213_v27  ;;  %v1086_v27 = vand.u32 65535, %v4229_v34  ;;  %v1170_v34 = vand.u32 65535, %v4245_v39 }
 0x250   :  { %v4681_v17 = vpop.xlane.xlu0 %978  ;;  %vm1022_vm7 = vcmp.eq.f32.partialorder %v4174_v43, %v4678_v50  ;;  %v1074_v37 = vcvt.s32.f32 %v1072_v11 }
 0x251   :  { %v1023_v42 = vsel %vm1022_vm7, %v1018_v53, inf  ;;  %vm980_vm8 = vcmp.eq.f32.partialorder %v5781_v49, %v4681_v17  ;;  %v5783_v53 = vld [vmem:[#allocation25_spill] sm:$0xff]  ;;  %3504 = vmatpush3.bf16.msra.mxu1 %v3501_v62 }
 0x252   :  { %1024 = vmin.xlane.f32.xlu1 %v1023_v42  ;;  %v981_v18 = vsel %vm980_vm8, %v976_v3, inf  ;;  %v5784_v42 = vld [vmem:[#allocation26_spill] sm:$0xff] }
 0x253   :  { %982 = vmin.xlane.f32.xlu0 %v981_v18  ;;  %v4694_v43 = vpop.xlane.xlu1 %992  ;;  %v1044_v49 = vand.u32 65535, %v5784_v42 }
 0x254   :  { %v4697_v55 = vpop.xlane.xlu0 %1062  ;;  %vm994_vm9 = vcmp.eq.f32.partialorder %v4190_v41, %v4694_v43  ;;  %v1032_v41 = vcvt.s32.f32 %v1030_v9 }
 0x255   :  { %v995_v60 = vsel %vm994_vm9, %v990_v33, inf  ;;  %vm1064_vm10 = vcmp.eq.f32.partialorder %v5783_v53, %v4697_v55  ;;  %v1128_v33 = vand.u32 65535, %v5786_v48  ;;  %v1046_v11 = vcvt.s32.f32 %v1044_v49 }
 0x256   :  { %996 = vmin.xlane.f32.xlu1 %v995_v60  ;;  %v1065_v3 = vsel %vm1064_vm10, %v1060_v10, inf  ;;  %v5787_v60 = vld [vmem:[#allocation29_spill] sm:$0xff] }
 0x257   :  { %1066 = vmin.xlane.f32.xlu0 %v1065_v3  ;;  %v4704_v30 = vpop.xlane.xlu1 %1076  ;;  %v5788_v3 = vld [vmem:[#allocation30_spill] sm:$0xff]  ;;  %v1130_v49 = vcvt.s32.f32 %v1128_v33 }
 0x258   :  { %v4707_v18 = vpop.xlane.xlu0 %1034  ;;  %vm1078_vm11 = vcmp.eq.f32.partialorder %v4206_v59, %v4704_v30  ;;  %v1116_v59 = vcvt.s32.f32 %v1114_v22  ;;  %v1100_v42 = vand.u32 65535, %v5788_v3 }
 0x259   :  { %v1079_v16 = vsel %vm1078_vm11, %v1074_v37, inf  ;;  %vm1036_vm12 = vcmp.eq.f32.partialorder %v5785_v21, %v4707_v18 }
 0x25a   :  { %1080 = vmin.xlane.f32.xlu1 %v1079_v16  ;;  %v1037_v15 = vsel %vm1036_vm12, %v1032_v41, inf  ;;  %v5789_v16 = vld [vmem:[#allocation31_spill] sm:$0xff]  ;;  %v1102_v39 = vcvt.s32.f32 %v1100_v42  ;;  %v5794_v42 = vld [vmem:[#allocation34_spill] sm:$0xff] }
 0x25b   :  { %1038 = vmin.xlane.f32.xlu0 %v1037_v15  ;;  %v4714_v10 = vpop.xlane.xlu1 %1048  ;;  %v5790_v15 = vld [vmem:[#allocation32_spill] sm:$0xff] }
 0x25c   :  { %v4717_v62 = vpop.xlane.xlu0 %1118  ;;  %vm1050_vm13 = vcmp.eq.f32.partialorder %v4222_v0, %v4714_v10  ;;  %v1088_v0 = vcvt.s32.f32 %v1086_v27  ;;  %v1184_v48 = vand.u32 65535, %v5790_v15 }
 0x25d   :  { %v1051_v9 = vsel %vm1050_vm13, %v1046_v11, inf  ;;  %vm1120_vm14 = vcmp.eq.f32.partialorder %v5787_v60, %v4717_v62  ;;  %v5791_v11 = vld [vmem:[#allocation10_spill] sm:$0xff]  ;;  %v5792_v60 = vld [vmem:[#allocation33_spill] sm:$0xff] }
 0x25e   :  { %1052 = vmin.xlane.f32.xlu1 %v1051_v9  ;;  %v1121_v53 = vsel %vm1120_vm14, %v1116_v59, inf  ;;  %vm796_vm1 = vcmp.eq.f32.partialorder %v5791_v11, %v4559_v25  ;;  %v1142_v59 = vand.u32 65535, %v4261_v47  ;;  %v5793_v25 = vld [vmem:[#allocation11_spill] sm:$0xff]  ;;  %v1156_v47 = vand.u32 65535, %v5794_v42 }
 0x25f   :  { %1122 = vmin.xlane.f32.xlu0 %v1121_v53  ;;  %v4724_v37 = vpop.xlane.xlu1 %1132  ;;  %v4746_v53 = vsel %vm796_vm1, %v4086_v14, 128  ;;  %vm797_vm4 = vcmp.eq.f32.partialorder %v5793_v25, %v4563_v26  ;;  %v1198_v11 = vand.u32 65535, %v4293_v2  ;;  %v5796_v25 = vld [vmem:[#allocation35_spill] sm:$0xff] }
 0x260   :  { %v4727_v41 = vpop.xlane.xlu0 %1090  ;;  %vm1134_vm15 = vcmp.eq.f32.partialorder %v4238_v7, %v4724_v37  ;;  %v1172_v7 = vcvt.s32.f32 %v1170_v34  ;;  %v1144_v34 = vcvt.s32.f32 %v1142_v59 }
 0x261   :  { %v1135_v22 = vsel %vm1134_vm15, %v1130_v49, inf  ;;  %vm1092_vm0 = vcmp.eq.f32.partialorder %v5789_v16, %v4727_v41  ;;  %v4759_v16 = vsel %vm797_vm4, %v4086_v14, 128 }
 0x262   :  { %1136 = vmin.xlane.f32.xlu1 %v1135_v22  ;;  %v1093_v21 = vsel %vm1092_vm0, %v1088_v0, inf  ;;  %v1186_v0 = vcvt.s32.f32 %v1184_v48  ;;  %v1731_v22 = vshra.s32 %v4746_v53, 16  ;;  %v1158_v48 = vcvt.s32.f32 %v1156_v47 }
 0x263   :  { %1094 = vmin.xlane.f32.xlu0 %v1093_v21  ;;  %v4736_v33 = vpop.xlane.xlu1 %1104  ;;  %v1200_v47 = vcvt.s32.f32 %v1198_v11 }
 0x264   :  { %v4739_v9 = vpop.xlane.xlu0 %1174  ;;  %vm1106_vm2 = vcmp.eq.f32.partialorder %v4254_v12, %v4736_v33 }
 0x265   :  { %v1107_v27 = vsel %vm1106_vm2, %v1102_v39, inf  ;;  %vm1176_vm3 = vcmp.eq.f32.partialorder %v5792_v60, %v4739_v9 }
 0x266   :  { %1108 = vmin.xlane.f32.xlu1 %v1107_v27  ;;  %v1177_v3 = vsel %vm1176_vm3, %v1172_v7, inf  ;;  %v4771_v7 = vcvt.s32.f32 %v1731_v22 }
 0x267   :  { %1178 = vmin.xlane.f32.xlu0 %v1177_v3  ;;  %v4751_v49 = vpop.xlane.xlu1 %1188  ;;  %v1226_v3 = vand.u32 65535, %v5796_v25 }
 0x268   :  { %v4753_v12 = vpop.xlane.xlu0 %1146  ;;  %vm1190_vm5 = vcmp.eq.f32.partialorder %v4270_v19, %v4751_v49  ;;  %v1745_v19 = vshra.s32 %v4759_v16, 16 }
 0x269   :  { %v1191_v26 = vsel %vm1190_vm5, %v1186_v0, inf  ;;  %vm1148_vm6 = vcmp.eq.f32.partialorder %v4274_v31, %v4753_v12  ;;  %v5795_v31 = vld [vmem:[#allocation38_spill] sm:$0xff]  ;;  %v5797_v0 = vld [vmem:[#allocation36_spill] sm:$0xff] }
 0x26a   :  { %1192 = vmin.xlane.f32.xlu1 %v1191_v26  ;;  %v1149_v21 = vsel %vm1148_vm6, %v1144_v34, inf  ;;  %v1212_v27 = vand.u32 65535, %v5795_v31  ;;  %v4780_v42 = vcvt.s32.f32 %v1745_v19  ;;  %v1240_v34 = vand.u32 65535, %v5797_v0  ;;  %v5799_v31 = vld [vmem:[#allocation42_spill] sm:$0xff] }
 0x26b   :  { %1150 = vmin.xlane.f32.xlu0 %v1149_v21  ;;  %v4763_v15 = vpop.xlane.xlu1 %1160  ;;  %v5798_v21 = vld [vmem:[#allocation37_spill] sm:$0xff]  ;;  %v1268_v25 = vand.u32 65535, %v5799_v31 }
 0x26c   :  { %v4767_v39 = vpop.xlane.xlu0 %1230  ;;  %vm1162_vm7 = vcmp.eq.f32.partialorder %v4286_v24, %v4763_v15  ;;  %v1214_v26 = vcvt.s32.f32 %v1212_v27 }
 0x26d   :  { %v1163_v59 = vsel %vm1162_vm7, %v1158_v48, inf  ;;  %vm1232_vm9 = vcmp.eq.f32.partialorder %v5798_v21, %v4767_v39  ;;  %v1254_v48 = vand.u32 65535, %v4325_v20 }
 0x26e   :  { %1164 = vmin.xlane.f32.xlu1 %v1163_v59 }
 0x26f   :  { %1734 = vmin.xlane.f32.xlu0 %v4771_v7  ;;  %v4775_v60 = vpop.xlane.xlu1 %1244  ;;  %v1256_v21 = vcvt.s32.f32 %v1254_v48 }
 0x270   :  { %v4778_v2 = vpop.xlane.xlu0 %1202  ;;  %vm1246_vm11 = vcmp.eq.f32.partialorder %v4302_v56, %v4775_v60 }
 0x271   :  { %vm1204_vm8 = vcmp.eq.f32.partialorder %v4306_v44, %v4778_v2  ;;  %v1228_v44 = vcvt.s32.f32 %v1226_v3 }
 0x272   :  { %1748 = vmin.xlane.f32.xlu1 %v4780_v42  ;;  %v1205_v24 = vsel %vm1204_vm8, %v1200_v47, inf  ;;  %v1242_v47 = vcvt.s32.f32 %v1240_v34  ;;  %v1310_v34 = vand.u32 65535, %v4357_v38 }
 0x273   :  { %1206 = vmin.xlane.f32.xlu0 %v1205_v24  ;;  %v4786_v22 = vpop.xlane.xlu1 %1216  ;;  %v1233_v59 = vsel %vm1232_vm9, %v1228_v44, inf  ;;  %v5800_v24 = vld [vmem:[#allocation39_spill] sm:$0xff] }
 0x274   :  { %v4791_v19 = vpop.xlane.xlu0 %1286  ;;  %vm1218_vm10 = vcmp.eq.f32.partialorder %v4318_v32, %v4786_v22  ;;  %v1282_v20 = vand.u32 65535, %v5800_v24  ;;  %v1247_v32 = vsel %vm1246_vm11, %v1242_v47, inf  ;;  %v5803_v24 = vld [vmem:[#allocation46_spill] sm:$0xff] }
 0x275   :  { %v1219_v11 = vsel %vm1218_vm10, %v1214_v26, inf  ;;  %v5801_v26 = vld [vmem:[#allocation40_spill] sm:$0xff] }
 0x276   :  { %1220 = vmin.xlane.f32.xlu1 %v1219_v11  ;;  %v1296_v44 = vand.u32 65535, %v5801_v26  ;;  %v1270_v11 = vcvt.s32.f32 %v1268_v25 }
 0x277   :  { %1234 = vmin.xlane.f32.xlu0 %v1233_v59  ;;  %v4798_v27 = vpop.xlane.xlu1 %1300  ;;  %v5802_v59 = vld [vmem:[#allocation41_spill] sm:$0xff] }
 0x278   :  { %v4801_v0 = vpop.xlane.xlu0 %1258  ;;  %vm1288_vm13 = vcmp.eq.f32.partialorder %v5802_v59, %v4791_v19  ;;  %vm1302_vm15 = vcmp.eq.f32.partialorder %v4334_v5, %v4798_v27  ;;  %v5805_v59 = vld [vmem:[#allocation44_spill] sm:$0xff]  ;;  %v5806_v5 = vld [vmem:[#allocation45_spill] sm:$0xff] }
 0x279   :  { %vm1260_vm12 = vcmp.eq.f32.partialorder %v4338_v61, %v4801_v0  ;;  %v1284_v61 = vcvt.s32.f32 %v1282_v20 }
 0x27a   :  { %1248 = vmin.xlane.f32.xlu1 %v1247_v32  ;;  %v1261_v3 = vsel %vm1260_vm12, %v1256_v21, inf  ;;  %v1324_v21 = vand.u32 65535, %v5803_v24  ;;  %v1298_v32 = vcvt.s32.f32 %v1296_v44 }
 0x27b   :  { %1262 = vmin.xlane.f32.xlu0 %v1261_v3  ;;  %v4806_v56 = vpop.xlane.xlu1 %1272  ;;  %v1289_v47 = vsel %vm1288_vm13, %v1284_v61, inf  ;;  %v5804_v3 = vld [vmem:[#allocation43_spill] sm:$0xff]  ;;  %v1352_v61 = vand.u32 65535, %v5805_v59 }
 0x27c   :  { %vm1274_vm14 = vcmp.eq.f32.partialorder %v4350_v13, %v4806_v56  ;;  %v4813_v48 = vpop.xlane.xlu0 %1342  ;;  %v1338_v38 = vand.u32 65535, %v5804_v3  ;;  %v1312_v13 = vcvt.s32.f32 %v1310_v34  ;;  %v1303_v20 = vsel %vm1302_vm15, %v1298_v32, inf  ;;  %v5807_v3 = vld [vmem:[#allocation50_spill] sm:$0xff] }
 0x27d   :  { %v1275_v31 = vsel %vm1274_vm14, %v1270_v11, inf  ;;  %vm1344_vm1 = vcmp.eq.f32.partialorder %v5806_v5, %v4813_v48  ;;  %v1326_v44 = vcvt.s32.f32 %v1324_v21  ;;  %v1354_v21 = vcvt.s32.f32 %v1352_v61 }
 0x27e   :  { %1276 = vmin.xlane.f32.xlu1 %v1275_v31 }
 0x27f   :  { %1290 = vmin.xlane.f32.xlu0 %v1289_v47  ;;  %v4818_v25 = vpop.xlane.xlu1 %1356  ;;  %v1366_v47 = vand.u32 65535, %v4389_v63 }
 0x280   :  { %v4821_v26 = vpop.xlane.xlu0 %1314  ;;  %vm1358_vm3 = vcmp.eq.f32.partialorder %v4367_v52, %v4818_v25  ;;  %v5809_v52 = vld [vmem:[#allocation48_spill] sm:$0xff] }
 0x281   :  { %vm1316_vm0 = vcmp.eq.f32.partialorder %v4370_v35, %v4821_v26  ;;  %v1340_v35 = vcvt.s32.f32 %v1338_v38  ;;  %v1359_v38 = vsel %vm1358_vm3, %v1354_v21, inf }
 0x282   :  { %1304 = vmin.xlane.f32.xlu1 %v1303_v20  ;;  %v1317_v11 = vsel %vm1316_vm0, %v1312_v13, inf  ;;  %v1380_v13 = vand.u32 65535, %v5807_v3 }
 0x283   :  { %1318 = vmin.xlane.f32.xlu0 %v1317_v11  ;;  %v4828_v31 = vpop.xlane.xlu1 %1328  ;;  %v1345_v32 = vsel %vm1344_vm1, %v1340_v35, inf  ;;  %v5808_v11 = vld [vmem:[#allocation47_spill] sm:$0xff]  ;;  %v5810_v35 = vld [vmem:[#allocation49_spill] sm:$0xff] }
 0x284   :  { %vm1330_vm2 = vcmp.eq.f32.partialorder %v4383_v40, %v4828_v31  ;;  %v4833_v34 = vpop.xlane.xlu0 %1398  ;;  %v1394_v63 = vand.u32 65535, %v5808_v11  ;;  %v1368_v40 = vcvt.s32.f32 %v1366_v47  ;;  %v1382_v61 = vcvt.s32.f32 %v1380_v13  ;;  %v5812_v11 = vld [vmem:[#allocation54_spill] sm:$0xff] }
 0x285   :  { %v1331_v24 = vsel %vm1330_vm2, %v1326_v44, inf  ;;  %v1408_v44 = vand.u32 65535, %v5809_v52  ;;  %vm1400_vm5 = vcmp.eq.f32.partialorder %v5810_v35, %v4833_v34 }
 0x286   :  { %1332 = vmin.xlane.f32.xlu1 %v1331_v24 }
 0x287   :  { %1346 = vmin.xlane.f32.xlu0 %v1345_v32  ;;  %v4838_v20 = vpop.xlane.xlu1 %1412  ;;  %v1422_v32 = vand.u32 65535, %v4421_v28  ;;  %v1410_v13 = vcvt.s32.f32 %v1408_v44 }
 0x288   :  { %v4841_v59 = vpop.xlane.xlu0 %1370  ;;  %vm1414_vm7 = vcmp.eq.f32.partialorder %v4399_v57, %v4838_v20  ;;  %v5815_v57 = vld [vmem:[#allocation52_spill] sm:$0xff] }
 0x289   :  { %vm1372_vm4 = vcmp.eq.f32.partialorder %v4402_v4, %v4841_v59  ;;  %v1396_v4 = vcvt.s32.f32 %v1394_v63  ;;  %v1415_v63 = vsel %vm1414_vm7, %v1410_v13, inf  ;;  %v5819_v13 = vld [vmem:[#allocation55_spill] sm:$0xff] }
 0x28a   :  { %1360 = vmin.xlane.f32.xlu1 %v1359_v38  ;;  %v1373_v5 = vsel %vm1372_vm4, %v1368_v40, inf  ;;  %v1436_v40 = vand.u32 65535, %v5812_v11 }
 0x28b   :  { %1374 = vmin.xlane.f32.xlu0 %v1373_v5  ;;  %v4848_v24 = vpop.xlane.xlu1 %1384  ;;  %v1401_v21 = vsel %vm1400_vm5, %v1396_v4, inf  ;;  %v5814_v5 = vld [vmem:[#allocation51_spill] sm:$0xff]  ;;  %v5816_v4 = vld [vmem:[#allocation53_spill] sm:$0xff] }
 0x28c   :  { %vm1386_vm6 = vcmp.eq.f32.partialorder %v4415_v1, %v4848_v24  ;;  %v4853_v47 = vpop.xlane.xlu0 %1454  ;;  %v1450_v28 = vand.u32 65535, %v5814_v5  ;;  %v1424_v1 = vcvt.s32.f32 %v1422_v32  ;;  %v1438_v44 = vcvt.s32.f32 %v1436_v40 }
 0x28d   :  { %5811 = vst [vmem:[#allocation15_spill] sm:$0xff] %v4853_v47  ;;  %v1387_v3 = vsel %vm1386_vm6, %v1382_v61, inf  ;;  %v1464_v61 = vand.u32 65535, %v5815_v57  ;;  %vm1456_vm9 = vcmp.eq.f32.partialorder %v5816_v4, %v4853_v47  ;;  %v5822_v57 = vld [vmem:[#allocation56_spill] sm:$0xff]  ;;  %v5824_v47 = vld [vmem:[#allocation61_spill] sm:$0xff] }
 0x28e   :  { %1388 = vmin.xlane.f32.xlu1 %v1387_v3 }
 0x28f   :  { %1402 = vmin.xlane.f32.xlu0 %v1401_v21  ;;  %v4858_v38 = vpop.xlane.xlu1 %1468  ;;  %v1478_v21 = vand.u32 65535, %v4453_v58  ;;  %v1466_v40 = vcvt.s32.f32 %v1464_v61  ;;  %v1506_v58 = vand.u32 65535, %v5822_v57 }
 0x290   :  { %5813 = vst [vmem:[#allocation16_spill] sm:$0xff] %v4858_v38  ;;  %v4861_v52 = vpop.xlane.xlu0 %1426  ;;  %vm1470_vm11 = vcmp.eq.f32.partialorder %v5819_v13, %v4858_v38  ;;  %v5825_v13 = vld [vmem:[#allocation57_spill] sm:$0xff]  ;;  %v5829_v38 = vld [vmem:[#allocation64_spill] sm:$0xff] }
 0x291   :  { %vm1428_vm8 = vcmp.eq.f32.partialorder %v4434_v23, %v4861_v52  ;;  %v1452_v23 = vcvt.s32.f32 %v1450_v28  ;;  %v1471_v28 = vsel %vm1470_vm11, %v1466_v40, inf }
 0x292   :  { %1416 = vmin.xlane.f32.xlu1 %v1415_v63  ;;  %v1429_v35 = vsel %vm1428_vm8, %v1424_v1, inf  ;;  %v5820_v1 = vld [vmem:[#allocation59_spill] sm:$0xff] }
 0x293   :  { %1430 = vmin.xlane.f32.xlu0 %v1429_v35  ;;  %v4868_v3 = vpop.xlane.xlu1 %1440  ;;  %v1457_v5 = vsel %vm1456_vm9, %v1452_v23, inf  ;;  %v1492_v63 = vand.u32 65535, %v5820_v1  ;;  %v5826_v23 = vld [vmem:[#allocation58_spill] sm:$0xff]  ;;  %v5828_v1 = vld [vmem:[#allocation65_spill] sm:$0xff] }
 0x294   :  { %5817 = vst [vmem:[#allocation17_spill] sm:$0xff] %v4868_v3  ;;  %vm1442_vm10 = vcmp.eq.f32.partialorder %v4447_v29, %v4868_v3  ;;  %v4873_v32 = vpop.xlane.xlu0 %1510  ;;  %v1480_v29 = vcvt.s32.f32 %v1478_v21  ;;  %v1534_v57 = vand.u32 65535, %v5828_v1  ;;  %v3578_v3 = vmov 1.0  }
 0x295   :  { %5818 = vst [vmem:[#allocation18_spill] sm:$0xff] %v4873_v32  ;;  %v1443_v11 = vsel %vm1442_vm10, %v1438_v44, inf  ;;  %vm1512_vm13 = vcmp.eq.f32.partialorder %v5826_v23, %v4873_v32  ;;  %v1494_v61 = vcvt.s32.f32 %v1492_v63  ;;  %v5834_v32 = vld [vmem:[#allocation62_spill] sm:$0xff] }
 0x296   :  { %1444 = vmin.xlane.f32.xlu1 %v1443_v11  ;;  %v1520_v11 = vand.u32 65535, %v5825_v13  ;;  %v5832_v13 = vld [vmem:[#allocation3_spill] sm:$0xff]  ;;  %v1562_v1 = vand.u32 65535, %v5834_v32  ;;  %v1590_v32 = vand.u32 65535, %v4517_v6 }
 0x297   :  { %1458 = vmin.xlane.f32.xlu0 %v1457_v5  ;;  %v4878_v35 = vpop.xlane.xlu1 %1524  ;;  %v1548_v23 = vand.u32 65535, %v5832_v13  ;;  %v5840_v13 = vld [vmem:[#allocation68_spill] sm:$0xff] }
 0x298   :  { %5821 = vst [vmem:[#allocation19_spill] sm:$0xff] %v4878_v35  ;;  %v4881_v4 = vpop.xlane.xlu0 %1482  ;;  %v1522_v63 = vcvt.s32.f32 %v1520_v11 }
 0x299   :  { %5823 = vst [vmem:[#allocation20_spill] sm:$0xff] %v4881_v4  ;;  %vm1484_vm12 = vcmp.eq.f32.partialorder %v5824_v47, %v4881_v4  ;;  %v1508_v47 = vcvt.s32.f32 %v1506_v58  ;;  %v1550_v11 = vcvt.s32.f32 %v1548_v23 }
 0x29a   :  { %1472 = vmin.xlane.f32.xlu1 %v1471_v28  ;;  %v1485_v44 = vsel %vm1484_vm12, %v1480_v29, inf  ;;  %v5831_v29 = vld [vmem:[#allocation60_spill] sm:$0xff] }
 0x29b   :  { %1486 = vmin.xlane.f32.xlu0 %v1485_v44  ;;  %v4888_v5 = vpop.xlane.xlu1 %1496  ;;  %vm1526_vm15 = vcmp.eq.f32.partialorder %v5831_v29, %v4878_v35  ;;  %v1513_v28 = vsel %vm1512_vm13, %v1508_v47, inf  ;;  %v5837_v29 = vld [vmem:[#allocation63_spill] sm:$0xff]  ;;  %v5838_v47 = vld [vmem:[#allocation2_spill] sm:$0xff] }
 0x29c   :  { %5827 = vst [vmem:[#allocation21_spill] sm:$0xff] %v4888_v5  ;;  %vm1498_vm14 = vcmp.eq.f32.partialorder %v5829_v38, %v4888_v5  ;;  %v4893_v21 = vpop.xlane.xlu0 %1566  ;;  %v1536_v38 = vcvt.s32.f32 %v1534_v57  ;;  %v5836_v5 = vld [vmem:[#allocation4_spill] sm:$0xff]  ;;  %v1527_v58 = vsel %vm1526_vm15, %v1522_v63, inf }
 0x29d   :  { %5830 = vst [vmem:[#allocation22_spill] sm:$0xff] %v4893_v21  ;;  %v1499_v40 = vsel %vm1498_vm14, %v1494_v61, inf  ;;  %vm1568_vm1 = vcmp.eq.f32.partialorder %v5838_v47, %v4893_v21  ;;  %v5845_v21 = vld [vmem:[#allocation67_spill] sm:$0xff] }
 0x29e   :  { %1500 = vmin.xlane.f32.xlu1 %v1499_v40  ;;  %v1576_v40 = vand.u32 65535, %v5837_v29  ;;  %v5843_v29 = vld [vmem:[#allocation7_spill] sm:$0xff]  ;;  %v1618_v6 = vand.u32 65535, %v5845_v21 }
 0x29f   :  { %1514 = vmin.xlane.f32.xlu0 %v1513_v28  ;;  %v4898_v44 = vpop.xlane.xlu1 %1580  ;;  %v1604_v47 = vand.u32 65535, %v5843_v29  ;;  %v5851_v29 = vld [vmem:[#allocation73_spill] sm:$0xff] }
 0x2a0   :  { %5833 = vst [vmem:[#allocation23_spill] sm:$0xff] %v4898_v44  ;;  %v4901_v4 = vpop.xlane.xlu0 %1538  ;;  %v1578_v23 = vcvt.s32.f32 %v1576_v40  ;;  %v1646_v21 = vand.u32 65535, %v5851_v29 }
 0x2a1   :  { %5835 = vst [vmem:[#allocation24_spill] sm:$0xff] %v4901_v4  ;;  %vm1540_vm0 = vcmp.eq.f32.partialorder %v5836_v5, %v4901_v4  ;;  %v1564_v5 = vcvt.s32.f32 %v1562_v1  ;;  %v1606_v40 = vcvt.s32.f32 %v1604_v47 }
 0x2a2   :  { %1528 = vmin.xlane.f32.xlu1 %v1527_v58  ;;  %v1541_v61 = vsel %vm1540_vm0, %v1536_v38, inf  ;;  %v5842_v38 = vld [vmem:[#allocation66_spill] sm:$0xff] }
 0x2a3   :  { %1542 = vmin.xlane.f32.xlu0 %v1541_v61  ;;  %v4908_v28 = vpop.xlane.xlu1 %1552  ;;  %vm1582_vm3 = vcmp.eq.f32.partialorder %v5842_v38, %v4898_v44  ;;  %v1569_v58 = vsel %vm1568_vm1, %v1564_v5, inf  ;;  %v5848_v38 = vld [vmem:[#allocation5_spill] sm:$0xff]  ;;  %v5849_v5 = vld [vmem:[#allocation6_spill] sm:$0xff]  ;;  %v5852_v44 = vld [vmem:[#allocation71_spill] sm:$0xff] }
 0x2a4   :  { %5839 = vst [vmem:[#allocation25_spill] sm:$0xff] %v4908_v28  ;;  %vm1554_vm2 = vcmp.eq.f32.partialorder %v5840_v13, %v4908_v28  ;;  %v4913_v57 = vpop.xlane.xlu0 %1622  ;;  %v1592_v13 = vcvt.s32.f32 %v1590_v32  ;;  %v5847_v28 = vld [vmem:[#allocation8_spill] sm:$0xff]  ;;  %v1583_v1 = vsel %vm1582_vm3, %v1578_v23, inf }
 0x2a5   :  { %5841 = vst [vmem:[#allocation26_spill] sm:$0xff] %v4913_v57  ;;  %v1555_v63 = vsel %vm1554_vm2, %v1550_v11, inf  ;;  %vm1624_vm5 = vcmp.eq.f32.partialorder %v5849_v5, %v4913_v57  ;;  %v5857_v57 = vld [vmem:[#allocation70_spill] sm:$0xff] }
 0x2a6   :  { %1556 = vmin.xlane.f32.xlu1 %v1555_v63  ;;  %v1632_v63 = vand.u32 65535, %v5848_v38  ;;  %v5855_v38 = vld [vmem:[#allocation74_spill] sm:$0xff]  ;;  %v1674_v29 = vand.u32 65535, %v5857_v57 }
 0x2a7   :  { %1570 = vmin.xlane.f32.xlu0 %v1569_v58  ;;  %v4918_v61 = vpop.xlane.xlu1 %1636  ;;  %v1660_v5 = vand.u32 65535, %v5855_v38  ;;  %v5863_v38 = vld [vmem:[#allocation78_spill] sm:$0xff] }
 0x2a8   :  { %5844 = vst [vmem:[#allocation27_spill] sm:$0xff] %v4918_v61  ;;  %v4921_v4 = vpop.xlane.xlu0 %1594  ;;  %v1634_v47 = vcvt.s32.f32 %v1632_v63  ;;  %v1702_v57 = vand.u32 65535, %v5863_v38 }
 0x2a9   :  { %5846 = vst [vmem:[#allocation28_spill] sm:$0xff] %v4921_v4  ;;  %vm1596_vm4 = vcmp.eq.f32.partialorder %v5847_v28, %v4921_v4  ;;  %v1620_v28 = vcvt.s32.f32 %v1618_v6  ;;  %v1662_v63 = vcvt.s32.f32 %v1660_v5  ;;  %v5868_v5 = vld [vmem:[#allocation80_spill] sm:$0xff] }
 0x2aa   :  { %1584 = vmin.xlane.f32.xlu1 %v1583_v1  ;;  %v1597_v11 = vsel %vm1596_vm4, %v1592_v13, inf  ;;  %v5854_v13 = vld [vmem:[#allocation69_spill] sm:$0xff] }
 0x2ab   :  { %1598 = vmin.xlane.f32.xlu0 %v1597_v11  ;;  %v4928_v58 = vpop.xlane.xlu1 %1608  ;;  %vm1638_vm7 = vcmp.eq.f32.partialorder %v5854_v13, %v4918_v61  ;;  %v1625_v1 = vsel %vm1624_vm5, %v1620_v28, inf  ;;  %v5860_v13 = vld [vmem:[#allocation9_spill] sm:$0xff]  ;;  %v5861_v28 = vld [vmem:[#allocation72_spill] sm:$0xff] }
 0x2ac   :  { %5850 = vst [vmem:[#allocation29_spill] sm:$0xff] %v4928_v58  ;;  %vm1610_vm6 = vcmp.eq.f32.partialorder %v5852_v44, %v4928_v58  ;;  %v4933_v32 = vpop.xlane.xlu0 %1678  ;;  %v1648_v44 = vcvt.s32.f32 %v1646_v21  ;;  %v5859_v58 = vld [vmem:[#allocation76_spill] sm:$0xff]  ;;  %v1639_v6 = vsel %vm1638_vm7, %v1634_v47, inf  ;;  %v5864_v61 = vld [vmem:[#allocation77_spill] sm:$0xff]  ;;  %v1676_v21 = vcvt.s32.f32 %v1674_v29 }
 0x2ad   :  { %5853 = vst [vmem:[#allocation30_spill] sm:$0xff] %v4933_v32  ;;  %v1611_v23 = vsel %vm1610_vm6, %v1606_v40, inf  ;;  %vm1680_vm9 = vcmp.eq.f32.partialorder %v5861_v28, %v4933_v32  ;;  %v1704_v28 = vcvt.s32.f32 %v1702_v57  ;;  %v5870_v29 = vld [vmem:[#allocation81_spill] sm:$0xff] }
 0x2ae   :  { %1612 = vmin.xlane.f32.xlu1 %v1611_v23  ;;  %v1688_v23 = vand.u32 65535, %v5860_v13  ;;  %v1681_v47 = vsel %vm1680_vm9, %v1676_v21, inf }
 0x2af   :  { %1626 = vmin.xlane.f32.xlu0 %v1625_v1  ;;  %v4938_v11 = vpop.xlane.xlu1 %1692 }
 0x2b0   :  { %5856 = vst [vmem:[#allocation31_spill] sm:$0xff] %v4938_v11  ;;  %v4941_v4 = vpop.xlane.xlu0 %1650  ;;  %v1690_v13 = vcvt.s32.f32 %v1688_v23  ;;  %v5871_v23 = vld [vmem:[#allocation13_spill] sm:$0xff] }
 0x2b1   :  { %5858 = vst [vmem:[#allocation32_spill] sm:$0xff] %v4941_v4  ;;  %vm1652_vm8 = vcmp.eq.f32.partialorder %v5859_v58, %v4941_v4  ;;  %v5865_v58 = vld [vmem:[#allocation75_spill] sm:$0xff]  ;;  %v5873_v4 = vld [vmem:[#allocation14_spill] sm:$0xff] }
 0x2b2   :  { %1640 = vmin.xlane.f32.xlu1 %v1639_v6  ;;  %v1653_v40 = vsel %vm1652_vm8, %v1648_v44, inf  ;;  %vm1694_vm11 = vcmp.eq.f32.partialorder %v5865_v58, %v4938_v11  ;;  %v5866_v44 = vld [vmem:[#allocation79_spill] sm:$0xff] }
 0x2b3   :  { %1654 = vmin.xlane.f32.xlu0 %v1653_v40  ;;  %v4948_v1 = vpop.xlane.xlu1 %1664  ;;  %v1716_v6 = vand.u32 65535, %v5866_v44  ;;  %v5872_v44 = vld [vmem:[#allocation12_spill] sm:$0xff] }
 0x2b4   :  { %5862 = vst [vmem:[#allocation10_spill] sm:$0xff] %v4948_v1  ;;  %vm1666_vm10 = vcmp.eq.f32.partialorder %v5864_v61, %v4948_v1  ;;  %v1695_v61 = vsel %vm1694_vm11, %v1690_v13, inf  ;;  %v901_v57 = vcvt.f32.s32 %v5872_v44 }
 0x2b5   :  { %v1667_v35 = vsel %vm1666_vm10, %v1662_v63, inf }
 0x2b6   :  { %1668 = vmin.xlane.f32.xlu1 %v1667_v35  ;;  %v1718_v35 = vcvt.s32.f32 %v1716_v6 }
 0x2b7   :  { %1682 = vmin.xlane.f32.xlu0 %v1681_v47  ;;  %v873_v47 = vcvt.f32.s32 %v5871_v23  ;;  %v929_v23 = vcvt.f32.s32 %v4649_v45  ;;  %v971_v45 = vcvt.f32.s32 %v4646_v36 }
 0x2b8   :  { %v4956_v40 = vpop.xlane.xlu0 %1706 }
 0x2b9   :  { %5867 = vst [vmem:[#allocation33_spill] sm:$0xff] %v4956_v40  ;;  %vm1708_vm12 = vcmp.eq.f32.partialorder %v5868_v5, %v4956_v40  ;;  %v4960_v38 = vpop.xlane.xlu1 %1720  ;;  %v874_v5 = vshll.u32 %v873_v47, 16  ;;  %v887_v40 = vcvt.f32.s32 %v4636_v54  ;;  %v943_v47 = vcvt.f32.s32 %v4662_v51 }
 0x2ba   :  { %5869 = vst [vmem:[#allocation11_spill] sm:$0xff] %v4960_v38  ;;  %vm1722_vm13 = vcmp.eq.f32.partialorder %v5870_v29, %v4960_v38  ;;  %1696 = vmin.xlane.f32.xlu1 %v1695_v61  ;;  %v1709_v63 = vsel %vm1708_vm12, %v1704_v28, inf  ;;  %v915_v29 = vcvt.f32.s32 %v5873_v4  ;;  %v902_v28 = vshll.u32 %v901_v57, 16 }
 0x2bb   :  { %1710 = vmin.xlane.f32.xlu0 %v1709_v63  ;;  %v1723_v21 = vsel %vm1722_vm13, %v1718_v35, inf  ;;  %v888_v6 = vshll.u32 %v887_v40, 16 }
 0x2bc   :  { %v916_v54 = vshll.u32 %v915_v29, 16 }
 0x2be   :  { %1724 = vmin.xlane.f32.xlu1 %v1723_v21 }
 0x2cb   :  { %v899_v58 = vpop.xlane.xlu0 %898 }
 0x2cc   :  { %v900_v1 = vcvt.f32.s32 %v899_v58  ;;  %v957_v58 = vcvt.f32.s32 %v4639_v8 }
 0x2ce   :  { %v903_v44 = vadd.s32 %v902_v28, %v900_v1  ;;  %v958_v1 = vshll.u32 %v957_v58, 16 }
 0x2cf   :  { %v871_v11 = vpop.xlane.xlu0 %870  ;;  %v913_v32 = vpop.xlane.xlu1 %912 }
 0x2d0   :  { %v872_v13 = vcvt.f32.s32 %v871_v11  ;;  %v914_v35 = vcvt.f32.s32 %v913_v32  ;;  %v930_v32 = vshll.u32 %v929_v23, 16  ;;  %vm1760_vm0 = vcmp.eq.s32.totalorder %v4086_v14, %v903_v44 }
 0x2d1   :  { %v999_v44 = vcvt.f32.s32 %v4694_v43 }
 0x2d2   :  { %v875_v61 = vadd.s32 %v874_v5, %v872_v13  ;;  %v917_v57 = vadd.s32 %v916_v54, %v914_v35  ;;  %v972_v35 = vshll.u32 %v971_v45, 16  ;;  %v1041_v45 = vcvt.f32.s32 %v4707_v18 }
 0x2d3   :  { %v885_v63 = vpop.xlane.xlu1 %884 }
 0x2d4   :  { %v886_v21 = vcvt.f32.s32 %v885_v63  ;;  %v955_v38 = vpop.xlane.xlu0 %954  ;;  %vm1758_vm14 = vcmp.eq.s32.totalorder %v4086_v14, %v875_v61  ;;  %v944_v61 = vshll.u32 %v943_v47, 16  ;;  %vm1761_vm1 = vcmp.eq.s32.totalorder %v4086_v14, %v917_v57 }
 0x2d5   :  { %3377 = vmatprep.mubr.msk.f32.mxu1 %vm1758_vm14, %v3578_v3  ;;  %v956_v5 = vcvt.f32.s32 %v955_v38  ;;  %v985_v38 = vcvt.f32.s32 %v4681_v17  ;;  %v1027_v47 = vcvt.f32.s32 %v4678_v50 }
 0x2d6   :  { %v889_v11 = vadd.s32 %v888_v6, %v886_v21  ;;  %v1013_v21 = vcvt.f32.s32 %v4665_v46 }
 0x2d7   :  { %v969_v4 = vpop.xlane.xlu1 %968  ;;  %v959_v6 = vadd.s32 %v958_v1, %v956_v5  ;;  %v986_v58 = vshll.u32 %v985_v38, 16  ;;  %v1042_v38 = vshll.u32 %v1041_v45, 16 }
 0x2d8   :  { %v927_v40 = vpop.xlane.xlu0 %926  ;;  %vm1759_vm15 = vcmp.eq.s32.totalorder %v4086_v14, %v889_v11  ;;  %v970_v51 = vcvt.f32.s32 %v969_v4  ;;  %v1014_v57 = vshll.u32 %v1013_v21, 16 }
 0x2d9   :  { %v928_v13 = vcvt.f32.s32 %v927_v40  ;;  %3378 = vmatmul.mubr.msk.f32.vlgmr.msra.gmra.mrb[0].mxu1 %vm1759_vm15, %v3578_v3  ;;  %vm1764_vm4 = vcmp.eq.s32.totalorder %v4086_v14, %v959_v6 }
 0x2da   :  { %3380 = vmatprep.mubr.msk.f32.mxu1 %vm1760_vm0, %v3578_v3  ;;  %v973_v54 = vadd.s32 %v972_v35, %v970_v51  ;;  %v1055_v51 = vcvt.f32.s32 %v4714_v10  ;;  %v1083_v35 = vcvt.f32.s32 %v4704_v30 }
 0x2db   :  { %v931_v8 = vadd.s32 %v930_v32, %v928_v13  ;;  %v941_v29 = vpop.xlane.xlu1 %940  ;;  %v1000_v32 = vshll.u32 %v999_v44, 16 }
 0x2dc   :  { %v942_v28 = vcvt.f32.s32 %v941_v29  ;;  %v1011_v63 = vpop.xlane.xlu0 %1010  ;;  %vm1765_vm5 = vcmp.eq.s32.totalorder %v4086_v14, %v973_v54  ;;  %v1069_v29 = vcvt.f32.s32 %v4697_v55 }
 0x2dd   :  { %3381 = vmatmul.mubr.msk.f32.gmra.mrb[2].mxu1 %vm1761_vm1, %v3578_v3  ;;  %vm1762_vm2 = vcmp.eq.s32.totalorder %v4086_v14, %v931_v8  ;;  %v1012_v17 = vcvt.f32.s32 %v1011_v63  ;;  %v1028_v8 = vshll.u32 %v1027_v47, 16 }
 0x2de   :  { %v945_v36 = vadd.s32 %v944_v61, %v942_v28  ;;  %3383 = vmatprep.mubr.msk.f32.mxu1 %vm1762_vm2, %v3578_v3 }
 0x2df   :  { %v1025_v23 = vpop.xlane.xlu1 %1024  ;;  %v1015_v1 = vadd.s32 %v1014_v57, %v1012_v17  ;;  %v1084_v17 = vshll.u32 %v1083_v35, 16  ;;  %v1111_v57 = vcvt.f32.s32 %v4736_v33 }
 0x2e0   :  { %v983_v11 = vpop.xlane.xlu0 %982  ;;  %vm1763_vm3 = vcmp.eq.s32.totalorder %v4086_v14, %v945_v36  ;;  %v1026_v43 = vcvt.f32.s32 %v1025_v23  ;;  %v1070_v36 = vshll.u32 %v1069_v29, 16  ;;  %v1056_v23 = vshll.u32 %v1055_v51, 16 }
 0x2e1   :  { %v984_v4 = vcvt.f32.s32 %v983_v11  ;;  %3384 = vmatmul.mubr.msk.f32.gmra.mrb[4].mxu1 %vm1763_vm3, %v3578_v3  ;;  %vm1768_vm8 = vcmp.eq.s32.totalorder %v4086_v14, %v1015_v1  ;;  %v1097_v11 = vcvt.f32.s32 %v4727_v41  ;;  %v1112_v1 = vshll.u32 %v1111_v57, 16 }
 0x2e2   :  { %3386 = vmatprep.mubr.msk.f32.mxu1 %vm1764_vm4, %v3578_v3  ;;  %v1029_v28 = vadd.s32 %v1028_v8, %v1026_v43  ;;  %v1153_v29 = vcvt.f32.s32 %v4753_v12 }
 0x2e3   :  { %v987_v46 = vadd.s32 %v986_v58, %v984_v4  ;;  %v997_v40 = vpop.xlane.xlu1 %996  ;;  %v1125_v4 = vcvt.f32.s32 %v4717_v62 }
 0x2e4   :  { %v998_v5 = vcvt.f32.s32 %v997_v40  ;;  %v1067_v13 = vpop.xlane.xlu0 %1066  ;;  %vm1769_vm9 = vcmp.eq.s32.totalorder %v4086_v14, %v1029_v28  ;;  %v1730_v28 = vand.u32 65535, %v4746_v53  ;;  %v1154_v12 = vshll.u32 %v1153_v29, 16 }
 0x2e5   :  { %3387 = vmatmul.mubr.msk.f32.gmra.mrb[6].mxu1 %vm1765_vm5, %v3578_v3  ;;  %vm1766_vm6 = vcmp.eq.s32.totalorder %v4086_v14, %v987_v46  ;;  %v1068_v18 = vcvt.f32.s32 %v1067_v13  ;;  %v1126_v13 = vshll.u32 %v1125_v4, 16 }
 0x2e6   :  { %v1001_v50 = vadd.s32 %v1000_v32, %v998_v5  ;;  %3389 = vmatprep.mubr.msk.f32.mxu1 %vm1766_vm6, %v3578_v3  ;;  %v1098_v32 = vshll.u32 %v1097_v11, 16  ;;  %v1139_v5 = vcvt.f32.s32 %v4724_v37 }
 0x2e7   :  { %v1081_v61 = vpop.xlane.xlu1 %1080  ;;  %v1071_v58 = vadd.s32 %v1070_v36, %v1068_v18  ;;  %v1167_v18 = vcvt.f32.s32 %v4763_v15 }
 0x2e8   :  { %v1039_v63 = vpop.xlane.xlu0 %1038  ;;  %vm1767_vm7 = vcmp.eq.s32.totalorder %v4086_v14, %v1001_v50  ;;  %v1082_v10 = vcvt.f32.s32 %v1081_v61  ;;  %v1140_v51 = vshll.u32 %v1139_v5, 16 }
 0x2e9   :  { %v1040_v6 = vcvt.f32.s32 %v1039_v63  ;;  %3390 = vmatmul.mubr.msk.f32.gmra.mrb[8].mxu1 %vm1767_vm7, %v3578_v3  ;;  %vm1772_vm12 = vcmp.eq.s32.totalorder %v4086_v14, %v1071_v58  ;;  %v1181_v63 = vcvt.f32.s32 %v4739_v9  ;;  %v1744_v9 = vand.u32 65535, %v4759_v16 }
 0x2ea   :  { %3392 = vmatprep.mubr.msk.f32.mxu1 %vm1768_vm8, %v3578_v3  ;;  %v1085_v46 = vadd.s32 %v1084_v17, %v1082_v10  ;;  %v1732_v10 = vcvt.s32.f32 %v1730_v28  ;;  %v1209_v17 = vcvt.f32.s32 %v4778_v2  ;;  %v1223_v2 = vcvt.f32.s32 %v4786_v22 }
 0x2eb   :  { %v1043_v55 = vadd.s32 %v1042_v38, %v1040_v6  ;;  %v1053_v21 = vpop.xlane.xlu1 %1052  ;;  %v1182_v53 = vshll.u32 %v1181_v63, 16  ;;  %v1251_v22 = vcvt.f32.s32 %v4775_v60  ;;  %v1279_v60 = vcvt.f32.s32 %v4806_v56 }
 0x2ec   :  { %v1054_v44 = vcvt.f32.s32 %v1053_v21  ;;  %v1123_v54 = vpop.xlane.xlu0 %1122  ;;  %vm1773_vm13 = vcmp.eq.s32.totalorder %v4086_v14, %v1085_v46  ;;  %v1195_v21 = vcvt.f32.s32 %v4751_v49  ;;  %v1746_v46 = vcvt.s32.f32 %v1744_v9 }
 0x2ed   :  { %3393 = vmatmul.mubr.msk.f32.gmra.mrb[10].mxu1 %vm1769_vm9, %v3578_v3  ;;  %vm1770_vm10 = vcmp.eq.s32.totalorder %v4086_v14, %v1043_v55  ;;  %v1124_v41 = vcvt.f32.s32 %v1123_v54  ;;  %v1293_v28 = vcvt.f32.s32 %v4791_v19  ;;  %v1280_v56 = vshll.u32 %v1279_v60, 16 }
 0x2ee   :  { %v1057_v30 = vadd.s32 %v1056_v23, %v1054_v44  ;;  %3395 = vmatprep.mubr.msk.f32.mxu1 %vm1770_vm10, %v3578_v3  ;;  %v1168_v44 = vshll.u32 %v1167_v18, 16  ;;  %v1196_v49 = vshll.u32 %v1195_v21, 16  ;;  %v1321_v19 = vcvt.f32.s32 %v4821_v26 }
 0x2ef   :  { %v1137_v47 = vpop.xlane.xlu1 %1136  ;;  %v1127_v61 = vadd.s32 %v1126_v13, %v1124_v41  ;;  %v1224_v13 = vshll.u32 %v1223_v2, 16 }
 0x2f0   :  { %v1095_v40 = vpop.xlane.xlu0 %1094  ;;  %vm1771_vm11 = vcmp.eq.s32.totalorder %v4086_v14, %v1057_v30  ;;  %v1138_v33 = vcvt.f32.s32 %v1137_v47  ;;  %v1237_v47 = vcvt.f32.s32 %v4767_v39  ;;  %v1322_v26 = vshll.u32 %v1321_v19, 16 }
 0x2f1   :  { %v1096_v43 = vcvt.f32.s32 %v1095_v40  ;;  %3396 = vmatmul.mubr.msk.f32.gmra.mrb[12].mxu1 %vm1771_vm11, %v3578_v3  ;;  %vm1776_vm0 = vcmp.eq.s32.totalorder %v4086_v14, %v1127_v61  ;;  %v1252_v61 = vshll.u32 %v1251_v22, 16 }
 0x2f2   :  { %3398 = vmatprep.mubr.msk.f32.mxu1 %vm1772_vm12, %v3578_v3  ;;  %v1141_v6 = vadd.s32 %v1140_v51, %v1138_v33 }
 0x2f3   :  { %v1099_v62 = vadd.s32 %v1098_v32, %v1096_v43  ;;  %v1109_v45 = vpop.xlane.xlu1 %1108  ;;  %v1210_v32 = vshll.u32 %v1209_v17, 16 }
 0x2f4   :  { %v1110_v8 = vcvt.f32.s32 %v1109_v45  ;;  %v1179_v50 = vpop.xlane.xlu0 %1178  ;;  %vm1777_vm1 = vcmp.eq.s32.totalorder %v4086_v14, %v1141_v6  ;;  %v1238_v45 = vshll.u32 %v1237_v47, 16 }
 0x2f5   :  { %3399 = vmatmul.mubr.msk.f32.gmra.mrb[14].mxu1 %vm1773_vm13, %v3578_v3  ;;  %vm1774_vm14 = vcmp.eq.s32.totalorder %v4086_v14, %v1099_v62  ;;  %v1180_v36 = vcvt.f32.s32 %v1179_v50 }
 0x2f6   :  { %v1113_v37 = vadd.s32 %v1112_v1, %v1110_v8  ;;  %3401 = vmatprep.mubr.msk.f32.mxu1 %vm1774_vm14, %v3578_v3  ;;  %v1265_v1 = vcvt.f32.s32 %v4801_v0 }
 0x2f7   :  { %v1193_v38 = vpop.xlane.xlu1 %1192  ;;  %v1183_v30 = vadd.s32 %v1182_v53, %v1180_v36 }
 0x2f8   :  { %v1151_v35 = vpop.xlane.xlu0 %1150  ;;  %vm1775_vm15 = vcmp.eq.s32.totalorder %v4086_v14, %v1113_v37  ;;  %v1194_v54 = vcvt.f32.s32 %v1193_v38  ;;  %v1266_v0 = vshll.u32 %v1265_v1, 16 }
 0x2f9   :  { %v1152_v55 = vcvt.f32.s32 %v1151_v35  ;;  %3402 = vmatmul.mubr.msk.f32.gmra.mrb[16].mxu1 %vm1775_vm15, %v3578_v3  ;;  %vm1780_vm6 = vcmp.eq.s32.totalorder %v4086_v14, %v1183_v30  ;;  %v1307_v35 = vcvt.f32.s32 %v4798_v27  ;;  %v1335_v27 = vcvt.f32.s32 %v4828_v31 }
 0x2fa   :  { %3404 = vmatprep.mubr.msk.f32.mxu1 %vm1776_vm0, %v3578_v3  ;;  %v1197_v40 = vadd.s32 %v1196_v49, %v1194_v54  ;;  %v1349_v54 = vcvt.f32.s32 %v4813_v48  ;;  %v1377_v48 = vcvt.f32.s32 %v4841_v59 }
 0x2fb   :  { %v1155_v23 = vadd.s32 %v1154_v12, %v1152_v55  ;;  %v1165_v15 = vpop.xlane.xlu1 %1164  ;;  %v1294_v55 = vshll.u32 %v1293_v28, 16  ;;  %v1336_v31 = vshll.u32 %v1335_v27, 16 }
 0x2fc   :  { %v1166_v11 = vcvt.f32.s32 %v1165_v15  ;;  %v5028_v58 = vpop.xlane.xlu0 %1734  ;;  %vm1781_vm7 = vcmp.eq.s32.totalorder %v4086_v14, %v1197_v40  ;;  %v1308_v15 = vshll.u32 %v1307_v35, 16  ;;  %v1378_v59 = vshll.u32 %v1377_v48, 16 }
 0x2fd   :  { %vm1736_vm2 = vcmp.eq.f32.partialorder %v4771_v7, %v5028_v58  ;;  %3405 = vmatmul.mubr.msk.f32.gmra.mrb[18].mxu1 %vm1777_vm1, %v3578_v3  ;;  %vm1778_vm3 = vcmp.eq.s32.totalorder %v4086_v14, %v1155_v23 }
 0x2fe   :  { %v1169_v16 = vadd.s32 %v1168_v44, %v1166_v11  ;;  %3407 = vmatprep.mubr.msk.f32.mxu1 %vm1778_vm3, %v3578_v3  ;;  %v1737_v4 = vsel %vm1736_vm2, %v1732_v10, inf }
 0x2ff   :  { %1738 = vmin.xlane.f32.xlu0 %v1737_v4  ;;  %v5038_v57 = vpop.xlane.xlu1 %1748 }
 0x300   :  { %vm1750_vm4 = vcmp.eq.f32.partialorder %v4780_v42, %v5038_v57  ;;  %v1207_v7 = vpop.xlane.xlu0 %1206  ;;  %vm1779_vm5 = vcmp.eq.s32.totalorder %v4086_v14, %v1169_v16  ;;  %v1363_v16 = vcvt.f32.s32 %v4818_v25  ;;  %v1391_v25 = vcvt.f32.s32 %v4848_v24 }
 0x301   :  { %v1208_v41 = vcvt.f32.s32 %v1207_v7  ;;  %3408 = vmatmul.mubr.msk.f32.gmra.mrb[20].mxu1 %vm1779_vm5, %v3578_v3  ;;  %v1751_v39 = vsel %vm1750_vm4, %v1746_v46, inf  ;;  %v1350_v46 = vshll.u32 %v1349_v54, 16 }
 0x302   :  { %3410 = vmatprep.mubr.msk.f32.mxu1 %vm1780_vm6, %v3578_v3  ;;  %1752 = vmin.xlane.f32.xlu1 %v1751_v39  ;;  %v1392_v24 = vshll.u32 %v1391_v25, 16 }
 0x303   :  { %v1211_v43 = vadd.s32 %v1210_v32, %v1208_v41  ;;  %v1221_v5 = vpop.xlane.xlu1 %1220  ;;  %v1364_v41 = vshll.u32 %v1363_v16, 16 }
 0x304   :  { %v1222_v62 = vcvt.f32.s32 %v1221_v5  ;;  %v1235_v42 = vpop.xlane.xlu0 %1234  ;;  %v1405_v5 = vcvt.f32.s32 %v4833_v34  ;;  %v1433_v34 = vcvt.f32.s32 %v4861_v52 }
 0x305   :  { %v1236_v33 = vcvt.f32.s32 %v1235_v42  ;;  %3411 = vmatmul.mubr.msk.f32.gmra.mrb[22].mxu1 %vm1781_vm7, %v3578_v3  ;;  %vm1782_vm8 = vcmp.eq.s32.totalorder %v4086_v14, %v1211_v43 }
 0x306   :  { %v1225_v8 = vadd.s32 %v1224_v13, %v1222_v62  ;;  %3413 = vmatprep.mubr.msk.f32.mxu1 %vm1782_vm8, %v3578_v3  ;;  %v1434_v52 = vshll.u32 %v1433_v34, 16 }
 0x307   :  { %v1239_v50 = vadd.s32 %v1238_v45, %v1236_v33  ;;  %v1249_v29 = vpop.xlane.xlu1 %1248  ;;  %v1419_v45 = vcvt.f32.s32 %v4838_v20  ;;  %v5874_v20 = vld [vmem:[#allocation17_spill] sm:$0xff] }
 0x308   :  { %v1250_v51 = vcvt.f32.s32 %v1249_v29  ;;  %v1263_v37 = vpop.xlane.xlu0 %1262  ;;  %vm1783_vm9 = vcmp.eq.s32.totalorder %v4086_v14, %v1225_v8  ;;  %v1406_v8 = vshll.u32 %v1405_v5, 16 }
 0x309   :  { %v1264_v63 = vcvt.f32.s32 %v1263_v37  ;;  %3414 = vmatmul.mubr.msk.f32.gmra.mrb[24].mxu1 %vm1783_vm9, %v3578_v3  ;;  %vm1784_vm10 = vcmp.eq.s32.totalorder %v4086_v14, %v1239_v50  ;;  %v1447_v37 = vcvt.f32.s32 %v5874_v20 }
 0x30a   :  { %v1253_v38 = vadd.s32 %v1252_v61, %v1250_v51  ;;  %3416 = vmatprep.mubr.msk.f32.mxu1 %vm1784_vm10, %v3578_v3  ;;  %v1420_v51 = vshll.u32 %v1419_v45, 16 }
 0x30b   :  { %v1267_v18 = vadd.s32 %v1266_v0, %v1264_v63  ;;  %v1277_v6 = vpop.xlane.xlu1 %1276  ;;  %v5875_v63 = vld [vmem:[#allocation15_spill] sm:$0xff] }
 0x30c   :  { %v1278_v12 = vcvt.f32.s32 %v1277_v6  ;;  %v1291_v36 = vpop.xlane.xlu0 %1290  ;;  %vm1785_vm11 = vcmp.eq.s32.totalorder %v4086_v14, %v1253_v38  ;;  %v1461_v38 = vcvt.f32.s32 %v5875_v63 }
 0x30d   :  { %v1292_v21 = vcvt.f32.s32 %v1291_v36  ;;  %3417 = vmatmul.mubr.msk.f32.gmra.mrb[26].mxu1 %vm1785_vm11, %v3578_v3  ;;  %vm1786_vm12 = vcmp.eq.s32.totalorder %v4086_v14, %v1267_v18 }
 0x30e   :  { %v1281_v9 = vadd.s32 %v1280_v56, %v1278_v12  ;;  %3419 = vmatprep.mubr.msk.f32.mxu1 %vm1786_vm12, %v3578_v3  ;;  %v5876_v12 = vld [vmem:[#allocation16_spill] sm:$0xff] }
 0x30f   :  { %v1295_v53 = vadd.s32 %v1294_v55, %v1292_v21  ;;  %v1305_v23 = vpop.xlane.xlu1 %1304  ;;  %v1475_v36 = vcvt.f32.s32 %v5876_v12  ;;  %v1448_v55 = vshll.u32 %v1447_v37, 16 }
 0x310   :  { %v1306_v10 = vcvt.f32.s32 %v1305_v23  ;;  %v1319_v44 = vpop.xlane.xlu0 %1318  ;;  %vm1787_vm13 = vcmp.eq.s32.totalorder %v4086_v14, %v1281_v9  ;;  %v1462_v9 = vshll.u32 %v1461_v38, 16  ;;  %v5885_v38 = vld [vmem:[#allocation28_spill] sm:$0xff] }
 0x311   :  { %v1320_v11 = vcvt.f32.s32 %v1319_v44  ;;  %3420 = vmatmul.mubr.msk.f32.gmra.mrb[28].mxu1 %vm1787_vm13, %v3578_v3  ;;  %vm1788_vm14 = vcmp.eq.s32.totalorder %v4086_v14, %v1295_v53  ;;  %v5877_v53 = vld [vmem:[#allocation20_spill] sm:$0xff]  ;;  %v1476_v54 = vshll.u32 %v1475_v36, 16  ;;  %v5886_v36 = vld [vmem:[#allocation29_spill] sm:$0xff] }
 0x312   :  { %v1309_v17 = vadd.s32 %v1308_v15, %v1306_v10  ;;  %3422 = vmatprep.mubr.msk.f32.mxu1 %vm1788_vm14, %v3578_v3  ;;  %v1489_v23 = vcvt.f32.s32 %v5877_v53 }
 0x313   :  { %v1323_v30 = vadd.s32 %v1322_v26, %v1320_v11  ;;  %v1333_v49 = vpop.xlane.xlu1 %1332  ;;  %v5878_v26 = vld [vmem:[#allocation21_spill] sm:$0xff] }
 0x314   :  { %v1334_v4 = vcvt.f32.s32 %v1333_v49  ;;  %v1347_v47 = vpop.xlane.xlu0 %1346  ;;  %vm1789_vm15 = vcmp.eq.s32.totalorder %v4086_v14, %v1309_v17  ;;  %v1503_v11 = vcvt.f32.s32 %v5878_v26  ;;  %v5879_v49 = vld [vmem:[#allocation18_spill] sm:$0xff] }
 0x315   :  { %v1348_v2 = vcvt.f32.s32 %v1347_v47  ;;  %3423 = vmatmul.mubr.msk.f32.gmra.mrb[30].mxu1 %vm1789_vm15, %v3578_v3  ;;  %vm1790_vm0 = vcmp.eq.s32.totalorder %v4086_v14, %v1323_v30  ;;  %v1517_v16 = vcvt.f32.s32 %v5879_v49 }
 0x316   :  { %v1337_v40 = vadd.s32 %v1336_v31, %v1334_v4  ;;  %3425 = vmatprep.mubr.msk.f32.mxu1 %vm1790_vm0, %v3578_v3  ;;  %v1490_v31 = vshll.u32 %v1489_v23, 16 }
 0x317   :  { %v1351_v7 = vadd.s32 %v1350_v46, %v1348_v2  ;;  %v1361_v32 = vpop.xlane.xlu1 %1360  ;;  %v5880_v2 = vld [vmem:[#allocation19_spill] sm:$0xff]  ;;  %v1518_v25 = vshll.u32 %v1517_v16, 16  ;;  %v5889_v16 = vld [vmem:[#allocation32_spill] sm:$0xff] }
 0x318   :  { %v1362_v39 = vcvt.f32.s32 %v1361_v32  ;;  %v1375_v43 = vpop.xlane.xlu0 %1374  ;;  %vm1791_vm1 = vcmp.eq.s32.totalorder %v4086_v14, %v1337_v40  ;;  %v1531_v40 = vcvt.f32.s32 %v5880_v2 }
 0x319   :  { %v1376_v22 = vcvt.f32.s32 %v1375_v43  ;;  %3426 = vmatmul.mubr.msk.f32.gmra.mrb[32].mxu1 %vm1791_vm1, %v3578_v3  ;;  %vm1792_vm2 = vcmp.eq.s32.totalorder %v4086_v14, %v1351_v7  ;;  %v1504_v7 = vshll.u32 %v1503_v11, 16 }
 0x31a   :  { %v1365_v13 = vadd.s32 %v1364_v41, %v1362_v39  ;;  %3428 = vmatprep.mubr.msk.f32.mxu1 %vm1792_vm2, %v3578_v3  ;;  %v5881_v39 = vld [vmem:[#allocation24_spill] sm:$0xff] }
 0x31b   :  { %v1379_v62 = vadd.s32 %v1378_v59, %v1376_v22  ;;  %v1389_v42 = vpop.xlane.xlu1 %1388  ;;  %v1545_v43 = vcvt.f32.s32 %v5881_v39 }
 0x31c   :  { %v1390_v1 = vcvt.f32.s32 %v1389_v42  ;;  %v1403_v33 = vpop.xlane.xlu0 %1402  ;;  %vm1793_vm3 = vcmp.eq.s32.totalorder %v4086_v14, %v1365_v13  ;;  %v5882_v42 = vld [vmem:[#allocation25_spill] sm:$0xff] }
 0x31d   :  { %v1404_v50 = vcvt.f32.s32 %v1403_v33  ;;  %3429 = vmatmul.mubr.msk.f32.gmra.mrb[34].mxu1 %vm1793_vm3, %v3578_v3  ;;  %vm1794_vm4 = vcmp.eq.s32.totalorder %v4086_v14, %v1379_v62  ;;  %v1532_v62 = vshll.u32 %v1531_v40, 16  ;;  %v1559_v45 = vcvt.f32.s32 %v5882_v42  ;;  %v5883_v33 = vld [vmem:[#allocation22_spill] sm:$0xff] }
 0x31e   :  { %v1393_v29 = vadd.s32 %v1392_v24, %v1390_v1  ;;  %3431 = vmatprep.mubr.msk.f32.mxu1 %vm1794_vm4, %v3578_v3  ;;  %v1546_v34 = vshll.u32 %v1545_v43, 16  ;;  %v5890_v40 = vld [vmem:[#allocation10_spill] sm:$0xff] }
 0x31f   :  { %v1407_v61 = vadd.s32 %v1406_v8, %v1404_v50  ;;  %v1417_v60 = vpop.xlane.xlu1 %1416  ;;  %v1573_v8 = vcvt.f32.s32 %v5883_v33  ;;  %v1560_v37 = vshll.u32 %v1559_v45, 16 }
 0x320   :  { %v1418_v28 = vcvt.f32.s32 %v1417_v60  ;;  %v1431_v0 = vpop.xlane.xlu0 %1430  ;;  %vm1795_vm5 = vcmp.eq.s32.totalorder %v4086_v14, %v1393_v29 }
 0x321   :  { %v1432_v18 = vcvt.f32.s32 %v1431_v0  ;;  %3432 = vmatmul.mubr.msk.f32.gmra.mrb[36].mxu1 %vm1795_vm5, %v3578_v3  ;;  %vm1796_vm6 = vcmp.eq.s32.totalorder %v4086_v14, %v1407_v61  ;;  %v1574_v63 = vshll.u32 %v1573_v8, 16  ;;  %v5893_v8 = vld [vmem:[#allocation33_spill] sm:$0xff] }
 0x322   :  { %v1421_v6 = vadd.s32 %v1420_v51, %v1418_v28  ;;  %3434 = vmatprep.mubr.msk.f32.mxu1 %vm1796_vm6, %v3578_v3  ;;  %v5884_v51 = vld [vmem:[#allocation23_spill] sm:$0xff] }
 0x323   :  { %v1435_v35 = vadd.s32 %v1434_v52, %v1432_v18  ;;  %v1445_v56 = vpop.xlane.xlu1 %1444  ;;  %v1587_v20 = vcvt.f32.s32 %v5884_v51  ;;  %v1601_v52 = vcvt.f32.s32 %v5885_v38 }
 0x324   :  { %v1446_v19 = vcvt.f32.s32 %v1445_v56  ;;  %v1459_v21 = vpop.xlane.xlu0 %1458  ;;  %vm1797_vm7 = vcmp.eq.s32.totalorder %v4086_v14, %v1421_v6 }
 0x325   :  { %v1460_v15 = vcvt.f32.s32 %v1459_v21  ;;  %3435 = vmatmul.mubr.msk.f32.gmra.mrb[38].mxu1 %vm1797_vm7, %v3578_v3  ;;  %vm1798_vm8 = vcmp.eq.s32.totalorder %v4086_v14, %v1435_v35  ;;  %v1588_v12 = vshll.u32 %v1587_v20, 16  ;;  %v1602_v23 = vshll.u32 %v1601_v52, 16  ;;  %v5894_v20 = vld [vmem:[#allocation11_spill] sm:$0xff] }
 0x326   :  { %v1449_v27 = vadd.s32 %v1448_v55, %v1446_v19  ;;  %3437 = vmatprep.mubr.msk.f32.mxu1 %vm1798_vm8, %v3578_v3  ;;  %v1615_v55 = vcvt.f32.s32 %v5886_v36  ;;  %v1741_v36 = vcvt.f32.s32 %v5028_v58  ;;  %v3514_v58 = vld [vmem:[%s5554_s0 + $0x8] sm:$0xff] }
 0x327   :  { %v1463_v10 = vadd.s32 %v1462_v9, %v1460_v15  ;;  %v1473_v44 = vpop.xlane.xlu1 %1472  ;;  %v5887_v9 = vld [vmem:[#allocation26_spill] sm:$0xff] }
 0x328   :  { %v1474_v17 = vcvt.f32.s32 %v1473_v44  ;;  %v1487_v30 = vpop.xlane.xlu0 %1486  ;;  %vm1799_vm9 = vcmp.eq.s32.totalorder %v4086_v14, %v1449_v27  ;;  %v1629_v53 = vcvt.f32.s32 %v5887_v9  ;;  %v1616_v11 = vshll.u32 %v1615_v55, 16 }
 0x329   :  { %v1488_v4 = vcvt.f32.s32 %v1487_v30  ;;  %3438 = vmatmul.mubr.msk.f32.gmra.mrb[40].mxu1 %vm1799_vm9, %v3578_v3  ;;  %vm1800_vm10 = vcmp.eq.s32.totalorder %v4086_v14, %v1463_v10  ;;  %v1755_v55 = vcvt.f32.s32 %v5038_v57 }
 0x32a   :  { %v1477_v47 = vadd.s32 %v1476_v54, %v1474_v17  ;;  %3440 = vmatprep.mubr.msk.f32.mxu1 %vm1800_vm10, %v3578_v3  ;;  %v5888_v54 = vld [vmem:[#allocation27_spill] sm:$0xff]  ;;  %v1630_v49 = vshll.u32 %v1629_v53, 16 }
 0x32b   :  { %v1491_v46 = vadd.s32 %v1490_v31, %v1488_v4  ;;  %v1501_v48 = vpop.xlane.xlu1 %1500  ;;  %v1643_v26 = vcvt.f32.s32 %v5888_v54  ;;  %v1657_v31 = vcvt.f32.s32 %v5889_v16  ;;  %v3516_v16 = vld [vmem:[%s5554_s0 + $0x18] sm:$0xff] }
 0x32c   :  { %v1502_v32 = vcvt.f32.s32 %v1501_v48  ;;  %v1515_v41 = vpop.xlane.xlu0 %1514  ;;  %vm1801_vm11 = vcmp.eq.s32.totalorder %v4086_v14, %v1477_v47 }
 0x32d   :  { %v1516_v5 = vcvt.f32.s32 %v1515_v41  ;;  %3441 = vmatmul.mubr.msk.f32.gmra.mrb[42].mxu1 %vm1801_vm11, %v3578_v3  ;;  %vm1802_vm12 = vcmp.eq.s32.totalorder %v4086_v14, %v1491_v46  ;;  %v1644_v2 = vshll.u32 %v1643_v26, 16  ;;  %v1658_v43 = vshll.u32 %v1657_v31, 16 }
 0x32e   :  { %v1505_v59 = vadd.s32 %v1504_v7, %v1502_v32  ;;  %3443 = vmatprep.mubr.msk.f32.mxu1 %vm1802_vm12, %v3578_v3  ;;  %v1671_v7 = vcvt.f32.s32 %v5890_v40 }
 0x32f   :  { %v1519_v22 = vadd.s32 %v1518_v25, %v1516_v5  ;;  %v1529_v13 = vpop.xlane.xlu1 %1528  ;;  %v5891_v25 = vld [vmem:[#allocation30_spill] sm:$0xff] }
 0x330   :  { %v1530_v24 = vcvt.f32.s32 %v1529_v13  ;;  %v1543_v1 = vpop.xlane.xlu0 %1542  ;;  %vm1803_vm13 = vcmp.eq.s32.totalorder %v4086_v14, %v1505_v59  ;;  %v1685_v39 = vcvt.f32.s32 %v5891_v25  ;;  %v1672_v45 = vshll.u32 %v1671_v7, 16  ;;  %v3519_v25 = vld [vmem:[%s5554_s0 + $0x20] sm:$0xff] }
 0x331   :  { %v1544_v50 = vcvt.f32.s32 %v1543_v1  ;;  %3444 = vmatmul.mubr.msk.f32.gmra.mrb[44].mxu1 %vm1803_vm13, %v3578_v3  ;;  %vm1804_vm14 = vcmp.eq.s32.totalorder %v4086_v14, %v1519_v22 }
 0x332   :  { %v1533_v29 = vadd.s32 %v1532_v62, %v1530_v24  ;;  %3446 = vmatprep.mubr.msk.f32.mxu1 %vm1804_vm14, %v3578_v3  ;;  %v5892_v62 = vld [vmem:[#allocation31_spill] sm:$0xff]  ;;  %v1686_v33 = vshll.u32 %v1685_v39, 16 }
 0x333   :  { %v1547_v61 = vadd.s32 %v1546_v34, %v1544_v50  ;;  %v1557_v60 = vpop.xlane.xlu1 %1556  ;;  %v1699_v42 = vcvt.f32.s32 %v5892_v62  ;;  %v1713_v34 = vcvt.f32.s32 %v5893_v8 }
 0x334   :  { %v1558_v28 = vcvt.f32.s32 %v1557_v60  ;;  %v1571_v0 = vpop.xlane.xlu0 %1570  ;;  %vm1805_vm15 = vcmp.eq.s32.totalorder %v4086_v14, %v1533_v29 }
 0x335   :  { %v1572_v18 = vcvt.f32.s32 %v1571_v0  ;;  %3447 = vmatmul.mubr.msk.f32.gmra.mrb[46].mxu1 %vm1805_vm15, %v3578_v3  ;;  %vm1806_vm0 = vcmp.eq.s32.totalorder %v4086_v14, %v1547_v61  ;;  %v1700_v51 = vshll.u32 %v1699_v42, 16  ;;  %v3520_v42 = vld [vmem:[%s5554_s0 + $0x38] sm:$0xff] }
 0x336   :  { %v1561_v6 = vadd.s32 %v1560_v37, %v1558_v28  ;;  %3449 = vmatprep.mubr.msk.f32.mxu1 %vm1806_vm0, %v3578_v3  ;;  %v1727_v37 = vcvt.f32.s32 %v5894_v20  ;;  %v3523_v20 = vld [vmem:[%s5554_s0 + $0x40] sm:$0xff] }
 0x337   :  { %v1575_v35 = vadd.s32 %v1574_v63, %v1572_v18  ;;  %v1585_v56 = vpop.xlane.xlu1 %1584  ;;  %v1714_v63 = vshll.u32 %v1713_v34, 16 }
 0x338   :  { %v1586_v19 = vcvt.f32.s32 %v1585_v56  ;;  %v1599_v21 = vpop.xlane.xlu0 %1598  ;;  %vm1807_vm1 = vcmp.eq.s32.totalorder %v4086_v14, %v1561_v6 }
 0x339   :  { %v1600_v15 = vcvt.f32.s32 %v1599_v21  ;;  %3450 = vmatmul.mubr.msk.f32.gmra.mrb[48].mxu1 %vm1807_vm1, %v3578_v3  ;;  %vm1808_vm2 = vcmp.eq.s32.totalorder %v4086_v14, %v1575_v35  ;;  %v1728_v35 = vshll.u32 %v1727_v37, 16  ;;  %v1742_v21 = vshll.u32 %v1741_v36, 16 }
 0x33a   :  { %v1589_v27 = vadd.s32 %v1588_v12, %v1586_v19  ;;  %3452 = vmatprep.mubr.msk.f32.mxu1 %vm1808_vm2, %v3578_v3 }
 0x33b   :  { %v1603_v10 = vadd.s32 %v1602_v23, %v1600_v15  ;;  %v1613_v44 = vpop.xlane.xlu1 %1612  ;;  %v1756_v15 = vshll.u32 %v1755_v55, 16 }
 0x33c   :  { %v1614_v17 = vcvt.f32.s32 %v1613_v44  ;;  %v1627_v30 = vpop.xlane.xlu0 %1626  ;;  %vm1809_vm3 = vcmp.eq.s32.totalorder %v4086_v14, %v1589_v27 }
 0x33d   :  { %v1628_v4 = vcvt.f32.s32 %v1627_v30  ;;  %3453 = vmatmul.mubr.msk.f32.gmra.mrb[50].mxu1 %vm1809_vm3, %v3578_v3  ;;  %vm1810_vm4 = vcmp.eq.s32.totalorder %v4086_v14, %v1603_v10 }
 0x33e   :  { %v1617_v47 = vadd.s32 %v1616_v11, %v1614_v17  ;;  %3455 = vmatprep.mubr.msk.f32.mxu1 %vm1810_vm4, %v3578_v3 }
 0x33f   :  { %v1631_v46 = vadd.s32 %v1630_v49, %v1628_v4  ;;  %v1641_v48 = vpop.xlane.xlu1 %1640  ;;  %v3517_v4 = vld [vmem:[%s5554_s0 + $0x10] sm:$0xff] }
 0x340   :  { %v1642_v32 = vcvt.f32.s32 %v1641_v48  ;;  %v1655_v41 = vpop.xlane.xlu0 %1654  ;;  %vm1811_vm5 = vcmp.eq.s32.totalorder %v4086_v14, %v1617_v47 }
 0x341   :  { %v1656_v5 = vcvt.f32.s32 %v1655_v41  ;;  %3456 = vmatmul.mubr.msk.f32.gmra.mrb[52].mxu1 %vm1811_vm5, %v3578_v3  ;;  %vm1812_vm6 = vcmp.eq.s32.totalorder %v4086_v14, %v1631_v46 }
 0x342   :  { %v1645_v59 = vadd.s32 %v1644_v2, %v1642_v32  ;;  %3458 = vmatprep.mubr.msk.f32.mxu1 %vm1812_vm6, %v3578_v3  ;;  %v3518_v32 = vld [vmem:[%s5554_s0 + $0x28] sm:$0xff] }
 0x343   :  { %v1659_v22 = vadd.s32 %v1658_v43, %v1656_v5  ;;  %v1669_v13 = vpop.xlane.xlu1 %1668 }
 0x344   :  { %v1670_v24 = vcvt.f32.s32 %v1669_v13  ;;  %v1683_v1 = vpop.xlane.xlu0 %1682  ;;  %vm1813_vm7 = vcmp.eq.s32.totalorder %v4086_v14, %v1645_v59 }
 0x345   :  { %v1684_v50 = vcvt.f32.s32 %v1683_v1  ;;  %3459 = vmatmul.mubr.msk.f32.gmra.mrb[54].mxu1 %vm1813_vm7, %v3578_v3  ;;  %vm1814_vm8 = vcmp.eq.s32.totalorder %v4086_v14, %v1659_v22 }
 0x346   :  { %v1673_v29 = vadd.s32 %v1672_v45, %v1670_v24  ;;  %3461 = vmatprep.mubr.msk.f32.mxu1 %vm1814_vm8, %v3578_v3  ;;  %v3521_v24 = vld [vmem:[%s5554_s0 + $0x30] sm:$0xff] }
 0x347   :  { %v1687_v61 = vadd.s32 %v1686_v33, %v1684_v50  ;;  %v1697_v60 = vpop.xlane.xlu1 %1696 }
 0x348   :  { %v1698_v28 = vcvt.f32.s32 %v1697_v60  ;;  %v1711_v0 = vpop.xlane.xlu0 %1710  ;;  %vm1815_vm9 = vcmp.eq.s32.totalorder %v4086_v14, %v1673_v29  ;;  %v3522_v60 = vld [vmem:[%s5554_s0 + $0x48] sm:$0xff] }
 0x349   :  { %v1712_v38 = vcvt.f32.s32 %v1711_v0  ;;  %3462 = vmatmul.mubr.msk.f32.gmra.mrb[56].mxu1 %vm1815_vm9, %v3578_v3  ;;  %vm1816_vm10 = vcmp.eq.s32.totalorder %v4086_v14, %v1687_v61 }
 0x34a   :  { %v1701_v52 = vadd.s32 %v1700_v51, %v1698_v28  ;;  %3464 = vmatprep.mubr.msk.f32.mxu1 %vm1816_vm10, %v3578_v3 }
 0x34b   :  { %v1715_v18 = vadd.s32 %v1714_v63, %v1712_v38  ;;  %v1725_v6 = vpop.xlane.xlu1 %1724 }
 0x34c   :  { %v1726_v56 = vcvt.f32.s32 %v1725_v6  ;;  %vm1817_vm11 = vcmp.eq.s32.totalorder %v4086_v14, %v1701_v52  ;;  %v3524_v6 = vld [vmem:[%s5554_s0 + $0x58] sm:$0xff] }
 0x34d   :  { %3465 = vmatmul.mubr.msk.f32.gmra.mrb[58].mxu1 %vm1817_vm11, %v3578_v3  ;;  %vm1818_vm12 = vcmp.eq.s32.totalorder %v4086_v14, %v1715_v18 }
 0x34e   :  { %v1729_v12 = vadd.s32 %v1728_v35, %v1726_v56  ;;  %3467 = vmatprep.mubr.msk.f32.mxu1 %vm1818_vm12, %v3578_v3  ;;  %v3525_v56 = vld [vmem:[%s5554_s0 + $0x50] sm:$0xff] }
 0x350   :  { %vm1819_vm13 = vcmp.eq.s32.totalorder %v4086_v14, %v1729_v12 }
 0x351   :  { %3468 = vmatmul.mubr.msk.f32.gmra.mrb[60].mxu1 %vm1819_vm13, %v3578_v3 }
 0x38c   :  { %v1739_v19 = vpop.xlane.xlu0 %1738 }
 0x38d   :  { %v1740_v9 = vcvt.f32.s32 %v1739_v19 }
 0x38f   :  { %v1743_v53 = vadd.s32 %v1742_v21, %v1740_v9  ;;  %v1753_v23 = vpop.xlane.xlu1 %1752 }
 0x390   :  { %v1754_v27 = vcvt.f32.s32 %v1753_v23  ;;  %v3526_v23 = vld [vmem:[%s5554_s0 + $0x68] sm:$0xff] }
 0x391   :  { %vm1820_vm14 = vcmp.eq.s32.totalorder %v4086_v14, %v1743_v53 }
 0x392   :  { %v1757_v10 = vadd.s32 %v1756_v15, %v1754_v27  ;;  %3470 = vmatprep.mubr.msk.f32.mxu1 %vm1820_vm14, %v3578_v3  ;;  %v3527_v27 = vld [vmem:[%s5554_s0 + $0x60] sm:$0xff] }
 0x394   :  { %vm1821_vm15 = vcmp.eq.s32.totalorder %v4086_v14, %v1757_v10  ;;  %v3515_v14 = vld [vmem:[%s5554_s0] sm:$0xff] }
 0x395   :  { %3471 = vmatmul.mubr.msk.f32.gmra.mrb[62].mxu1 %vm1821_vm15, %v3578_v3 }
 0x3ac   :  { %v3379_v44 = vpop.f32.mrb[0].mxu1 }
 0x3ad   :  { %2352 = vst [vmem:[%s5557_s4 + $0x8] sm:$0xff] %v3379_v44  ;;  %v2547_v57 = vsub.f32 %v3379_v44, %v3514_v58  ;;  %v2032_v54 = vpop.f32.mrb[1].mxu1 }
 0x3ae   :  { %2351 = vst [vmem:[%s5557_s4] sm:$0xff] %v2032_v54  ;;  %v2546_v3 = vsub.f32 %v2032_v54, %v3515_v14 }
 0x3af   :  { %v2867_v26 = vmul.f32 %v2547_v57, %v2547_v57 }
 0x3b0   :  { %v2866_v11 = vmul.f32 %v2546_v3, %v2546_v3  ;;  %v3382_v17 = vpop.f32.mrb[2].mxu1 }
 0x3b1   :  { %2354 = vst [vmem:[%s5557_s4 + $0x18] sm:$0xff] %v3382_v17  ;;  %v2042_v30 = vpop.f32.mrb[3].mxu1  ;;  %v2549_v31 = vsub.f32 %v3382_v17, %v3516_v16  ;;  %v3529_v17 = vld [vmem:[%s5554_s0 + $0x70] sm:$0xff] }
 0x3b2   :  { %v2930_v49 = vadd.f32 %v2867_v26, %v2866_v11  ;;  %2353 = vst [vmem:[%s5557_s4 + $0x10] sm:$0xff] %v2042_v30  ;;  %v2548_v47 = vsub.f32 %v2042_v30, %v3517_v4  ;;  %v3528_v26 = vld [vmem:[%s5554_s0 + $0x78] sm:$0xff] }
 0x3b3   :  { %v2869_v40 = vmul.f32 %v2549_v31, %v2549_v31 }
 0x3b4   :  { %v2868_v46 = vmul.f32 %v2548_v47, %v2548_v47  ;;  %v3385_v48 = vpop.f32.mrb[4].mxu1 }
 0x3b5   :  { %2356 = vst [vmem:[%s5557_s4 + $0x28] sm:$0xff] %v3385_v48  ;;  %v2052_v2 = vpop.f32.mrb[5].mxu1  ;;  %v2551_v41 = vsub.f32 %v3385_v48, %v3518_v32  ;;  %v3530_v48 = vld [vmem:[%s5554_s0 + $0x88] sm:$0xff] }
 0x3b6   :  { %v2931_v7 = vadd.f32 %v2930_v49, %v2868_v46  ;;  %2355 = vst [vmem:[%s5557_s4 + $0x20] sm:$0xff] %v2052_v2  ;;  %v2550_v39 = vsub.f32 %v2052_v2, %v3519_v25 }
 0x3b7   :  { %v2871_v13 = vmul.f32 %v2551_v41, %v2551_v41 }
 0x3b8   :  { %v2870_v43 = vmul.f32 %v2550_v39, %v2550_v39  ;;  %v2932_v5 = vadd.f32 %v2931_v7, %v2869_v40  ;;  %v3388_v59 = vpop.f32.mrb[6].mxu1  ;;  %v3531_v40 = vld [vmem:[%s5554_s0 + $0x80] sm:$0xff] }
 0x3b9   :  { %2358 = vst [vmem:[%s5557_s4 + $0x38] sm:$0xff] %v3388_v59  ;;  %v2062_v22 = vpop.f32.mrb[7].mxu1  ;;  %v2553_v45 = vsub.f32 %v3388_v59, %v3520_v42  ;;  %v3532_v59 = vld [vmem:[%s5554_s0 + $0x98] sm:$0xff] }
 0x3ba   :  { %v2933_v62 = vadd.f32 %v2932_v5, %v2870_v43  ;;  %2357 = vst [vmem:[%s5557_s4 + $0x30] sm:$0xff] %v2062_v22  ;;  %v2552_v1 = vsub.f32 %v2062_v22, %v3521_v24 }
 0x3bb   :  { %v2873_v29 = vmul.f32 %v2553_v45, %v2553_v45 }
 0x3bc   :  { %v2872_v33 = vmul.f32 %v2552_v1, %v2552_v1  ;;  %v2934_v8 = vadd.f32 %v2933_v62, %v2871_v13  ;;  %v3391_v34 = vpop.f32.mrb[8].mxu1  ;;  %v3533_v13 = vld [vmem:[%s5554_s0 + $0x90] sm:$0xff] }
 0x3bd   :  { %2360 = vst [vmem:[%s5557_s4 + $0x48] sm:$0xff] %v3391_v34  ;;  %v2072_v50 = vpop.f32.mrb[9].mxu1  ;;  %v2555_v51 = vsub.f32 %v3391_v34, %v3522_v60  ;;  %v3534_v34 = vld [vmem:[%s5554_s0 + $0xa8] sm:$0xff] }
 0x3be   :  { %v2935_v61 = vadd.f32 %v2934_v8, %v2872_v33  ;;  %2359 = vst [vmem:[%s5557_s4 + $0x40] sm:$0xff] %v2072_v50  ;;  %v2554_v37 = vsub.f32 %v2072_v50, %v3523_v20 }
 0x3bf   :  { %v2875_v52 = vmul.f32 %v2555_v51, %v2555_v51 }
 0x3c0   :  { %v2874_v28 = vmul.f32 %v2554_v37, %v2554_v37  ;;  %v2936_v0 = vadd.f32 %v2935_v61, %v2873_v29  ;;  %v3394_v63 = vpop.f32.mrb[10].mxu1  ;;  %v3535_v29 = vld [vmem:[%s5554_s0 + $0xa0] sm:$0xff] }
 0x3c1   :  { %2362 = vst [vmem:[%s5557_s4 + $0x58] sm:$0xff] %v3394_v63  ;;  %v2082_v38 = vpop.f32.mrb[11].mxu1  ;;  %v2557_v35 = vsub.f32 %v3394_v63, %v3524_v6  ;;  %v3536_v63 = vld [vmem:[%s5554_s0 + $0xb8] sm:$0xff] }
 0x3c2   :  { %v2937_v18 = vadd.f32 %v2936_v0, %v2874_v28  ;;  %2361 = vst [vmem:[%s5557_s4 + $0x50] sm:$0xff] %v2082_v38  ;;  %v2556_v12 = vsub.f32 %v2082_v38, %v3525_v56 }
 0x3c3   :  { %v2877_v9 = vmul.f32 %v2557_v35, %v2557_v35 }
 0x3c4   :  { %v2876_v36 = vmul.f32 %v2556_v12, %v2556_v12  ;;  %v2938_v55 = vadd.f32 %v2937_v18, %v2875_v52  ;;  %v3397_v19 = vpop.f32.mrb[12].mxu1  ;;  %v3537_v52 = vld [vmem:[%s5554_s0 + $0xb0] sm:$0xff] }
 0x3c5   :  { %2364 = vst [vmem:[%s5557_s4 + $0x68] sm:$0xff] %v3397_v19  ;;  %v2092_v21 = vpop.f32.mrb[13].mxu1  ;;  %v2559_v15 = vsub.f32 %v3397_v19, %v3526_v23  ;;  %v3538_v19 = vld [vmem:[%s5554_s0 + $0xc8] sm:$0xff] }
 0x3c6   :  { %v2939_v53 = vadd.f32 %v2938_v55, %v2876_v36  ;;  %2363 = vst [vmem:[%s5557_s4 + $0x60] sm:$0xff] %v2092_v21  ;;  %v2558_v10 = vsub.f32 %v2092_v21, %v3527_v27 }
 0x3c7   :  { %v2879_v14 = vmul.f32 %v2559_v15, %v2559_v15 }
 0x3c8   :  { %v2878_v44 = vmul.f32 %v2558_v10, %v2558_v10  ;;  %v2940_v58 = vadd.f32 %v2939_v53, %v2877_v9  ;;  %v3400_v57 = vpop.f32.mrb[14].mxu1  ;;  %v3539_v9 = vld [vmem:[%s5554_s0 + $0xc0] sm:$0xff] }
 0x3c9   :  { %2366 = vst [vmem:[%s5557_s4 + $0x78] sm:$0xff] %v3400_v57  ;;  %v2102_v54 = vpop.f32.mrb[15].mxu1  ;;  %v2561_v11 = vsub.f32 %v3400_v57, %v3528_v26  ;;  %v3540_v57 = vld [vmem:[%s5554_s0 + $0xd8] sm:$0xff] }
 0x3ca   :  { %v2941_v3 = vadd.f32 %v2940_v58, %v2878_v44  ;;  %2365 = vst [vmem:[%s5557_s4 + $0x70] sm:$0xff] %v2102_v54  ;;  %v2560_v30 = vsub.f32 %v2102_v54, %v3529_v17 }
 0x3cb   :  { %v2881_v47 = vmul.f32 %v2561_v11, %v2561_v11 }
 0x3cc   :  { %v2880_v49 = vmul.f32 %v2560_v30, %v2560_v30  ;;  %v2942_v16 = vadd.f32 %v2941_v3, %v2879_v14  ;;  %v3403_v31 = vpop.f32.mrb[16].mxu1  ;;  %v3541_v14 = vld [vmem:[%s5554_s0 + $0xd0] sm:$0xff] }
 0x3cd   :  { %2368 = vst [vmem:[%s5557_s4 + $0x88] sm:$0xff] %v3403_v31  ;;  %v2112_v4 = vpop.f32.mrb[17].mxu1  ;;  %v2563_v2 = vsub.f32 %v3403_v31, %v3530_v48  ;;  %v3542_v31 = vld [vmem:[%s5554_s0 + $0xe8] sm:$0xff] }
 0x3ce   :  { %v2943_v46 = vadd.f32 %v2942_v16, %v2880_v49  ;;  %2367 = vst [vmem:[%s5557_s4 + $0x80] sm:$0xff] %v2112_v4  ;;  %v2562_v7 = vsub.f32 %v2112_v4, %v3531_v40 }
 0x3cf   :  { %v2883_v43 = vmul.f32 %v2563_v2, %v2563_v2 }
 0x3d0   :  { %v2882_v32 = vmul.f32 %v2562_v7, %v2562_v7  ;;  %v2944_v41 = vadd.f32 %v2943_v46, %v2881_v47  ;;  %v3406_v25 = vpop.f32.mrb[18].mxu1  ;;  %v3543_v47 = vld [vmem:[%s5554_s0 + $0xe0] sm:$0xff] }
 0x3d1   :  { %2370 = vst [vmem:[%s5557_s4 + $0x98] sm:$0xff] %v3406_v25  ;;  %v2122_v39 = vpop.f32.mrb[19].mxu1  ;;  %v2565_v22 = vsub.f32 %v3406_v25, %v3532_v59  ;;  %v3544_v25 = vld [vmem:[%s5554_s0 + $0xf8] sm:$0xff] }
 0x3d2   :  { %v2945_v5 = vadd.f32 %v2944_v41, %v2882_v32  ;;  %2369 = vst [vmem:[%s5557_s4 + $0x90] sm:$0xff] %v2122_v39  ;;  %v2564_v62 = vsub.f32 %v2122_v39, %v3533_v13 }
 0x3d3   :  { %v2885_v33 = vmul.f32 %v2565_v22, %v2565_v22 }
 0x3d4   :  { %v2884_v42 = vmul.f32 %v2564_v62, %v2564_v62  ;;  %v2946_v45 = vadd.f32 %v2945_v5, %v2883_v43  ;;  %v3409_v24 = vpop.f32.mrb[20].mxu1  ;;  %v3545_v43 = vld [vmem:[%s5554_s0 + $0xf0] sm:$0xff] }
 0x3d5   :  { %2372 = vst [vmem:[%s5557_s4 + $0xa8] sm:$0xff] %v3409_v24  ;;  %v2132_v1 = vpop.f32.mrb[21].mxu1  ;;  %v2567_v50 = vsub.f32 %v3409_v24, %v3534_v34  ;;  %v3546_v24 = vld [vmem:[%s5554_s0 + $0x108] sm:$0xff] }
 0x3d6   :  { %v2947_v8 = vadd.f32 %v2946_v45, %v2884_v42  ;;  %2371 = vst [vmem:[%s5557_s4 + $0xa0] sm:$0xff] %v2132_v1  ;;  %v2566_v61 = vsub.f32 %v2132_v1, %v3535_v29 }
 0x3d7   :  { %v2887_v28 = vmul.f32 %v2567_v50, %v2567_v50 }
 0x3d8   :  { %v2886_v60 = vmul.f32 %v2566_v61, %v2566_v61  ;;  %v2948_v51 = vadd.f32 %v2947_v8, %v2885_v33  ;;  %v3412_v20 = vpop.f32.mrb[22].mxu1  ;;  %v3547_v33 = vld [vmem:[%s5554_s0 + $0x100] sm:$0xff] }
 0x3d9   :  { %2374 = vst [vmem:[%s5557_s4 + $0xb8] sm:$0xff] %v3412_v20  ;;  %v2142_v37 = vpop.f32.mrb[23].mxu1  ;;  %v2569_v38 = vsub.f32 %v3412_v20, %v3536_v63  ;;  %v3548_v20 = vld [vmem:[%s5554_s0 + $0x118] sm:$0xff] }
 0x3da   :  { %v2949_v0 = vadd.f32 %v2948_v51, %v2886_v60  ;;  %2373 = vst [vmem:[%s5557_s4 + $0xb0] sm:$0xff] %v2142_v37  ;;  %v2568_v18 = vsub.f32 %v2142_v37, %v3537_v52 }
 0x3db   :  { %v2889_v36 = vmul.f32 %v2569_v38, %v2569_v38 }
 0x3dc   :  { %v2888_v6 = vmul.f32 %v2568_v18, %v2568_v18  ;;  %v2950_v35 = vadd.f32 %v2949_v0, %v2887_v28  ;;  %v3415_v56 = vpop.f32.mrb[24].mxu1  ;;  %v3549_v28 = vld [vmem:[%s5554_s0 + $0x110] sm:$0xff] }
 0x3dd   :  { %2376 = vst [vmem:[%s5557_s4 + $0xc8] sm:$0xff] %v3415_v56  ;;  %v2152_v12 = vpop.f32.mrb[25].mxu1  ;;  %v2571_v21 = vsub.f32 %v3415_v56, %v3538_v19  ;;  %v3550_v56 = vld [vmem:[%s5554_s0 + $0x128] sm:$0xff] }
 0x3de   :  { %v2951_v55 = vadd.f32 %v2950_v35, %v2888_v6  ;;  %2375 = vst [vmem:[%s5557_s4 + $0xc0] sm:$0xff] %v2152_v12  ;;  %v2570_v53 = vsub.f32 %v2152_v12, %v3539_v9 }
 0x3df   :  { %v2891_v44 = vmul.f32 %v2571_v21, %v2571_v21 }
 0x3e0   :  { %v2890_v23 = vmul.f32 %v2570_v53, %v2570_v53  ;;  %v2952_v15 = vadd.f32 %v2951_v55, %v2889_v36  ;;  %v3418_v27 = vpop.f32.mrb[26].mxu1  ;;  %v3551_v36 = vld [vmem:[%s5554_s0 + $0x120] sm:$0xff] }
 0x3e1   :  { %2378 = vst [vmem:[%s5557_s4 + $0xd8] sm:$0xff] %v3418_v27  ;;  %v2162_v10 = vpop.f32.mrb[27].mxu1  ;;  %v2573_v54 = vsub.f32 %v3418_v27, %v3540_v57  ;;  %v3552_v27 = vld [vmem:[%s5554_s0 + $0x138] sm:$0xff] }
 0x3e2   :  { %v2953_v58 = vadd.f32 %v2952_v15, %v2890_v23  ;;  %2377 = vst [vmem:[%s5557_s4 + $0xd0] sm:$0xff] %v2162_v10  ;;  %v2572_v3 = vsub.f32 %v2162_v10, %v3541_v14 }
 0x3e3   :  { %v2893_v49 = vmul.f32 %v2573_v54, %v2573_v54 }
 0x3e4   :  { %v2892_v26 = vmul.f32 %v2572_v3, %v2572_v3  ;;  %v2954_v11 = vadd.f32 %v2953_v58, %v2891_v44  ;;  %v3421_v17 = vpop.f32.mrb[28].mxu1  ;;  %v3553_v44 = vld [vmem:[%s5554_s0 + $0x130] sm:$0xff] }
 0x3e5   :  { %2380 = vst [vmem:[%s5557_s4 + $0xe8] sm:$0xff] %v3421_v17  ;;  %v2172_v30 = vpop.f32.mrb[29].mxu1  ;;  %v2575_v4 = vsub.f32 %v3421_v17, %v3542_v31  ;;  %v3554_v17 = vld [vmem:[%s5554_s0 + $0x148] sm:$0xff] }
 0x3e6   :  { %v2955_v16 = vadd.f32 %v2954_v11, %v2892_v26  ;;  %2379 = vst [vmem:[%s5557_s4 + $0xe0] sm:$0xff] %v2172_v30  ;;  %v2574_v46 = vsub.f32 %v2172_v30, %v3543_v47 }
 0x3e7   :  { %v2895_v32 = vmul.f32 %v2575_v4, %v2575_v4 }
 0x3e8   :  { %v2894_v48 = vmul.f32 %v2574_v46, %v2574_v46  ;;  %v2956_v2 = vadd.f32 %v2955_v16, %v2893_v49  ;;  %v3424_v40 = vpop.f32.mrb[30].mxu1  ;;  %v3555_v49 = vld [vmem:[%s5554_s0 + $0x140] sm:$0xff] }
 0x3e9   :  { %2382 = vst [vmem:[%s5557_s4 + $0xf8] sm:$0xff] %v3424_v40  ;;  %v2182_v7 = vpop.f32.mrb[31].mxu1  ;;  %v2577_v39 = vsub.f32 %v3424_v40, %v3544_v25  ;;  %v3556_v40 = vld [vmem:[%s5554_s0 + $0x158] sm:$0xff] }
 0x3ea   :  { %v2957_v41 = vadd.f32 %v2956_v2, %v2894_v48  ;;  %2381 = vst [vmem:[%s5557_s4 + $0xf0] sm:$0xff] %v2182_v7  ;;  %v2576_v5 = vsub.f32 %v2182_v7, %v3545_v43 }
 0x3eb   :  { %v2897_v42 = vmul.f32 %v2577_v39, %v2577_v39 }
 0x3ec   :  { %v2896_v59 = vmul.f32 %v2576_v5, %v2576_v5  ;;  %v2958_v22 = vadd.f32 %v2957_v41, %v2895_v32  ;;  %v3427_v13 = vpop.f32.mrb[32].mxu1  ;;  %v3557_v32 = vld [vmem:[%s5554_s0 + $0x150] sm:$0xff] }
 0x3ed   :  { %2384 = vst [vmem:[%s5557_s4 + $0x108] sm:$0xff] %v3427_v13  ;;  %v2192_v62 = vpop.f32.mrb[33].mxu1  ;;  %v2579_v1 = vsub.f32 %v3427_v13, %v3546_v24  ;;  %v3558_v13 = vld [vmem:[%s5554_s0 + $0x168] sm:$0xff] }
 0x3ee   :  { %v2959_v45 = vadd.f32 %v2958_v22, %v2896_v59  ;;  %2383 = vst [vmem:[%s5557_s4 + $0x100] sm:$0xff] %v2192_v62  ;;  %v2578_v8 = vsub.f32 %v2192_v62, %v3547_v33 }
 0x3ef   :  { %v2899_v60 = vmul.f32 %v2579_v1, %v2579_v1 }
 0x3f0   :  { %v2898_v34 = vmul.f32 %v2578_v8, %v2578_v8  ;;  %v2960_v50 = vadd.f32 %v2959_v45, %v2897_v42  ;;  %v3430_v29 = vpop.f32.mrb[34].mxu1  ;;  %v3559_v42 = vld [vmem:[%s5554_s0 + $0x160] sm:$0xff] }
 0x3f1   :  { %2386 = vst [vmem:[%s5557_s4 + $0x118] sm:$0xff] %v3430_v29  ;;  %v2202_v61 = vpop.f32.mrb[35].mxu1  ;;  %v2581_v37 = vsub.f32 %v3430_v29, %v3548_v20  ;;  %v3560_v29 = vld [vmem:[%s5554_s0 + $0x178] sm:$0xff] }
 0x3f2   :  { %v2961_v51 = vadd.f32 %v2960_v50, %v2898_v34  ;;  %2385 = vst [vmem:[%s5557_s4 + $0x110] sm:$0xff] %v2202_v61  ;;  %v2580_v0 = vsub.f32 %v2202_v61, %v3549_v28 }
 0x3f3   :  { %v2901_v6 = vmul.f32 %v2581_v37, %v2581_v37 }
 0x3f4   :  { %v2900_v63 = vmul.f32 %v2580_v0, %v2580_v0  ;;  %v2962_v38 = vadd.f32 %v2961_v51, %v2899_v60  ;;  %v3433_v52 = vpop.f32.mrb[36].mxu1  ;;  %v3561_v60 = vld [vmem:[%s5554_s0 + $0x170] sm:$0xff] }
 0x3f5   :  { %2388 = vst [vmem:[%s5557_s4 + $0x128] sm:$0xff] %v3433_v52  ;;  %v2212_v18 = vpop.f32.mrb[37].mxu1  ;;  %v2583_v12 = vsub.f32 %v3433_v52, %v3550_v56  ;;  %v3562_v52 = vld [vmem:[%s5554_s0 + $0x188] sm:$0xff] }
 0x3f6   :  { %v2963_v35 = vadd.f32 %v2962_v38, %v2900_v63  ;;  %2387 = vst [vmem:[%s5557_s4 + $0x120] sm:$0xff] %v2212_v18  ;;  %v2582_v55 = vsub.f32 %v2212_v18, %v3551_v36 }
 0x3f7   :  { %v2903_v23 = vmul.f32 %v2583_v12, %v2583_v12 }
 0x3f8   :  { %v2902_v19 = vmul.f32 %v2582_v55, %v2582_v55  ;;  %v2964_v21 = vadd.f32 %v2963_v35, %v2901_v6  ;;  %v3436_v9 = vpop.f32.mrb[38].mxu1  ;;  %v3563_v6 = vld [vmem:[%s5554_s0 + $0x180] sm:$0xff] }
 0x3f9   :  { %2390 = vst [vmem:[%s5557_s4 + $0x138] sm:$0xff] %v3436_v9  ;;  %v2222_v53 = vpop.f32.mrb[39].mxu1  ;;  %v2585_v10 = vsub.f32 %v3436_v9, %v3552_v27  ;;  %v3564_v9 = vld [vmem:[%s5554_s0 + $0x198] sm:$0xff] }
 0x3fa   :  { %v2965_v15 = vadd.f32 %v2964_v21, %v2902_v19  ;;  %2389 = vst [vmem:[%s5557_s4 + $0x130] sm:$0xff] %v2222_v53  ;;  %v2584_v58 = vsub.f32 %v2222_v53, %v3553_v44 }
 0x3fb   :  { %v2905_v26 = vmul.f32 %v2585_v10, %v2585_v10 }
 0x3fc   :  { %v2904_v57 = vmul.f32 %v2584_v58, %v2584_v58  ;;  %v2966_v54 = vadd.f32 %v2965_v15, %v2903_v23  ;;  %v3439_v14 = vpop.f32.mrb[40].mxu1  ;;  %v3565_v23 = vld [vmem:[%s5554_s0 + $0x190] sm:$0xff] }
 0x3fd   :  { %2392 = vst [vmem:[%s5557_s4 + $0x148] sm:$0xff] %v3439_v14  ;;  %v2232_v3 = vpop.f32.mrb[41].mxu1  ;;  %v2587_v30 = vsub.f32 %v3439_v14, %v3554_v17  ;;  %v3566_v14 = vld [vmem:[%s5554_s0 + $0x1a8] sm:$0xff] }
 0x3fe   :  { %v2967_v11 = vadd.f32 %v2966_v54, %v2904_v57  ;;  %2391 = vst [vmem:[%s5557_s4 + $0x140] sm:$0xff] %v2232_v3  ;;  %v2586_v16 = vsub.f32 %v2232_v3, %v3555_v49 }
 0x3ff   :  { %v2907_v48 = vmul.f32 %v2587_v30, %v2587_v30 }
 0x400   :  { %v2906_v31 = vmul.f32 %v2586_v16, %v2586_v16  ;;  %v2968_v4 = vadd.f32 %v2967_v11, %v2905_v26  ;;  %v3442_v47 = vpop.f32.mrb[42].mxu1  ;;  %v3567_v26 = vld [vmem:[%s5554_s0 + $0x1a0] sm:$0xff] }
 0x401   :  { %2394 = vst [vmem:[%s5557_s4 + $0x158] sm:$0xff] %v3442_v47  ;;  %v2242_v46 = vpop.f32.mrb[43].mxu1  ;;  %v2589_v7 = vsub.f32 %v3442_v47, %v3556_v40  ;;  %v3568_v47 = vld [vmem:[%s5554_s0 + $0x1b8] sm:$0xff] }
 0x402   :  { %v2969_v2 = vadd.f32 %v2968_v4, %v2906_v31  ;;  %2393 = vst [vmem:[%s5557_s4 + $0x150] sm:$0xff] %v2242_v46  ;;  %v2588_v41 = vsub.f32 %v2242_v46, %v3557_v32 }
 0x403   :  { %v2909_v59 = vmul.f32 %v2589_v7, %v2589_v7 }
 0x404   :  { %v2908_v25 = vmul.f32 %v2588_v41, %v2588_v41  ;;  %v2970_v39 = vadd.f32 %v2969_v2, %v2907_v48  ;;  %v3445_v43 = vpop.f32.mrb[44].mxu1  ;;  %v3569_v48 = vld [vmem:[%s5554_s0 + $0x1b0] sm:$0xff] }
 0x405   :  { %2396 = vst [vmem:[%s5557_s4 + $0x168] sm:$0xff] %v3445_v43  ;;  %v2252_v5 = vpop.f32.mrb[45].mxu1  ;;  %v2591_v62 = vsub.f32 %v3445_v43, %v3558_v13  ;;  %v3570_v43 = vld [vmem:[%s5554_s0 + $0x1c8] sm:$0xff] }
 0x406   :  { %v2971_v22 = vadd.f32 %v2970_v39, %v2908_v25  ;;  %2395 = vst [vmem:[%s5557_s4 + $0x160] sm:$0xff] %v2252_v5  ;;  %v2590_v45 = vsub.f32 %v2252_v5, %v3559_v42 }
 0x407   :  { %v2911_v34 = vmul.f32 %v2591_v62, %v2591_v62 }
 0x408   :  { %v2910_v24 = vmul.f32 %v2590_v45, %v2590_v45  ;;  %v2972_v1 = vadd.f32 %v2971_v22, %v2909_v59  ;;  %v3448_v33 = vpop.f32.mrb[46].mxu1  ;;  %v3571_v59 = vld [vmem:[%s5554_s0 + $0x1c0] sm:$0xff] }
 0x409   :  { %2398 = vst [vmem:[%s5557_s4 + $0x178] sm:$0xff] %v3448_v33  ;;  %v2262_v8 = vpop.f32.mrb[47].mxu1  ;;  %v2593_v61 = vsub.f32 %v3448_v33, %v3560_v29  ;;  %v3572_v33 = vld [vmem:[%s5554_s0 + $0x1d8] sm:$0xff] }
 0x40a   :  { %v2973_v50 = vadd.f32 %v2972_v1, %v2910_v24  ;;  %2397 = vst [vmem:[%s5557_s4 + $0x170] sm:$0xff] %v2262_v8  ;;  %v2592_v51 = vsub.f32 %v2262_v8, %v3561_v60 }
 0x40b   :  { %v2913_v63 = vmul.f32 %v2593_v61, %v2593_v61 }
 0x40c   :  { %v2912_v20 = vmul.f32 %v2592_v51, %v2592_v51  ;;  %v2974_v37 = vadd.f32 %v2973_v50, %v2911_v34  ;;  %v3451_v28 = vpop.f32.mrb[48].mxu1  ;;  %v3573_v34 = vld [vmem:[%s5554_s0 + $0x1d0] sm:$0xff] }
 0x40d   :  { %2400 = vst [vmem:[%s5557_s4 + $0x188] sm:$0xff] %v3451_v28  ;;  %v2272_v0 = vpop.f32.mrb[49].mxu1  ;;  %v2595_v18 = vsub.f32 %v3451_v28, %v3562_v52  ;;  %v3574_v28 = vld [vmem:[%s5554_s0 + $0x1e8] sm:$0xff] }
 0x40e   :  { %v2975_v38 = vadd.f32 %v2974_v37, %v2912_v20  ;;  %2399 = vst [vmem:[%s5557_s4 + $0x180] sm:$0xff] %v2272_v0  ;;  %v2594_v35 = vsub.f32 %v2272_v0, %v3563_v6 }
 0x40f   :  { %v2915_v19 = vmul.f32 %v2595_v18, %v2595_v18 }
 0x410   :  { %v2914_v56 = vmul.f32 %v2594_v35, %v2594_v35  ;;  %v2976_v12 = vadd.f32 %v2975_v38, %v2913_v63  ;;  %v3454_v36 = vpop.f32.mrb[50].mxu1  ;;  %v3575_v63 = vld [vmem:[%s5554_s0 + $0x1e0] sm:$0xff] }
 0x411   :  { %2402 = vst [vmem:[%s5557_s4 + $0x198] sm:$0xff] %v3454_v36  ;;  %v2282_v55 = vpop.f32.mrb[51].mxu1  ;;  %v2597_v53 = vsub.f32 %v3454_v36, %v3564_v9 }
 0x412   :  { %v2977_v21 = vadd.f32 %v2976_v12, %v2914_v56  ;;  %2401 = vst [vmem:[%s5557_s4 + $0x190] sm:$0xff] %v2282_v55  ;;  %v2596_v15 = vsub.f32 %v2282_v55, %v3565_v23  ;;  %v3576_v55 = vld [vmem:[%s5554_s0 + $0x1f8] sm:$0xff] }
 0x413   :  { %v2917_v57 = vmul.f32 %v2597_v53, %v2597_v53 }
 0x414   :  { %v2916_v27 = vmul.f32 %v2596_v15, %v2596_v15  ;;  %v2978_v10 = vadd.f32 %v2977_v21, %v2915_v19  ;;  %v3457_v44 = vpop.f32.mrb[52].mxu1  ;;  %v3577_v21 = vld [vmem:[%s5554_s0 + $0x1f0] sm:$0xff] }
 0x415   :  { %2404 = vst [vmem:[%s5557_s4 + $0x1a8] sm:$0xff] %v3457_v44  ;;  %v2292_v58 = vpop.f32.mrb[53].mxu1  ;;  %v2599_v3 = vsub.f32 %v3457_v44, %v3566_v14 }
 0x416   :  { %v2979_v54 = vadd.f32 %v2978_v10, %v2916_v27  ;;  %2403 = vst [vmem:[%s5557_s4 + $0x1a0] sm:$0xff] %v2292_v58  ;;  %v2598_v11 = vsub.f32 %v2292_v58, %v3567_v26 }
 0x417   :  { %v2919_v31 = vmul.f32 %v2599_v3, %v2599_v3 }
 0x418   :  { %v2918_v17 = vmul.f32 %v2598_v11, %v2598_v11  ;;  %v2980_v30 = vadd.f32 %v2979_v54, %v2917_v57  ;;  %v3460_v49 = vpop.f32.mrb[54].mxu1 }
 0x419   :  { %2406 = vst [vmem:[%s5557_s4 + $0x1b8] sm:$0xff] %v3460_v49  ;;  %v2302_v16 = vpop.f32.mrb[55].mxu1  ;;  %v2601_v46 = vsub.f32 %v3460_v49, %v3568_v47 }
 0x41a   :  { %v2981_v4 = vadd.f32 %v2980_v30, %v2918_v17  ;;  %2405 = vst [vmem:[%s5557_s4 + $0x1b0] sm:$0xff] %v2302_v16  ;;  %v2600_v2 = vsub.f32 %v2302_v16, %v3569_v48 }
 0x41b   :  { %v2921_v25 = vmul.f32 %v2601_v46, %v2601_v46 }
 0x41c   :  { %v2920_v40 = vmul.f32 %v2600_v2, %v2600_v2  ;;  %v2982_v7 = vadd.f32 %v2981_v4, %v2919_v31  ;;  %v3463_v32 = vpop.f32.mrb[56].mxu1 }
 0x41d   :  { %2408 = vst [vmem:[%s5557_s4 + $0x1c8] sm:$0xff] %v3463_v32  ;;  %v2312_v41 = vpop.f32.mrb[57].mxu1  ;;  %v2603_v5 = vsub.f32 %v3463_v32, %v3570_v43 }
 0x41e   :  { %v2983_v39 = vadd.f32 %v2982_v7, %v2920_v40  ;;  %2407 = vst [vmem:[%s5557_s4 + $0x1c0] sm:$0xff] %v2312_v41  ;;  %v2602_v22 = vsub.f32 %v2312_v41, %v3571_v59 }
 0x41f   :  { %v2923_v24 = vmul.f32 %v2603_v5, %v2603_v5 }
 0x420   :  { %v2922_v13 = vmul.f32 %v2602_v22, %v2602_v22  ;;  %v2984_v62 = vadd.f32 %v2983_v39, %v2921_v25  ;;  %v3466_v42 = vpop.f32.mrb[58].mxu1 }
 0x421   :  { %2410 = vst [vmem:[%s5557_s4 + $0x1d8] sm:$0xff] %v3466_v42  ;;  %v2322_v45 = vpop.f32.mrb[59].mxu1  ;;  %v2605_v8 = vsub.f32 %v3466_v42, %v3572_v33 }
 0x422   :  { %v2985_v1 = vadd.f32 %v2984_v62, %v2922_v13  ;;  %2409 = vst [vmem:[%s5557_s4 + $0x1d0] sm:$0xff] %v2322_v45  ;;  %v2604_v50 = vsub.f32 %v2322_v45, %v3573_v34 }
 0x423   :  { %v2925_v20 = vmul.f32 %v2605_v8, %v2605_v8 }
 0x424   :  { %v2924_v29 = vmul.f32 %v2604_v50, %v2604_v50  ;;  %v2986_v61 = vadd.f32 %v2985_v1, %v2923_v24  ;;  %v3469_v60 = vpop.f32.mrb[60].mxu1 }
 0x425   :  { %2412 = vst [vmem:[%s5557_s4 + $0x1e8] sm:$0xff] %v3469_v60  ;;  %v2332_v51 = vpop.f32.mrb[61].mxu1  ;;  %v2607_v0 = vsub.f32 %v3469_v60, %v3574_v28 }
 0x426   :  { %v2987_v37 = vadd.f32 %v2986_v61, %v2924_v29  ;;  %2411 = vst [vmem:[%s5557_s4 + $0x1e0] sm:$0xff] %v2332_v51  ;;  %v2606_v38 = vsub.f32 %v2332_v51, %v3575_v63 }
 0x427   :  { %v2927_v6 = vmul.f32 %v2607_v0, %v2607_v0 }
 0x428   :  { %v2926_v52 = vmul.f32 %v2606_v38, %v2606_v38  ;;  %v2988_v18 = vadd.f32 %v2987_v37, %v2925_v20 }
 0x42a   :  { %v2989_v35 = vadd.f32 %v2988_v18, %v2926_v52 }
 0x42c   :  { %v2990_v56 = vadd.f32 %v2989_v35, %v2927_v6 }
 0x468   :  { %v3472_v12 = vpop.f32.mrb[62].mxu1 }
 0x469   :  { %2414 = vst [vmem:[%s5557_s4 + $0x1f8] sm:$0xff] %v3472_v12  ;;  %v2342_v36 = vpop.f32.mrb[63].mxu1  ;;  %v2609_v19 = vsub.f32 %v3472_v12, %v3576_v55 }
 0x46a   :  { %2413 = vst [vmem:[%s5557_s4 + $0x1f0] sm:$0xff] %v2342_v36  ;;  %v2608_v9 = vsub.f32 %v2342_v36, %v3577_v21 }
 0x46b   :  { %v2929_v23 = vmul.f32 %v2609_v19, %v2609_v19 }
 0x46c   :  { %v2928_v53 = vmul.f32 %v2608_v9, %v2608_v9 }
 0x46e   :  { %v2991_v15 = vadd.f32 %v2990_v56, %v2928_v53 }
 0x470   :  { %v2992_v27 = vadd.f32 %v2991_v15, %v2929_v23 }
 0x472   :  { %v2993_v10 = vrot.slane %v2992_v27, 4 }
 0x474   :  { %v2994_v44 = vadd.f32 %v2993_v10, %v2992_v27 }
 0x476   :  { %v2995_v58 = vrot.slane %v2994_v44, 2 }
 0x478   :  { %v2996_v57 = vadd.f32 %v2995_v58, %v2994_v44 }
 0x47a   :  { %v2997_v54 = vrot.slane %v2996_v57, 1 }
 0x47c   :  { %v2998_v14 = vadd.f32 %v2997_v54, %v2996_v57 }
 0x47e   :  { %2999 = vst [vmem:[%s5558_s5] sm:$0x1] %v2998_v14 }

</bundles_post_ra>
